<compile_context>
chip_gen: v7x
topology: tpu7x:2x2x1
jax: 0.10.0
libtpu: 0.0.40
codegen_flags: <defaults>
</compile_context>

<pallas_src>
import jax
import jax.numpy as jnp
from jax.experimental import pallas as pl
from jax.experimental.pallas import tpu as pltpu  # noqa: F401  (TPU backend)

NUM_HIDDENS = 256          # fixed by the PyTorch module
NUM_HEADS = 4
HEAD_DIM = NUM_HIDDENS // NUM_HEADS
FFN_HIDDEN = 1024
LN_EPS = 1e-5
NEG_INF = -1e30            # finite mask fill: no NaN rows


# ---------------------------------------------------------------------------
# in-kernel helpers (traced inside the Pallas kernel body)
# ---------------------------------------------------------------------------
def _layer_norm(x, gamma, beta):
    # LayerNorm over the hidden axis, biased variance, eps=1e-5 (f32 math)
    mu = jnp.mean(x, axis=-1, keepdims=True)
    var = jnp.mean((x - mu) ** 2, axis=-1, keepdims=True)
    return (x - mu) * jax.lax.rsqrt(var + LN_EPS) * gamma + beta


def _mha_core(q, k, v, wo_ref, bias, bsz, t_q, t_k):
    """Multi-head attention given already-projected Q/K/V.

    q: (bsz*t_q, D) f32, k/v: (bsz*t_k, D) f32, wo_ref: (D, D) bf16 ref,
    bias: (bsz, t_q, t_k) f32 additive mask (0 keep / -1e30 drop).
    Returns (bsz*t_q, D) f32.
    """
    scale = 1.0 / (HEAD_DIM ** 0.5)
    out = jnp.zeros((bsz * t_q, NUM_HIDDENS), jnp.float32)
    for h in range(NUM_HEADS):                     # static 4-iteration loop
        sl = slice(h * HEAD_DIM, (h + 1) * HEAD_DIM)
        # leading-dim reshapes only (lane dim unchanged) -> cheap
        qh = q[:, sl].reshape(bsz, t_q, HEAD_DIM).astype(jnp.bfloat16)
        kh = k[:, sl].reshape(bsz, t_k, HEAD_DIM).astype(jnp.bfloat16)
        vh = v[:, sl].reshape(bsz, t_k, HEAD_DIM).astype(jnp.bfloat16)
        # scores for the whole batch at once; additive mask bias (no select)
        s = jnp.einsum('bqd,bkd->bqk', qh, kh,
                       preferred_element_type=jnp.float32) * scale + bias
        s = s - jnp.max(s, axis=-1, keepdims=True)
        e = jnp.exp(s)
        p = e * pl.reciprocal(jnp.sum(e, axis=-1, keepdims=True), approx=True)
        oh = jnp.einsum('bqk,bkd->bqd', p.astype(jnp.bfloat16), vh,
                        preferred_element_type=jnp.float32)   # (bsz, t_q, 64)
        # accumulate directly into the output projection (no head concat)
        out = out + jnp.dot(
            oh.reshape(bsz * t_q, HEAD_DIM).astype(jnp.bfloat16),
            wo_ref[sl, :], preferred_element_type=jnp.float32)
    return out


# ---------------------------------------------------------------------------
# fused decoder-block kernel (single grid step, whole batch in one block)
# ---------------------------------------------------------------------------
def decoder_block_kernel(self_b_ref, cross_b_ref, x_t_ref, x_en_ref,
                         wqkv1_ref, wo1_ref, wq2_ref, wkv2_ref, wo2_ref,
                         wff1_ref, wff2_ref, ln_ref, out_ref):
    B, T, D = x_t_ref.shape
    S = x_en_ref.shape[1]

    x = x_t_ref[...].reshape(B * T, D)               # (BT, D) f32 residual stream
    x_bf = x.astype(jnp.bfloat16)
    xen_bf = x_en_ref[...].reshape(B * S, D).astype(jnp.bfloat16)
    ln = ln_ref[...]                                 # (6, D) f32 packed LN params

    # ---- 1. masked multi-head self-attention + AddNorm ----
    qkv = jnp.dot(x_bf, wqkv1_ref[...],
                  preferred_element_type=jnp.float32)          # (BT, 3D) f32
    x1 = _mha_core(qkv[:, :D], qkv[:, D:2 * D], qkv[:, 2 * D:],
                   wo1_ref, self_b_ref[...], B, T, T)
    x = x + _layer_norm(x1, ln[0:1, :], ln[1:2, :])
    # TODO(synk): nn.Dropout(0.1) in AddNorm is identity (eval mode); training
    # dropout would need pltpu.prng_* and is not implemented.

    # ---- 2. cross-attention + AddNorm ----
    q2 = jnp.dot(x.astype(jnp.bfloat16), wq2_ref[...],
                 preferred_element_type=jnp.float32)           # (BT, D)
    kv2 = jnp.dot(xen_bf, wkv2_ref[...],
                  preferred_element_type=jnp.float32)          # (BS, 2D)
    x2 = _mha_core(q2, kv2[:, :D], kv2[:, D:], wo2_ref, cross_b_ref[...],
                   B, T, S)
    x = x + _layer_norm(x2, ln[2:3, :], ln[3:4, :])

    # ---- 3. position-wise FFN: relu(relu(x W1) W2) + AddNorm ----
    h1 = jnp.maximum(jnp.dot(x.astype(jnp.bfloat16), wff1_ref[...],
                             preferred_element_type=jnp.float32), 0.0)
    x3 = jnp.maximum(jnp.dot(h1.astype(jnp.bfloat16), wff2_ref[...],
                             preferred_element_type=jnp.float32), 0.0)
    x = x + _layer_norm(x3, ln[4:5, :], ln[5:6, :])

    out_ref[...] = x.reshape(B, T, D).astype(out_ref.dtype)


# ---------------------------------------------------------------------------
# one-time weight preparation (hoisted OUT of the per-call hot path)
# ---------------------------------------------------------------------------
def prepare_params(params):
    (wq1, wk1, wv1, wo1, wq2, wk2, wv2, wo2,
     wff1, wff2, g1, b1, g2, b2, g3, b3) = params
    bf16 = jnp.bfloat16
    w_qkv1 = jnp.concatenate([wq1, wk1, wv1], axis=1).astype(bf16)   # (D, 3D)
    w_kv2 = jnp.concatenate([wk2, wv2], axis=1).astype(bf16)         # (D, 2D)
    ln = jnp.stack([g1, b1, g2, b2, g3, b3], axis=0).astype(jnp.float32)  # (6, D)
    return (w_qkv1, wo1.astype(bf16), wq2.astype(bf16), w_kv2,
            wo2.astype(bf16), wff1.astype(bf16), wff2.astype(bf16), ln)


# ---------------------------------------------------------------------------
# wrapper: build additive mask biases, single-step pallas_call
# ---------------------------------------------------------------------------
@jax.jit
def decoder_block(x_t, o_m, x_en, i_m, prepared):
    w_qkv1, w_o1, w_q2, w_kv2, w_o2, w_f1, w_f2, ln = prepared
    B, T, D = x_t.shape
    S = x_en.shape[1]
    assert D == NUM_HIDDENS and T <= 12     # module's tril mask is 12x12

    # additive attention-mask biases (0 keep / -1e30 drop), precomputed in JAX
    tril = jnp.tril(jnp.ones((T, T), jnp.float32))
    self_keep = o_m.astype(jnp.float32)[:, None, :] * tril[None, :, :]   # (B,T,T)
    self_bias = jnp.where(self_keep != 0.0, 0.0, NEG_INF).astype(jnp.float32)
    cross_bias = jnp.where(i_m.astype(jnp.float32)[:, None, :] != 0.0,
                           0.0, NEG_INF)
    cross_bias = jnp.broadcast_to(cross_bias, (B, T, S)).astype(jnp.float32)

    # Single grid step: whole (B*T, D) slab is one MXU-friendly block; avoids
    # the serial half-fill steps on single-TensorCore v5e/v6e.
    def zero2(b):
        return (0, 0)

    def zero3(b):
        return (0, 0, 0)

    in_specs = [
        pl.BlockSpec((B, T, T), zero3),        # self-attn additive bias
        pl.BlockSpec((B, T, S), zero3),        # cross-attn additive bias
        pl.BlockSpec((B, T, D), zero3),        # X_t (f32 residual stream)
        pl.BlockSpec((B, S, D), zero3),        # X_en (f32)
        pl.BlockSpec((D, 3 * D), zero2),       # fused Wq|Wk|Wv (self)
        pl.BlockSpec((D, D), zero2),           # Wo (self)
        pl.BlockSpec((D, D), zero2),           # Wq (cross)
        pl.BlockSpec((D, 2 * D), zero2),       # fused Wk|Wv (cross)
        pl.BlockSpec((D, D), zero2),           # Wo (cross)
        pl.BlockSpec((D, FFN_HIDDEN), zero2),  # FFN W1
        pl.BlockSpec((FFN_HIDDEN, D), zero2),  # FFN W2
        pl.BlockSpec((6, D), zero2),           # packed LayerNorm gamma/beta x3
    ]
    out_spec = pl.BlockSpec((B, T, D), zero3)

    return pl.pallas_call(
        decoder_block_kernel,
        out_shape=jax.ShapeDtypeStruct((B, T, D), x_t.dtype),
        grid=(1,),
        in_specs=in_specs,
        out_specs=out_spec,
    )(self_bias, cross_bias, x_t, x_en,
      w_qkv1, w_o1, w_q2, w_kv2, w_o2, w_f1, w_f2, ln)


# ---------------------------------------------------------------------------
# pure-JAX f32 reference (mirrors the PyTorch forward, eval-mode dropout)
# ---------------------------------------------------------------------------
def reference_decoder_block(x_t, o_m, x_en, i_m, params):
    (wq1, wk1, wv1, wo1, wq2, wk2, wv2, wo2,
     wff1, wff2, g1, b1, g2, b2, g3, b3) = params
    B, T, D = x_t.shape
    S = x_en.shape[1]

    def ln(x, g, bb):
        mu = x.mean(-1, keepdims=True)
        var = ((x - mu) ** 2).mean(-1, keepdims=True)
        return (x - mu) / jnp.sqrt(var + LN_EPS) * g + bb

    def split_heads(y):
        b, t, _ = y.shape
        return y.reshape(b, t, NUM_HEADS, HEAD_DIM).transpose(0, 2, 1, 3)

    def mha(xq, xkv, wq, wk, wv, wo, mask):
        q = split_heads(xq @ wq)
        k = split_heads(xkv @ wk)
        v = split_heads(xkv @ wv)
        a = q @ k.transpose(0, 1, 3, 2) / (HEAD_DIM ** 0.5)
        a = jnp.where(mask[:, None, :, :] != 0, a, -jnp.inf)
        a = jax.nn.softmax(a, axis=-1)
        o = (a @ v).transpose(0, 2, 1, 3).reshape(xq.shape[0], xq.shape[1], D)
        return o @ wo

    tril = jnp.tril(jnp.ones((T, T), jnp.float32))
    self_mask = o_m[:, None, :] * tril[None]
    x = x_t + ln(mha(x_t, x_t, wq1, wk1, wv1, wo1, self_mask), g1, b1)
    cross_mask = jnp.broadcast_to(i_m[:, None, :], (B, T, S))
    x = x + ln(mha(x, x_en, wq2, wk2, wv2, wo2, cross_mask), g2, b2)
    x3 = jnp.maximum(jnp.maximum(x @ wff1, 0.0) @ wff2, 0.0)
    x = x + ln(x3, g3, b3)
    return x


# ---------------------------------------------------------------------------
def make_params(key):
    ks = jax.random.split(key, 10)

    def lin(k, din, dout):
        # nn.Linear weight is (out, in) with y = x @ W.T; we store W.T = (in, out)
        return jax.random.normal(k, (din, dout), jnp.float32) * 0.05

    wq1, wk1, wv1, wo1 = (lin(ks[i], NUM_HIDDENS, NUM_HIDDENS) for i in range(4))
    wq2, wk2, wv2, wo2 = (lin(ks[4 + i], NUM_HIDDENS, NUM_HIDDENS) for i in range(4))
    wff1 = lin(ks[8], NUM_HIDDENS, FFN_HIDDEN)
    wff2 = lin(ks[9], FFN_HIDDEN, NUM_HIDDENS)
    ones = jnp.ones((NUM_HIDDENS,), jnp.float32)    # LayerNorm gamma
    zeros = jnp.zeros((NUM_HIDDENS,), jnp.float32)  # LayerNorm beta
    return (wq1, wk1, wv1, wo1, wq2, wk2, wv2, wo2, wff1, wff2,
            ones, zeros, ones, zeros, ones, zeros)


if __name__ == "__main__":
    B, T, S = 4, 8, 8            # decoder seq T must be <= 12 (module tril mask)
    key = jax.random.PRNGKey(0)
    k_par, k_xt, k_xen = jax.random.split(key, 3)

    params = make_params(k_par)
    prepared = prepare_params(params)   # one-time weight fusion/cast (off hot path)

    x_t = jax.random.normal(k_xt, (B, T, NUM_HIDDENS), jnp.float32)
    x_en = jax.random.normal(k_xen, (B, S, NUM_HIDDENS), jnp.float32)
    o_m = jnp.ones((B, T), jnp.float32)                        # decoder pad mask
    i_m = jnp.ones((B, S), jnp.float32)                        # encoder pad mask
    i_m = i_m.at[1, -2:].set(0.0).at[3, -4:].set(0.0)

    out = jax.block_until_ready(decoder_block(x_t, o_m, x_en, i_m, prepared))
    ref = reference_decoder_block(x_t, o_m, x_en, i_m, params)

    assert out.shape == (B, T, NUM_HIDDENS)
    max_err = jnp.max(jnp.abs(out - ref))
    # bf16 matmul operands vs f32 reference (f32 residual stream) -> tight-ish bound
    assert jnp.allclose(out, ref, rtol=5e-2, atol=5e-2), \
        f"max abs err = {max_err}"
    print("KERNEL_OK")
</pallas_src>

<mosaic_0001>
module attributes {stable_mosaic.version = 11 : i64} {
  func.func @decoder_block_kernel(%arg0: i32, %arg1: memref<4x8x8xf32, #tpu.memory_space<vmem>>, %arg2: memref<4x8x8xf32, #tpu.memory_space<vmem>>, %arg3: memref<4x8x256xf32, #tpu.memory_space<vmem>>, %arg4: memref<4x8x256xf32, #tpu.memory_space<vmem>>, %arg5: memref<256x768xbf16, #tpu.memory_space<vmem>>, %arg6: memref<256x256xbf16, #tpu.memory_space<vmem>>, %arg7: memref<256x256xbf16, #tpu.memory_space<vmem>>, %arg8: memref<256x512xbf16, #tpu.memory_space<vmem>>, %arg9: memref<256x256xbf16, #tpu.memory_space<vmem>>, %arg10: memref<256x1024xbf16, #tpu.memory_space<vmem>>, %arg11: memref<1024x256xbf16, #tpu.memory_space<vmem>>, %arg12: memref<6x256xf32, #tpu.memory_space<vmem>>, %arg13: memref<4x8x256xf32, #tpu.memory_space<vmem>>) attributes {dimension_semantics = [#tpu.dimension_semantics<arbitrary>], iteration_bounds = array<i64: 1>, scalar_prefetch = 0 : i64, scratch_operands = 0 : i64, tpu.core_type = #tpu.core_type<tc>, window_params = [{pipeline_mode = #tpu.pipeline_mode<synchronous>, transform_indices = @transform_0, window_bounds = array<i64: 4, 8, 8>}, {pipeline_mode = #tpu.pipeline_mode<synchronous>, transform_indices = @transform_1, window_bounds = array<i64: 4, 8, 8>}, {pipeline_mode = #tpu.pipeline_mode<synchronous>, transform_indices = @transform_2, window_bounds = array<i64: 4, 8, 256>}, {pipeline_mode = #tpu.pipeline_mode<synchronous>, transform_indices = @transform_3, window_bounds = array<i64: 4, 8, 256>}, {pipeline_mode = #tpu.pipeline_mode<synchronous>, transform_indices = @transform_4, window_bounds = array<i64: 256, 768>}, {pipeline_mode = #tpu.pipeline_mode<synchronous>, transform_indices = @transform_5, window_bounds = array<i64: 256, 256>}, {pipeline_mode = #tpu.pipeline_mode<synchronous>, transform_indices = @transform_6, window_bounds = array<i64: 256, 256>}, {pipeline_mode = #tpu.pipeline_mode<synchronous>, transform_indices = @transform_7, window_bounds = array<i64: 256, 512>}, {pipeline_mode = #tpu.pipeline_mode<synchronous>, transform_indices = @transform_8, window_bounds = array<i64: 256, 256>}, {pipeline_mode = #tpu.pipeline_mode<synchronous>, transform_indices = @transform_9, window_bounds = array<i64: 256, 1024>}, {pipeline_mode = #tpu.pipeline_mode<synchronous>, transform_indices = @transform_10, window_bounds = array<i64: 1024, 256>}, {pipeline_mode = #tpu.pipeline_mode<synchronous>, transform_indices = @transform_11, window_bounds = array<i64: 6, 256>}, {pipeline_mode = #tpu.pipeline_mode<synchronous>, transform_indices = @transform_12, window_bounds = array<i64: 4, 8, 256>}]} {
    %c0 = arith.constant 0 : index
    %c0_0 = arith.constant 0 : index
    %c0_1 = arith.constant 0 : index
    %0 = vector.load %arg3[%c0, %c0_0, %c0_1] : memref<4x8x256xf32, #tpu.memory_space<vmem>>, vector<4x8x256xf32>
    %1 = vector.shape_cast %0 : vector<4x8x256xf32> to vector<32x256xf32>
    %2 = arith.truncf %1 : vector<32x256xf32> to vector<32x256xbf16>
    %c0_2 = arith.constant 0 : index
    %c0_3 = arith.constant 0 : index
    %c0_4 = arith.constant 0 : index
    %3 = vector.load %arg4[%c0_2, %c0_3, %c0_4] : memref<4x8x256xf32, #tpu.memory_space<vmem>>, vector<4x8x256xf32>
    %4 = vector.shape_cast %3 : vector<4x8x256xf32> to vector<32x256xf32>
    %5 = arith.truncf %4 : vector<32x256xf32> to vector<32x256xbf16>
    %c0_5 = arith.constant 0 : index
    %c0_6 = arith.constant 0 : index
    %6 = vector.load %arg12[%c0_5, %c0_6] : memref<6x256xf32, #tpu.memory_space<vmem>>, vector<6x256xf32>
    %c0_7 = arith.constant 0 : index
    %c0_8 = arith.constant 0 : index
    %7 = vector.load %arg5[%c0_7, %c0_8] : memref<256x768xbf16, #tpu.memory_space<vmem>>, vector<256x768xbf16>
    %cst = arith.constant dense<0.000000e+00> : vector<32x768xf32>
    %8 = tpu.matmul %2, %7, %cst {dimension_numbers = #tpu.dot_dimension_numbers<[1], [0], [0], [1], [0, 0, 1, 1], [], []>} : vector<32x256xbf16>, vector<256x768xbf16>, vector<32x768xf32> -> vector<32x768xf32>
    %9 = vector.extract_strided_slice %8 {offsets = [0, 0], sizes = [32, 256], strides = [1, 1]} : vector<32x768xf32> to vector<32x256xf32>
    %10 = vector.extract_strided_slice %8 {offsets = [0, 256], sizes = [32, 256], strides = [1, 1]} : vector<32x768xf32> to vector<32x256xf32>
    %11 = vector.extract_strided_slice %8 {offsets = [0, 512], sizes = [32, 256], strides = [1, 1]} : vector<32x768xf32> to vector<32x256xf32>
    %c0_9 = arith.constant 0 : index
    %c0_10 = arith.constant 0 : index
    %c0_11 = arith.constant 0 : index
    %12 = vector.load %arg1[%c0_9, %c0_10, %c0_11] : memref<4x8x8xf32, #tpu.memory_space<vmem>>, vector<4x8x8xf32>
    %cst_12 = arith.constant 0.000000e+00 : f32
    %13 = vector.broadcast %cst_12 : f32 to vector<32x256xf32>
    %14 = vector.extract_strided_slice %9 {offsets = [0, 0], sizes = [32, 64], strides = [1, 1]} : vector<32x256xf32> to vector<32x64xf32>
    %15 = vector.shape_cast %14 : vector<32x64xf32> to vector<4x8x64xf32>
    %16 = arith.truncf %15 : vector<4x8x64xf32> to vector<4x8x64xbf16>
    %17 = vector.extract_strided_slice %10 {offsets = [0, 0], sizes = [32, 64], strides = [1, 1]} : vector<32x256xf32> to vector<32x64xf32>
    %18 = vector.shape_cast %17 : vector<32x64xf32> to vector<4x8x64xf32>
    %19 = arith.truncf %18 : vector<4x8x64xf32> to vector<4x8x64xbf16>
    %20 = vector.extract_strided_slice %11 {offsets = [0, 0], sizes = [32, 64], strides = [1, 1]} : vector<32x256xf32> to vector<32x64xf32>
    %21 = vector.shape_cast %20 : vector<32x64xf32> to vector<4x8x64xf32>
    %22 = arith.truncf %21 : vector<4x8x64xf32> to vector<4x8x64xbf16>
    "tpu.trace_start"() <{level = 10 : i32, message = "bqd,bkd->bqk"}> : () -> ()
    %cst_13 = arith.constant dense<0.000000e+00> : vector<4x8x8xf32>
    %23 = tpu.matmul %16, %19, %cst_13 {dimension_numbers = #tpu.dot_dimension_numbers<[2], [2], [1], [1], [0, 0, 0, 1, 1, 1], [0], [0]>} : vector<4x8x64xbf16>, vector<4x8x64xbf16>, vector<4x8x8xf32> -> vector<4x8x8xf32>
    "tpu.trace_stop"() : () -> ()
    %cst_14 = arith.constant 1.250000e-01 : f32
    %24 = vector.broadcast %cst_14 : f32 to vector<4x8x8xf32>
    %25 = arith.mulf %23, %24 : vector<4x8x8xf32>
    %26 = arith.addf %25, %12 : vector<4x8x8xf32>
    %cst_15 = arith.constant dense<0xFF800000> : vector<4x8xf32>
    %27 = vector.multi_reduction <maximumf>, %26, %cst_15 [2] : vector<4x8x8xf32> to vector<4x8xf32>
    %28 = vector.shape_cast %27 : vector<4x8xf32> to vector<4x8x1xf32>
    %29 = vector.broadcast %28 : vector<4x8x1xf32> to vector<4x8x8xf32>
    %30 = arith.subf %26, %29 : vector<4x8x8xf32>
    %31 = math.exp %30 : vector<4x8x8xf32>
    %cst_16 = arith.constant dense<0.000000e+00> : vector<4x8xf32>
    %32 = vector.multi_reduction <add>, %31, %cst_16 [2] : vector<4x8x8xf32> to vector<4x8xf32>
    %33 = vector.shape_cast %32 : vector<4x8xf32> to vector<4x8x1xf32>
    %34 = tpu.reciprocal %33 {approx = true} : vector<4x8x1xf32> -> vector<4x8x1xf32>
    %35 = vector.broadcast %34 : vector<4x8x1xf32> to vector<4x8x8xf32>
    %36 = arith.mulf %31, %35 : vector<4x8x8xf32>
    %37 = arith.truncf %36 : vector<4x8x8xf32> to vector<4x8x8xbf16>
    "tpu.trace_start"() <{level = 10 : i32, message = "bqk,bkd->bqd"}> : () -> ()
    %cst_17 = arith.constant dense<0.000000e+00> : vector<4x8x64xf32>
    %38 = tpu.matmul %37, %22, %cst_17 {dimension_numbers = #tpu.dot_dimension_numbers<[2], [1], [1], [2], [0, 0, 0, 1, 1, 2], [0], [0]>} : vector<4x8x8xbf16>, vector<4x8x64xbf16>, vector<4x8x64xf32> -> vector<4x8x64xf32>
    "tpu.trace_stop"() : () -> ()
    %39 = vector.shape_cast %38 : vector<4x8x64xf32> to vector<32x64xf32>
    %40 = arith.truncf %39 : vector<32x64xf32> to vector<32x64xbf16>
    %c0_18 = arith.constant 0 : index
    %c0_19 = arith.constant 0 : index
    %41 = vector.load %arg6[%c0_18, %c0_19] : memref<256x256xbf16, #tpu.memory_space<vmem>>, vector<64x256xbf16>
    %cst_20 = arith.constant dense<0.000000e+00> : vector<32x256xf32>
    %42 = tpu.matmul %40, %41, %cst_20 {dimension_numbers = #tpu.dot_dimension_numbers<[1], [0], [0], [1], [0, 0, 1, 1], [], []>} : vector<32x64xbf16>, vector<64x256xbf16>, vector<32x256xf32> -> vector<32x256xf32>
    %43 = arith.addf %13, %42 : vector<32x256xf32>
    %44 = vector.extract_strided_slice %9 {offsets = [0, 64], sizes = [32, 64], strides = [1, 1]} : vector<32x256xf32> to vector<32x64xf32>
    %45 = vector.shape_cast %44 : vector<32x64xf32> to vector<4x8x64xf32>
    %46 = arith.truncf %45 : vector<4x8x64xf32> to vector<4x8x64xbf16>
    %47 = vector.extract_strided_slice %10 {offsets = [0, 64], sizes = [32, 64], strides = [1, 1]} : vector<32x256xf32> to vector<32x64xf32>
    %48 = vector.shape_cast %47 : vector<32x64xf32> to vector<4x8x64xf32>
    %49 = arith.truncf %48 : vector<4x8x64xf32> to vector<4x8x64xbf16>
    %50 = vector.extract_strided_slice %11 {offsets = [0, 64], sizes = [32, 64], strides = [1, 1]} : vector<32x256xf32> to vector<32x64xf32>
    %51 = vector.shape_cast %50 : vector<32x64xf32> to vector<4x8x64xf32>
    %52 = arith.truncf %51 : vector<4x8x64xf32> to vector<4x8x64xbf16>
    "tpu.trace_start"() <{level = 10 : i32, message = "bqd,bkd->bqk"}> : () -> ()
    %cst_21 = arith.constant dense<0.000000e+00> : vector<4x8x8xf32>
    %53 = tpu.matmul %46, %49, %cst_21 {dimension_numbers = #tpu.dot_dimension_numbers<[2], [2], [1], [1], [0, 0, 0, 1, 1, 1], [0], [0]>} : vector<4x8x64xbf16>, vector<4x8x64xbf16>, vector<4x8x8xf32> -> vector<4x8x8xf32>
    "tpu.trace_stop"() : () -> ()
    %cst_22 = arith.constant 1.250000e-01 : f32
    %54 = vector.broadcast %cst_22 : f32 to vector<4x8x8xf32>
    %55 = arith.mulf %53, %54 : vector<4x8x8xf32>
    %56 = arith.addf %55, %12 : vector<4x8x8xf32>
    %cst_23 = arith.constant dense<0xFF800000> : vector<4x8xf32>
    %57 = vector.multi_reduction <maximumf>, %56, %cst_23 [2] : vector<4x8x8xf32> to vector<4x8xf32>
    %58 = vector.shape_cast %57 : vector<4x8xf32> to vector<4x8x1xf32>
    %59 = vector.broadcast %58 : vector<4x8x1xf32> to vector<4x8x8xf32>
    %60 = arith.subf %56, %59 : vector<4x8x8xf32>
    %61 = math.exp %60 : vector<4x8x8xf32>
    %cst_24 = arith.constant dense<0.000000e+00> : vector<4x8xf32>
    %62 = vector.multi_reduction <add>, %61, %cst_24 [2] : vector<4x8x8xf32> to vector<4x8xf32>
    %63 = vector.shape_cast %62 : vector<4x8xf32> to vector<4x8x1xf32>
    %64 = tpu.reciprocal %63 {approx = true} : vector<4x8x1xf32> -> vector<4x8x1xf32>
    %65 = vector.broadcast %64 : vector<4x8x1xf32> to vector<4x8x8xf32>
    %66 = arith.mulf %61, %65 : vector<4x8x8xf32>
    %67 = arith.truncf %66 : vector<4x8x8xf32> to vector<4x8x8xbf16>
    "tpu.trace_start"() <{level = 10 : i32, message = "bqk,bkd->bqd"}> : () -> ()
    %cst_25 = arith.constant dense<0.000000e+00> : vector<4x8x64xf32>
    %68 = tpu.matmul %67, %52, %cst_25 {dimension_numbers = #tpu.dot_dimension_numbers<[2], [1], [1], [2], [0, 0, 0, 1, 1, 2], [0], [0]>} : vector<4x8x8xbf16>, vector<4x8x64xbf16>, vector<4x8x64xf32> -> vector<4x8x64xf32>
    "tpu.trace_stop"() : () -> ()
    %69 = vector.shape_cast %68 : vector<4x8x64xf32> to vector<32x64xf32>
    %70 = arith.truncf %69 : vector<32x64xf32> to vector<32x64xbf16>
    %c64 = arith.constant 64 : index
    %c0_26 = arith.constant 0 : index
    %71 = vector.load %arg6[%c64, %c0_26] : memref<256x256xbf16, #tpu.memory_space<vmem>>, vector<64x256xbf16>
    %cst_27 = arith.constant dense<0.000000e+00> : vector<32x256xf32>
    %72 = tpu.matmul %70, %71, %cst_27 {dimension_numbers = #tpu.dot_dimension_numbers<[1], [0], [0], [1], [0, 0, 1, 1], [], []>} : vector<32x64xbf16>, vector<64x256xbf16>, vector<32x256xf32> -> vector<32x256xf32>
    %73 = arith.addf %43, %72 : vector<32x256xf32>
    %74 = vector.extract_strided_slice %9 {offsets = [0, 128], sizes = [32, 64], strides = [1, 1]} : vector<32x256xf32> to vector<32x64xf32>
    %75 = vector.shape_cast %74 : vector<32x64xf32> to vector<4x8x64xf32>
    %76 = arith.truncf %75 : vector<4x8x64xf32> to vector<4x8x64xbf16>
    %77 = vector.extract_strided_slice %10 {offsets = [0, 128], sizes = [32, 64], strides = [1, 1]} : vector<32x256xf32> to vector<32x64xf32>
    %78 = vector.shape_cast %77 : vector<32x64xf32> to vector<4x8x64xf32>
    %79 = arith.truncf %78 : vector<4x8x64xf32> to vector<4x8x64xbf16>
    %80 = vector.extract_strided_slice %11 {offsets = [0, 128], sizes = [32, 64], strides = [1, 1]} : vector<32x256xf32> to vector<32x64xf32>
    %81 = vector.shape_cast %80 : vector<32x64xf32> to vector<4x8x64xf32>
    %82 = arith.truncf %81 : vector<4x8x64xf32> to vector<4x8x64xbf16>
    "tpu.trace_start"() <{level = 10 : i32, message = "bqd,bkd->bqk"}> : () -> ()
    %cst_28 = arith.constant dense<0.000000e+00> : vector<4x8x8xf32>
    %83 = tpu.matmul %76, %79, %cst_28 {dimension_numbers = #tpu.dot_dimension_numbers<[2], [2], [1], [1], [0, 0, 0, 1, 1, 1], [0], [0]>} : vector<4x8x64xbf16>, vector<4x8x64xbf16>, vector<4x8x8xf32> -> vector<4x8x8xf32>
    "tpu.trace_stop"() : () -> ()
    %cst_29 = arith.constant 1.250000e-01 : f32
    %84 = vector.broadcast %cst_29 : f32 to vector<4x8x8xf32>
    %85 = arith.mulf %83, %84 : vector<4x8x8xf32>
    %86 = arith.addf %85, %12 : vector<4x8x8xf32>
    %cst_30 = arith.constant dense<0xFF800000> : vector<4x8xf32>
    %87 = vector.multi_reduction <maximumf>, %86, %cst_30 [2] : vector<4x8x8xf32> to vector<4x8xf32>
    %88 = vector.shape_cast %87 : vector<4x8xf32> to vector<4x8x1xf32>
    %89 = vector.broadcast %88 : vector<4x8x1xf32> to vector<4x8x8xf32>
    %90 = arith.subf %86, %89 : vector<4x8x8xf32>
    %91 = math.exp %90 : vector<4x8x8xf32>
    %cst_31 = arith.constant dense<0.000000e+00> : vector<4x8xf32>
    %92 = vector.multi_reduction <add>, %91, %cst_31 [2] : vector<4x8x8xf32> to vector<4x8xf32>
    %93 = vector.shape_cast %92 : vector<4x8xf32> to vector<4x8x1xf32>
    %94 = tpu.reciprocal %93 {approx = true} : vector<4x8x1xf32> -> vector<4x8x1xf32>
    %95 = vector.broadcast %94 : vector<4x8x1xf32> to vector<4x8x8xf32>
    %96 = arith.mulf %91, %95 : vector<4x8x8xf32>
    %97 = arith.truncf %96 : vector<4x8x8xf32> to vector<4x8x8xbf16>
    "tpu.trace_start"() <{level = 10 : i32, message = "bqk,bkd->bqd"}> : () -> ()
    %cst_32 = arith.constant dense<0.000000e+00> : vector<4x8x64xf32>
    %98 = tpu.matmul %97, %82, %cst_32 {dimension_numbers = #tpu.dot_dimension_numbers<[2], [1], [1], [2], [0, 0, 0, 1, 1, 2], [0], [0]>} : vector<4x8x8xbf16>, vector<4x8x64xbf16>, vector<4x8x64xf32> -> vector<4x8x64xf32>
    "tpu.trace_stop"() : () -> ()
    %99 = vector.shape_cast %98 : vector<4x8x64xf32> to vector<32x64xf32>
    %100 = arith.truncf %99 : vector<32x64xf32> to vector<32x64xbf16>
    %c128 = arith.constant 128 : index
    %c0_33 = arith.constant 0 : index
    %101 = vector.load %arg6[%c128, %c0_33] : memref<256x256xbf16, #tpu.memory_space<vmem>>, vector<64x256xbf16>
    %cst_34 = arith.constant dense<0.000000e+00> : vector<32x256xf32>
    %102 = tpu.matmul %100, %101, %cst_34 {dimension_numbers = #tpu.dot_dimension_numbers<[1], [0], [0], [1], [0, 0, 1, 1], [], []>} : vector<32x64xbf16>, vector<64x256xbf16>, vector<32x256xf32> -> vector<32x256xf32>
    %103 = arith.addf %73, %102 : vector<32x256xf32>
    %104 = vector.extract_strided_slice %9 {offsets = [0, 192], sizes = [32, 64], strides = [1, 1]} : vector<32x256xf32> to vector<32x64xf32>
    %105 = vector.shape_cast %104 : vector<32x64xf32> to vector<4x8x64xf32>
    %106 = arith.truncf %105 : vector<4x8x64xf32> to vector<4x8x64xbf16>
    %107 = vector.extract_strided_slice %10 {offsets = [0, 192], sizes = [32, 64], strides = [1, 1]} : vector<32x256xf32> to vector<32x64xf32>
    %108 = vector.shape_cast %107 : vector<32x64xf32> to vector<4x8x64xf32>
    %109 = arith.truncf %108 : vector<4x8x64xf32> to vector<4x8x64xbf16>
    %110 = vector.extract_strided_slice %11 {offsets = [0, 192], sizes = [32, 64], strides = [1, 1]} : vector<32x256xf32> to vector<32x64xf32>
    %111 = vector.shape_cast %110 : vector<32x64xf32> to vector<4x8x64xf32>
    %112 = arith.truncf %111 : vector<4x8x64xf32> to vector<4x8x64xbf16>
    "tpu.trace_start"() <{level = 10 : i32, message = "bqd,bkd->bqk"}> : () -> ()
    %cst_35 = arith.constant dense<0.000000e+00> : vector<4x8x8xf32>
    %113 = tpu.matmul %106, %109, %cst_35 {dimension_numbers = #tpu.dot_dimension_numbers<[2], [2], [1], [1], [0, 0, 0, 1, 1, 1], [0], [0]>} : vector<4x8x64xbf16>, vector<4x8x64xbf16>, vector<4x8x8xf32> -> vector<4x8x8xf32>
    "tpu.trace_stop"() : () -> ()
    %cst_36 = arith.constant 1.250000e-01 : f32
    %114 = vector.broadcast %cst_36 : f32 to vector<4x8x8xf32>
    %115 = arith.mulf %113, %114 : vector<4x8x8xf32>
    %116 = arith.addf %115, %12 : vector<4x8x8xf32>
    %cst_37 = arith.constant dense<0xFF800000> : vector<4x8xf32>
    %117 = vector.multi_reduction <maximumf>, %116, %cst_37 [2] : vector<4x8x8xf32> to vector<4x8xf32>
    %118 = vector.shape_cast %117 : vector<4x8xf32> to vector<4x8x1xf32>
    %119 = vector.broadcast %118 : vector<4x8x1xf32> to vector<4x8x8xf32>
    %120 = arith.subf %116, %119 : vector<4x8x8xf32>
    %121 = math.exp %120 : vector<4x8x8xf32>
    %cst_38 = arith.constant dense<0.000000e+00> : vector<4x8xf32>
    %122 = vector.multi_reduction <add>, %121, %cst_38 [2] : vector<4x8x8xf32> to vector<4x8xf32>
    %123 = vector.shape_cast %122 : vector<4x8xf32> to vector<4x8x1xf32>
    %124 = tpu.reciprocal %123 {approx = true} : vector<4x8x1xf32> -> vector<4x8x1xf32>
    %125 = vector.broadcast %124 : vector<4x8x1xf32> to vector<4x8x8xf32>
    %126 = arith.mulf %121, %125 : vector<4x8x8xf32>
    %127 = arith.truncf %126 : vector<4x8x8xf32> to vector<4x8x8xbf16>
    "tpu.trace_start"() <{level = 10 : i32, message = "bqk,bkd->bqd"}> : () -> ()
    %cst_39 = arith.constant dense<0.000000e+00> : vector<4x8x64xf32>
    %128 = tpu.matmul %127, %112, %cst_39 {dimension_numbers = #tpu.dot_dimension_numbers<[2], [1], [1], [2], [0, 0, 0, 1, 1, 2], [0], [0]>} : vector<4x8x8xbf16>, vector<4x8x64xbf16>, vector<4x8x64xf32> -> vector<4x8x64xf32>
    "tpu.trace_stop"() : () -> ()
    %129 = vector.shape_cast %128 : vector<4x8x64xf32> to vector<32x64xf32>
    %130 = arith.truncf %129 : vector<32x64xf32> to vector<32x64xbf16>
    %c192 = arith.constant 192 : index
    %c0_40 = arith.constant 0 : index
    %131 = vector.load %arg6[%c192, %c0_40] : memref<256x256xbf16, #tpu.memory_space<vmem>>, vector<64x256xbf16>
    %cst_41 = arith.constant dense<0.000000e+00> : vector<32x256xf32>
    %132 = tpu.matmul %130, %131, %cst_41 {dimension_numbers = #tpu.dot_dimension_numbers<[1], [0], [0], [1], [0, 0, 1, 1], [], []>} : vector<32x64xbf16>, vector<64x256xbf16>, vector<32x256xf32> -> vector<32x256xf32>
    %133 = arith.addf %103, %132 : vector<32x256xf32>
    %134 = vector.extract_strided_slice %6 {offsets = [0, 0], sizes = [1, 256], strides = [1, 1]} : vector<6x256xf32> to vector<1x256xf32>
    %135 = vector.extract_strided_slice %6 {offsets = [1, 0], sizes = [1, 256], strides = [1, 1]} : vector<6x256xf32> to vector<1x256xf32>
    %cst_42 = arith.constant dense<0.000000e+00> : vector<32xf32>
    %136 = vector.multi_reduction <add>, %133, %cst_42 [1] : vector<32x256xf32> to vector<32xf32>
    %137 = vector.shape_cast %136 : vector<32xf32> to vector<32x1xf32>
    %cst_43 = arith.constant 2.560000e+02 : f32
    %138 = vector.broadcast %cst_43 : f32 to vector<32x1xf32>
    %139 = arith.divf %137, %138 : vector<32x1xf32>
    %140 = vector.broadcast %139 : vector<32x1xf32> to vector<32x256xf32>
    %141 = arith.subf %133, %140 : vector<32x256xf32>
    %142 = arith.mulf %141, %141 : vector<32x256xf32>
    %cst_44 = arith.constant dense<0.000000e+00> : vector<32xf32>
    %143 = vector.multi_reduction <add>, %142, %cst_44 [1] : vector<32x256xf32> to vector<32xf32>
    %144 = vector.shape_cast %143 : vector<32xf32> to vector<32x1xf32>
    %cst_45 = arith.constant 2.560000e+02 : f32
    %145 = vector.broadcast %cst_45 : f32 to vector<32x1xf32>
    %146 = arith.divf %144, %145 : vector<32x1xf32>
    %147 = vector.broadcast %139 : vector<32x1xf32> to vector<32x256xf32>
    %148 = arith.subf %133, %147 : vector<32x256xf32>
    %cst_46 = arith.constant 9.99999974E-6 : f32
    %149 = vector.broadcast %cst_46 : f32 to vector<32x1xf32>
    %150 = arith.addf %146, %149 : vector<32x1xf32>
    %151 = math.rsqrt %150 : vector<32x1xf32>
    %152 = vector.broadcast %151 : vector<32x1xf32> to vector<32x256xf32>
    %153 = arith.mulf %148, %152 : vector<32x256xf32>
    %154 = vector.broadcast %134 : vector<1x256xf32> to vector<32x256xf32>
    %155 = arith.mulf %153, %154 : vector<32x256xf32>
    %156 = vector.broadcast %135 : vector<1x256xf32> to vector<32x256xf32>
    %157 = arith.addf %155, %156 : vector<32x256xf32>
    %158 = arith.addf %1, %157 : vector<32x256xf32>
    %159 = arith.truncf %158 : vector<32x256xf32> to vector<32x256xbf16>
    %c0_47 = arith.constant 0 : index
    %c0_48 = arith.constant 0 : index
    %160 = vector.load %arg7[%c0_47, %c0_48] : memref<256x256xbf16, #tpu.memory_space<vmem>>, vector<256x256xbf16>
    %cst_49 = arith.constant dense<0.000000e+00> : vector<32x256xf32>
    %161 = tpu.matmul %159, %160, %cst_49 {dimension_numbers = #tpu.dot_dimension_numbers<[1], [0], [0], [1], [0, 0, 1, 1], [], []>} : vector<32x256xbf16>, vector<256x256xbf16>, vector<32x256xf32> -> vector<32x256xf32>
    %c0_50 = arith.constant 0 : index
    %c0_51 = arith.constant 0 : index
    %162 = vector.load %arg8[%c0_50, %c0_51] : memref<256x512xbf16, #tpu.memory_space<vmem>>, vector<256x512xbf16>
    %cst_52 = arith.constant dense<0.000000e+00> : vector<32x512xf32>
    %163 = tpu.matmul %5, %162, %cst_52 {dimension_numbers = #tpu.dot_dimension_numbers<[1], [0], [0], [1], [0, 0, 1, 1], [], []>} : vector<32x256xbf16>, vector<256x512xbf16>, vector<32x512xf32> -> vector<32x512xf32>
    %164 = vector.extract_strided_slice %163 {offsets = [0, 0], sizes = [32, 256], strides = [1, 1]} : vector<32x512xf32> to vector<32x256xf32>
    %165 = vector.extract_strided_slice %163 {offsets = [0, 256], sizes = [32, 256], strides = [1, 1]} : vector<32x512xf32> to vector<32x256xf32>
    %c0_53 = arith.constant 0 : index
    %c0_54 = arith.constant 0 : index
    %c0_55 = arith.constant 0 : index
    %166 = vector.load %arg2[%c0_53, %c0_54, %c0_55] : memref<4x8x8xf32, #tpu.memory_space<vmem>>, vector<4x8x8xf32>
    %cst_56 = arith.constant 0.000000e+00 : f32
    %167 = vector.broadcast %cst_56 : f32 to vector<32x256xf32>
    %168 = vector.extract_strided_slice %161 {offsets = [0, 0], sizes = [32, 64], strides = [1, 1]} : vector<32x256xf32> to vector<32x64xf32>
    %169 = vector.shape_cast %168 : vector<32x64xf32> to vector<4x8x64xf32>
    %170 = arith.truncf %169 : vector<4x8x64xf32> to vector<4x8x64xbf16>
    %171 = vector.extract_strided_slice %164 {offsets = [0, 0], sizes = [32, 64], strides = [1, 1]} : vector<32x256xf32> to vector<32x64xf32>
    %172 = vector.shape_cast %171 : vector<32x64xf32> to vector<4x8x64xf32>
    %173 = arith.truncf %172 : vector<4x8x64xf32> to vector<4x8x64xbf16>
    %174 = vector.extract_strided_slice %165 {offsets = [0, 0], sizes = [32, 64], strides = [1, 1]} : vector<32x256xf32> to vector<32x64xf32>
    %175 = vector.shape_cast %174 : vector<32x64xf32> to vector<4x8x64xf32>
    %176 = arith.truncf %175 : vector<4x8x64xf32> to vector<4x8x64xbf16>
    "tpu.trace_start"() <{level = 10 : i32, message = "bqd,bkd->bqk"}> : () -> ()
    %cst_57 = arith.constant dense<0.000000e+00> : vector<4x8x8xf32>
    %177 = tpu.matmul %170, %173, %cst_57 {dimension_numbers = #tpu.dot_dimension_numbers<[2], [2], [1], [1], [0, 0, 0, 1, 1, 1], [0], [0]>} : vector<4x8x64xbf16>, vector<4x8x64xbf16>, vector<4x8x8xf32> -> vector<4x8x8xf32>
    "tpu.trace_stop"() : () -> ()
    %cst_58 = arith.constant 1.250000e-01 : f32
    %178 = vector.broadcast %cst_58 : f32 to vector<4x8x8xf32>
    %179 = arith.mulf %177, %178 : vector<4x8x8xf32>
    %180 = arith.addf %179, %166 : vector<4x8x8xf32>
    %cst_59 = arith.constant dense<0xFF800000> : vector<4x8xf32>
    %181 = vector.multi_reduction <maximumf>, %180, %cst_59 [2] : vector<4x8x8xf32> to vector<4x8xf32>
    %182 = vector.shape_cast %181 : vector<4x8xf32> to vector<4x8x1xf32>
    %183 = vector.broadcast %182 : vector<4x8x1xf32> to vector<4x8x8xf32>
    %184 = arith.subf %180, %183 : vector<4x8x8xf32>
    %185 = math.exp %184 : vector<4x8x8xf32>
    %cst_60 = arith.constant dense<0.000000e+00> : vector<4x8xf32>
    %186 = vector.multi_reduction <add>, %185, %cst_60 [2] : vector<4x8x8xf32> to vector<4x8xf32>
    %187 = vector.shape_cast %186 : vector<4x8xf32> to vector<4x8x1xf32>
    %188 = tpu.reciprocal %187 {approx = true} : vector<4x8x1xf32> -> vector<4x8x1xf32>
    %189 = vector.broadcast %188 : vector<4x8x1xf32> to vector<4x8x8xf32>
    %190 = arith.mulf %185, %189 : vector<4x8x8xf32>
    %191 = arith.truncf %190 : vector<4x8x8xf32> to vector<4x8x8xbf16>
    "tpu.trace_start"() <{level = 10 : i32, message = "bqk,bkd->bqd"}> : () -> ()
    %cst_61 = arith.constant dense<0.000000e+00> : vector<4x8x64xf32>
    %192 = tpu.matmul %191, %176, %cst_61 {dimension_numbers = #tpu.dot_dimension_numbers<[2], [1], [1], [2], [0, 0, 0, 1, 1, 2], [0], [0]>} : vector<4x8x8xbf16>, vector<4x8x64xbf16>, vector<4x8x64xf32> -> vector<4x8x64xf32>
    "tpu.trace_stop"() : () -> ()
    %193 = vector.shape_cast %192 : vector<4x8x64xf32> to vector<32x64xf32>
    %194 = arith.truncf %193 : vector<32x64xf32> to vector<32x64xbf16>
    %c0_62 = arith.constant 0 : index
    %c0_63 = arith.constant 0 : index
    %195 = vector.load %arg9[%c0_62, %c0_63] : memref<256x256xbf16, #tpu.memory_space<vmem>>, vector<64x256xbf16>
    %cst_64 = arith.constant dense<0.000000e+00> : vector<32x256xf32>
    %196 = tpu.matmul %194, %195, %cst_64 {dimension_numbers = #tpu.dot_dimension_numbers<[1], [0], [0], [1], [0, 0, 1, 1], [], []>} : vector<32x64xbf16>, vector<64x256xbf16>, vector<32x256xf32> -> vector<32x256xf32>
    %197 = arith.addf %167, %196 : vector<32x256xf32>
    %198 = vector.extract_strided_slice %161 {offsets = [0, 64], sizes = [32, 64], strides = [1, 1]} : vector<32x256xf32> to vector<32x64xf32>
    %199 = vector.shape_cast %198 : vector<32x64xf32> to vector<4x8x64xf32>
    %200 = arith.truncf %199 : vector<4x8x64xf32> to vector<4x8x64xbf16>
    %201 = vector.extract_strided_slice %164 {offsets = [0, 64], sizes = [32, 64], strides = [1, 1]} : vector<32x256xf32> to vector<32x64xf32>
    %202 = vector.shape_cast %201 : vector<32x64xf32> to vector<4x8x64xf32>
    %203 = arith.truncf %202 : vector<4x8x64xf32> to vector<4x8x64xbf16>
    %204 = vector.extract_strided_slice %165 {offsets = [0, 64], sizes = [32, 64], strides = [1, 1]} : vector<32x256xf32> to vector<32x64xf32>
    %205 = vector.shape_cast %204 : vector<32x64xf32> to vector<4x8x64xf32>
    %206 = arith.truncf %205 : vector<4x8x64xf32> to vector<4x8x64xbf16>
    "tpu.trace_start"() <{level = 10 : i32, message = "bqd,bkd->bqk"}> : () -> ()
    %cst_65 = arith.constant dense<0.000000e+00> : vector<4x8x8xf32>
    %207 = tpu.matmul %200, %203, %cst_65 {dimension_numbers = #tpu.dot_dimension_numbers<[2], [2], [1], [1], [0, 0, 0, 1, 1, 1], [0], [0]>} : vector<4x8x64xbf16>, vector<4x8x64xbf16>, vector<4x8x8xf32> -> vector<4x8x8xf32>
    "tpu.trace_stop"() : () -> ()
    %cst_66 = arith.constant 1.250000e-01 : f32
    %208 = vector.broadcast %cst_66 : f32 to vector<4x8x8xf32>
    %209 = arith.mulf %207, %208 : vector<4x8x8xf32>
    %210 = arith.addf %209, %166 : vector<4x8x8xf32>
    %cst_67 = arith.constant dense<0xFF800000> : vector<4x8xf32>
    %211 = vector.multi_reduction <maximumf>, %210, %cst_67 [2] : vector<4x8x8xf32> to vector<4x8xf32>
    %212 = vector.shape_cast %211 : vector<4x8xf32> to vector<4x8x1xf32>
    %213 = vector.broadcast %212 : vector<4x8x1xf32> to vector<4x8x8xf32>
    %214 = arith.subf %210, %213 : vector<4x8x8xf32>
    %215 = math.exp %214 : vector<4x8x8xf32>
    %cst_68 = arith.constant dense<0.000000e+00> : vector<4x8xf32>
    %216 = vector.multi_reduction <add>, %215, %cst_68 [2] : vector<4x8x8xf32> to vector<4x8xf32>
    %217 = vector.shape_cast %216 : vector<4x8xf32> to vector<4x8x1xf32>
    %218 = tpu.reciprocal %217 {approx = true} : vector<4x8x1xf32> -> vector<4x8x1xf32>
    %219 = vector.broadcast %218 : vector<4x8x1xf32> to vector<4x8x8xf32>
    %220 = arith.mulf %215, %219 : vector<4x8x8xf32>
    %221 = arith.truncf %220 : vector<4x8x8xf32> to vector<4x8x8xbf16>
    "tpu.trace_start"() <{level = 10 : i32, message = "bqk,bkd->bqd"}> : () -> ()
    %cst_69 = arith.constant dense<0.000000e+00> : vector<4x8x64xf32>
    %222 = tpu.matmul %221, %206, %cst_69 {dimension_numbers = #tpu.dot_dimension_numbers<[2], [1], [1], [2], [0, 0, 0, 1, 1, 2], [0], [0]>} : vector<4x8x8xbf16>, vector<4x8x64xbf16>, vector<4x8x64xf32> -> vector<4x8x64xf32>
    "tpu.trace_stop"() : () -> ()
    %223 = vector.shape_cast %222 : vector<4x8x64xf32> to vector<32x64xf32>
    %224 = arith.truncf %223 : vector<32x64xf32> to vector<32x64xbf16>
    %c64_70 = arith.constant 64 : index
    %c0_71 = arith.constant 0 : index
    %225 = vector.load %arg9[%c64_70, %c0_71] : memref<256x256xbf16, #tpu.memory_space<vmem>>, vector<64x256xbf16>
    %cst_72 = arith.constant dense<0.000000e+00> : vector<32x256xf32>
    %226 = tpu.matmul %224, %225, %cst_72 {dimension_numbers = #tpu.dot_dimension_numbers<[1], [0], [0], [1], [0, 0, 1, 1], [], []>} : vector<32x64xbf16>, vector<64x256xbf16>, vector<32x256xf32> -> vector<32x256xf32>
    %227 = arith.addf %197, %226 : vector<32x256xf32>
    %228 = vector.extract_strided_slice %161 {offsets = [0, 128], sizes = [32, 64], strides = [1, 1]} : vector<32x256xf32> to vector<32x64xf32>
    %229 = vector.shape_cast %228 : vector<32x64xf32> to vector<4x8x64xf32>
    %230 = arith.truncf %229 : vector<4x8x64xf32> to vector<4x8x64xbf16>
    %231 = vector.extract_strided_slice %164 {offsets = [0, 128], sizes = [32, 64], strides = [1, 1]} : vector<32x256xf32> to vector<32x64xf32>
    %232 = vector.shape_cast %231 : vector<32x64xf32> to vector<4x8x64xf32>
    %233 = arith.truncf %232 : vector<4x8x64xf32> to vector<4x8x64xbf16>
    %234 = vector.extract_strided_slice %165 {offsets = [0, 128], sizes = [32, 64], strides = [1, 1]} : vector<32x256xf32> to vector<32x64xf32>
    %235 = vector.shape_cast %234 : vector<32x64xf32> to vector<4x8x64xf32>
    %236 = arith.truncf %235 : vector<4x8x64xf32> to vector<4x8x64xbf16>
    "tpu.trace_start"() <{level = 10 : i32, message = "bqd,bkd->bqk"}> : () -> ()
    %cst_73 = arith.constant dense<0.000000e+00> : vector<4x8x8xf32>
    %237 = tpu.matmul %230, %233, %cst_73 {dimension_numbers = #tpu.dot_dimension_numbers<[2], [2], [1], [1], [0, 0, 0, 1, 1, 1], [0], [0]>} : vector<4x8x64xbf16>, vector<4x8x64xbf16>, vector<4x8x8xf32> -> vector<4x8x8xf32>
    "tpu.trace_stop"() : () -> ()
    %cst_74 = arith.constant 1.250000e-01 : f32
    %238 = vector.broadcast %cst_74 : f32 to vector<4x8x8xf32>
    %239 = arith.mulf %237, %238 : vector<4x8x8xf32>
    %240 = arith.addf %239, %166 : vector<4x8x8xf32>
    %cst_75 = arith.constant dense<0xFF800000> : vector<4x8xf32>
    %241 = vector.multi_reduction <maximumf>, %240, %cst_75 [2] : vector<4x8x8xf32> to vector<4x8xf32>
    %242 = vector.shape_cast %241 : vector<4x8xf32> to vector<4x8x1xf32>
    %243 = vector.broadcast %242 : vector<4x8x1xf32> to vector<4x8x8xf32>
    %244 = arith.subf %240, %243 : vector<4x8x8xf32>
    %245 = math.exp %244 : vector<4x8x8xf32>
    %cst_76 = arith.constant dense<0.000000e+00> : vector<4x8xf32>
    %246 = vector.multi_reduction <add>, %245, %cst_76 [2] : vector<4x8x8xf32> to vector<4x8xf32>
    %247 = vector.shape_cast %246 : vector<4x8xf32> to vector<4x8x1xf32>
    %248 = tpu.reciprocal %247 {approx = true} : vector<4x8x1xf32> -> vector<4x8x1xf32>
    %249 = vector.broadcast %248 : vector<4x8x1xf32> to vector<4x8x8xf32>
    %250 = arith.mulf %245, %249 : vector<4x8x8xf32>
    %251 = arith.truncf %250 : vector<4x8x8xf32> to vector<4x8x8xbf16>
    "tpu.trace_start"() <{level = 10 : i32, message = "bqk,bkd->bqd"}> : () -> ()
    %cst_77 = arith.constant dense<0.000000e+00> : vector<4x8x64xf32>
    %252 = tpu.matmul %251, %236, %cst_77 {dimension_numbers = #tpu.dot_dimension_numbers<[2], [1], [1], [2], [0, 0, 0, 1, 1, 2], [0], [0]>} : vector<4x8x8xbf16>, vector<4x8x64xbf16>, vector<4x8x64xf32> -> vector<4x8x64xf32>
    "tpu.trace_stop"() : () -> ()
    %253 = vector.shape_cast %252 : vector<4x8x64xf32> to vector<32x64xf32>
    %254 = arith.truncf %253 : vector<32x64xf32> to vector<32x64xbf16>
    %c128_78 = arith.constant 128 : index
    %c0_79 = arith.constant 0 : index
    %255 = vector.load %arg9[%c128_78, %c0_79] : memref<256x256xbf16, #tpu.memory_space<vmem>>, vector<64x256xbf16>
    %cst_80 = arith.constant dense<0.000000e+00> : vector<32x256xf32>
    %256 = tpu.matmul %254, %255, %cst_80 {dimension_numbers = #tpu.dot_dimension_numbers<[1], [0], [0], [1], [0, 0, 1, 1], [], []>} : vector<32x64xbf16>, vector<64x256xbf16>, vector<32x256xf32> -> vector<32x256xf32>
    %257 = arith.addf %227, %256 : vector<32x256xf32>
    %258 = vector.extract_strided_slice %161 {offsets = [0, 192], sizes = [32, 64], strides = [1, 1]} : vector<32x256xf32> to vector<32x64xf32>
    %259 = vector.shape_cast %258 : vector<32x64xf32> to vector<4x8x64xf32>
    %260 = arith.truncf %259 : vector<4x8x64xf32> to vector<4x8x64xbf16>
    %261 = vector.extract_strided_slice %164 {offsets = [0, 192], sizes = [32, 64], strides = [1, 1]} : vector<32x256xf32> to vector<32x64xf32>
    %262 = vector.shape_cast %261 : vector<32x64xf32> to vector<4x8x64xf32>
    %263 = arith.truncf %262 : vector<4x8x64xf32> to vector<4x8x64xbf16>
    %264 = vector.extract_strided_slice %165 {offsets = [0, 192], sizes = [32, 64], strides = [1, 1]} : vector<32x256xf32> to vector<32x64xf32>
    %265 = vector.shape_cast %264 : vector<32x64xf32> to vector<4x8x64xf32>
    %266 = arith.truncf %265 : vector<4x8x64xf32> to vector<4x8x64xbf16>
    "tpu.trace_start"() <{level = 10 : i32, message = "bqd,bkd->bqk"}> : () -> ()
    %cst_81 = arith.constant dense<0.000000e+00> : vector<4x8x8xf32>
    %267 = tpu.matmul %260, %263, %cst_81 {dimension_numbers = #tpu.dot_dimension_numbers<[2], [2], [1], [1], [0, 0, 0, 1, 1, 1], [0], [0]>} : vector<4x8x64xbf16>, vector<4x8x64xbf16>, vector<4x8x8xf32> -> vector<4x8x8xf32>
    "tpu.trace_stop"() : () -> ()
    %cst_82 = arith.constant 1.250000e-01 : f32
    %268 = vector.broadcast %cst_82 : f32 to vector<4x8x8xf32>
    %269 = arith.mulf %267, %268 : vector<4x8x8xf32>
    %270 = arith.addf %269, %166 : vector<4x8x8xf32>
    %cst_83 = arith.constant dense<0xFF800000> : vector<4x8xf32>
    %271 = vector.multi_reduction <maximumf>, %270, %cst_83 [2] : vector<4x8x8xf32> to vector<4x8xf32>
    %272 = vector.shape_cast %271 : vector<4x8xf32> to vector<4x8x1xf32>
    %273 = vector.broadcast %272 : vector<4x8x1xf32> to vector<4x8x8xf32>
    %274 = arith.subf %270, %273 : vector<4x8x8xf32>
    %275 = math.exp %274 : vector<4x8x8xf32>
    %cst_84 = arith.constant dense<0.000000e+00> : vector<4x8xf32>
    %276 = vector.multi_reduction <add>, %275, %cst_84 [2] : vector<4x8x8xf32> to vector<4x8xf32>
    %277 = vector.shape_cast %276 : vector<4x8xf32> to vector<4x8x1xf32>
    %278 = tpu.reciprocal %277 {approx = true} : vector<4x8x1xf32> -> vector<4x8x1xf32>
    %279 = vector.broadcast %278 : vector<4x8x1xf32> to vector<4x8x8xf32>
    %280 = arith.mulf %275, %279 : vector<4x8x8xf32>
    %281 = arith.truncf %280 : vector<4x8x8xf32> to vector<4x8x8xbf16>
    "tpu.trace_start"() <{level = 10 : i32, message = "bqk,bkd->bqd"}> : () -> ()
    %cst_85 = arith.constant dense<0.000000e+00> : vector<4x8x64xf32>
    %282 = tpu.matmul %281, %266, %cst_85 {dimension_numbers = #tpu.dot_dimension_numbers<[2], [1], [1], [2], [0, 0, 0, 1, 1, 2], [0], [0]>} : vector<4x8x8xbf16>, vector<4x8x64xbf16>, vector<4x8x64xf32> -> vector<4x8x64xf32>
    "tpu.trace_stop"() : () -> ()
    %283 = vector.shape_cast %282 : vector<4x8x64xf32> to vector<32x64xf32>
    %284 = arith.truncf %283 : vector<32x64xf32> to vector<32x64xbf16>
    %c192_86 = arith.constant 192 : index
    %c0_87 = arith.constant 0 : index
    %285 = vector.load %arg9[%c192_86, %c0_87] : memref<256x256xbf16, #tpu.memory_space<vmem>>, vector<64x256xbf16>
    %cst_88 = arith.constant dense<0.000000e+00> : vector<32x256xf32>
    %286 = tpu.matmul %284, %285, %cst_88 {dimension_numbers = #tpu.dot_dimension_numbers<[1], [0], [0], [1], [0, 0, 1, 1], [], []>} : vector<32x64xbf16>, vector<64x256xbf16>, vector<32x256xf32> -> vector<32x256xf32>
    %287 = arith.addf %257, %286 : vector<32x256xf32>
    %288 = vector.extract_strided_slice %6 {offsets = [2, 0], sizes = [1, 256], strides = [1, 1]} : vector<6x256xf32> to vector<1x256xf32>
    %289 = vector.extract_strided_slice %6 {offsets = [3, 0], sizes = [1, 256], strides = [1, 1]} : vector<6x256xf32> to vector<1x256xf32>
    %cst_89 = arith.constant dense<0.000000e+00> : vector<32xf32>
    %290 = vector.multi_reduction <add>, %287, %cst_89 [1] : vector<32x256xf32> to vector<32xf32>
    %291 = vector.shape_cast %290 : vector<32xf32> to vector<32x1xf32>
    %cst_90 = arith.constant 2.560000e+02 : f32
    %292 = vector.broadcast %cst_90 : f32 to vector<32x1xf32>
    %293 = arith.divf %291, %292 : vector<32x1xf32>
    %294 = vector.broadcast %293 : vector<32x1xf32> to vector<32x256xf32>
    %295 = arith.subf %287, %294 : vector<32x256xf32>
    %296 = arith.mulf %295, %295 : vector<32x256xf32>
    %cst_91 = arith.constant dense<0.000000e+00> : vector<32xf32>
    %297 = vector.multi_reduction <add>, %296, %cst_91 [1] : vector<32x256xf32> to vector<32xf32>
    %298 = vector.shape_cast %297 : vector<32xf32> to vector<32x1xf32>
    %cst_92 = arith.constant 2.560000e+02 : f32
    %299 = vector.broadcast %cst_92 : f32 to vector<32x1xf32>
    %300 = arith.divf %298, %299 : vector<32x1xf32>
    %301 = vector.broadcast %293 : vector<32x1xf32> to vector<32x256xf32>
    %302 = arith.subf %287, %301 : vector<32x256xf32>
    %cst_93 = arith.constant 9.99999974E-6 : f32
    %303 = vector.broadcast %cst_93 : f32 to vector<32x1xf32>
    %304 = arith.addf %300, %303 : vector<32x1xf32>
    %305 = math.rsqrt %304 : vector<32x1xf32>
    %306 = vector.broadcast %305 : vector<32x1xf32> to vector<32x256xf32>
    %307 = arith.mulf %302, %306 : vector<32x256xf32>
    %308 = vector.broadcast %288 : vector<1x256xf32> to vector<32x256xf32>
    %309 = arith.mulf %307, %308 : vector<32x256xf32>
    %310 = vector.broadcast %289 : vector<1x256xf32> to vector<32x256xf32>
    %311 = arith.addf %309, %310 : vector<32x256xf32>
    %312 = arith.addf %158, %311 : vector<32x256xf32>
    %313 = arith.truncf %312 : vector<32x256xf32> to vector<32x256xbf16>
    %c0_94 = arith.constant 0 : index
    %c0_95 = arith.constant 0 : index
    %314 = vector.load %arg10[%c0_94, %c0_95] : memref<256x1024xbf16, #tpu.memory_space<vmem>>, vector<256x1024xbf16>
    %cst_96 = arith.constant dense<0.000000e+00> : vector<32x1024xf32>
    %315 = tpu.matmul %313, %314, %cst_96 {dimension_numbers = #tpu.dot_dimension_numbers<[1], [0], [0], [1], [0, 0, 1, 1], [], []>} : vector<32x256xbf16>, vector<256x1024xbf16>, vector<32x1024xf32> -> vector<32x1024xf32>
    %cst_97 = arith.constant 0.000000e+00 : f32
    %316 = vector.broadcast %cst_97 : f32 to vector<32x1024xf32>
    %317 = arith.maximumf %315, %316 : vector<32x1024xf32>
    %318 = arith.truncf %317 : vector<32x1024xf32> to vector<32x1024xbf16>
    %c0_98 = arith.constant 0 : index
    %c0_99 = arith.constant 0 : index
    %319 = vector.load %arg11[%c0_98, %c0_99] : memref<1024x256xbf16, #tpu.memory_space<vmem>>, vector<1024x256xbf16>
    %cst_100 = arith.constant dense<0.000000e+00> : vector<32x256xf32>
    %320 = tpu.matmul %318, %319, %cst_100 {dimension_numbers = #tpu.dot_dimension_numbers<[1], [0], [0], [1], [0, 0, 1, 1], [], []>} : vector<32x1024xbf16>, vector<1024x256xbf16>, vector<32x256xf32> -> vector<32x256xf32>
    %cst_101 = arith.constant 0.000000e+00 : f32
    %321 = vector.broadcast %cst_101 : f32 to vector<32x256xf32>
    %322 = arith.maximumf %320, %321 : vector<32x256xf32>
    %323 = vector.extract_strided_slice %6 {offsets = [4, 0], sizes = [1, 256], strides = [1, 1]} : vector<6x256xf32> to vector<1x256xf32>
    %324 = vector.extract_strided_slice %6 {offsets = [5, 0], sizes = [1, 256], strides = [1, 1]} : vector<6x256xf32> to vector<1x256xf32>
    %cst_102 = arith.constant dense<0.000000e+00> : vector<32xf32>
    %325 = vector.multi_reduction <add>, %322, %cst_102 [1] : vector<32x256xf32> to vector<32xf32>
    %326 = vector.shape_cast %325 : vector<32xf32> to vector<32x1xf32>
    %cst_103 = arith.constant 2.560000e+02 : f32
    %327 = vector.broadcast %cst_103 : f32 to vector<32x1xf32>
    %328 = arith.divf %326, %327 : vector<32x1xf32>
    %329 = vector.broadcast %328 : vector<32x1xf32> to vector<32x256xf32>
    %330 = arith.subf %322, %329 : vector<32x256xf32>
    %331 = arith.mulf %330, %330 : vector<32x256xf32>
    %cst_104 = arith.constant dense<0.000000e+00> : vector<32xf32>
    %332 = vector.multi_reduction <add>, %331, %cst_104 [1] : vector<32x256xf32> to vector<32xf32>
    %333 = vector.shape_cast %332 : vector<32xf32> to vector<32x1xf32>
    %cst_105 = arith.constant 2.560000e+02 : f32
    %334 = vector.broadcast %cst_105 : f32 to vector<32x1xf32>
    %335 = arith.divf %333, %334 : vector<32x1xf32>
    %336 = vector.broadcast %328 : vector<32x1xf32> to vector<32x256xf32>
    %337 = arith.subf %322, %336 : vector<32x256xf32>
    %cst_106 = arith.constant 9.99999974E-6 : f32
    %338 = vector.broadcast %cst_106 : f32 to vector<32x1xf32>
    %339 = arith.addf %335, %338 : vector<32x1xf32>
    %340 = math.rsqrt %339 : vector<32x1xf32>
    %341 = vector.broadcast %340 : vector<32x1xf32> to vector<32x256xf32>
    %342 = arith.mulf %337, %341 : vector<32x256xf32>
    %343 = vector.broadcast %323 : vector<1x256xf32> to vector<32x256xf32>
    %344 = arith.mulf %342, %343 : vector<32x256xf32>
    %345 = vector.broadcast %324 : vector<1x256xf32> to vector<32x256xf32>
    %346 = arith.addf %344, %345 : vector<32x256xf32>
    %347 = arith.addf %312, %346 : vector<32x256xf32>
    %348 = vector.shape_cast %347 : vector<32x256xf32> to vector<4x8x256xf32>
    %c0_107 = arith.constant 0 : index
    %c0_108 = arith.constant 0 : index
    %c0_109 = arith.constant 0 : index
    %349 = vector.load %arg13[%c0_107, %c0_108, %c0_109] : memref<4x8x256xf32, #tpu.memory_space<vmem>>, vector<4x8x256xf32>
    tpu.vector_store %arg13[%c0_107, %c0_108, %c0_109], %348 {strides = array<i32>} : memref<4x8x256xf32, #tpu.memory_space<vmem>>, vector<4x8x256xf32>,
    return
  }
  func.func @transform_0(%arg0: i32) -> (i32, i32, i32) {
    %c0_i32 = arith.constant 0 : i32
    %c0_i32_0 = arith.constant 0 : i32
    %c0_i32_1 = arith.constant 0 : i32
    %c0_i32_2 = arith.constant 0 : i32
    return %c0_i32, %c0_i32_0, %c0_i32_1 : i32, i32, i32
  }
  func.func @transform_1(%arg0: i32) -> (i32, i32, i32) {
    %c0_i32 = arith.constant 0 : i32
    %c0_i32_0 = arith.constant 0 : i32
    %c0_i32_1 = arith.constant 0 : i32
    %c0_i32_2 = arith.constant 0 : i32
    return %c0_i32, %c0_i32_0, %c0_i32_1 : i32, i32, i32
  }
  func.func @transform_2(%arg0: i32) -> (i32, i32, i32) {
    %c0_i32 = arith.constant 0 : i32
    %c0_i32_0 = arith.constant 0 : i32
    %c0_i32_1 = arith.constant 0 : i32
    %c0_i32_2 = arith.constant 0 : i32
    return %c0_i32, %c0_i32_0, %c0_i32_1 : i32, i32, i32
  }
  func.func @transform_3(%arg0: i32) -> (i32, i32, i32) {
    %c0_i32 = arith.constant 0 : i32
    %c0_i32_0 = arith.constant 0 : i32
    %c0_i32_1 = arith.constant 0 : i32
    %c0_i32_2 = arith.constant 0 : i32
    return %c0_i32, %c0_i32_0, %c0_i32_1 : i32, i32, i32
  }
  func.func @transform_4(%arg0: i32) -> (i32, i32) {
    %c0_i32 = arith.constant 0 : i32
    %c0_i32_0 = arith.constant 0 : i32
    %c0_i32_1 = arith.constant 0 : i32
    return %c0_i32, %c0_i32_0 : i32, i32
  }
  func.func @transform_5(%arg0: i32) -> (i32, i32) {
    %c0_i32 = arith.constant 0 : i32
    %c0_i32_0 = arith.constant 0 : i32
    %c0_i32_1 = arith.constant 0 : i32
    return %c0_i32, %c0_i32_0 : i32, i32
  }
  func.func @transform_6(%arg0: i32) -> (i32, i32) {
    %c0_i32 = arith.constant 0 : i32
    %c0_i32_0 = arith.constant 0 : i32
    %c0_i32_1 = arith.constant 0 : i32
    return %c0_i32, %c0_i32_0 : i32, i32
  }
  func.func @transform_7(%arg0: i32) -> (i32, i32) {
    %c0_i32 = arith.constant 0 : i32
    %c0_i32_0 = arith.constant 0 : i32
    %c0_i32_1 = arith.constant 0 : i32
    return %c0_i32, %c0_i32_0 : i32, i32
  }
  func.func @transform_8(%arg0: i32) -> (i32, i32) {
    %c0_i32 = arith.constant 0 : i32
    %c0_i32_0 = arith.constant 0 : i32
    %c0_i32_1 = arith.constant 0 : i32
    return %c0_i32, %c0_i32_0 : i32, i32
  }
  func.func @transform_9(%arg0: i32) -> (i32, i32) {
    %c0_i32 = arith.constant 0 : i32
    %c0_i32_0 = arith.constant 0 : i32
    %c0_i32_1 = arith.constant 0 : i32
    return %c0_i32, %c0_i32_0 : i32, i32
  }
  func.func @transform_10(%arg0: i32) -> (i32, i32) {
    %c0_i32 = arith.constant 0 : i32
    %c0_i32_0 = arith.constant 0 : i32
    %c0_i32_1 = arith.constant 0 : i32
    return %c0_i32, %c0_i32_0 : i32, i32
  }
  func.func @transform_11(%arg0: i32) -> (i32, i32) {
    %c0_i32 = arith.constant 0 : i32
    %c0_i32_0 = arith.constant 0 : i32
    %c0_i32_1 = arith.constant 0 : i32
    return %c0_i32, %c0_i32_0 : i32, i32
  }
  func.func @transform_12(%arg0: i32) -> (i32, i32, i32) {
    %c0_i32 = arith.constant 0 : i32
    %c0_i32_0 = arith.constant 0 : i32
    %c0_i32_1 = arith.constant 0 : i32
    %c0_i32_2 = arith.constant 0 : i32
    return %c0_i32, %c0_i32_0, %c0_i32_1 : i32, i32, i32
  }
}

</mosaic_0001>

<bundles_post_ra>
// kernel: decoder_block.1
= control target key start
LH: loop header
LB: loop body
LE: loop exit
PB: predicated region body
PF: predicated region fallthrough
CT: control target
= control target key end

     0   :  { %17 = vsyncpa [#allocation3], 0  ;;  %s12249_s0 = inlined_call_operand.vmem [shape: f32[4,8,8], index: 0, kind: input, shape index: {}]   ;;  %s12250_s1 = inlined_call_operand.vmem [shape: f32[4,8,8], index: 1, kind: input, shape index: {}]   ;;  %s12251_s2 = inlined_call_operand.vmem [shape: f32[4,8,256], index: 2, kind: input, shape index: {}]   ;;  %s12252_s3 = inlined_call_operand.hbm [shape: f32[4,8,256], index: 3, kind: input, shape index: {}]   ;;  %s12253_s4 = inlined_call_operand.hbm [shape: bf16[256,768], index: 4, kind: input, shape index: {}]   ;;  %s12254_s5 = inlined_call_operand.hbm [shape: bf16[256,256], index: 5, kind: input, shape index: {}]   ;;  %s12255_s6 = inlined_call_operand.hbm [shape: bf16[256,256], index: 6, kind: input, shape index: {}]   ;;  %s12256_s7 = inlined_call_operand.hbm [shape: bf16[256,512], index: 7, kind: input, shape index: {}]   ;;  %s12257_s8 = inlined_call_operand.hbm [shape: bf16[256,256], index: 8, kind: input, shape index: {}]   ;;  %s12258_s9 = inlined_call_operand.hbm [shape: bf16[256,1024], index: 9, kind: input, shape index: {}]   ;;  %s12259_s10 = inlined_call_operand.hbm [shape: bf16[1024,256], index: 10, kind: input, shape index: {}]   ;;  %s12260_s11 = inlined_call_operand.vmem [shape: f32[6,256], index: 11, kind: input, shape index: {}]   ;;  %s12261_s12 = inlined_call_operand.hbm [shape: f32[4,8,256], index: 12, kind: output, shape index: {}]  }
   0x1   :  { %18 = vsyncpa [#allocation6], 0 }
   0x2   :  { %19 = vsyncpa [#allocation9], 0 }
   0x3   :  { %20 = vsyncpa [#allocation12], 0 }
   0x4   :  { %21 = vsyncpa [#allocation15], 0 }
   0x5   :  { %22 = vsyncpa [#allocation4], 0  ;;  %s10665_s21 = smov [#allocation5]   ;;  %s10455_s25 = scalar_lea.hbm %s12253_s4, 12288 }
   0x6   :  { %s46_s22 = sshll.u32 %s10665_s21, 4  ;;  %p10456_p0 = scmp.ne.s32.totalorder %s12253_s4, %s10455_s25  ;;  %s47_s22 = int_to_ptr.vmem [resolvable:$true] %s46_s22 }
   0x7   :  { %p10459_p1 = scmp.lt.u32.totalorder %s10455_s25, %s12253_s4 }
   0x9   :  { %p10461_p2 = pnand %p10459_p1, %p10456_p0 }
   0xb   :  { %10464 = shalt.err (!%p10461_p2)
}
   0xc   :  { %s10465_s30 = scalar_lea.vmem %s47_s22, 12288  ;;  %p10470_p4 = scmp.lt.s32.totalorder %s47_s22, %s47_s22 }
   0xd   :  { %p10466_p3 = scmp.ne.s32.totalorder %s47_s22, %s10465_s30  ;;  %p10471_p5 = scmp.lt.s32.totalorder %s10465_s30, %s10465_s30 }
   0xf   :  { %p10472_p6 = por %p10471_p5, %p10470_p4 }
  0x11   :  { %p10473_p7 = pnand %p10472_p6, %p10466_p3 }
  0x13   :  { %10476 = shalt.err (!%p10473_p7)
}
  0x14   :  { %s10666_s13 = smov 384   ;;  %s10667_s14 = smov 24  }
  0x15   :  { %52 = dma.hbm_to_vmem [thread:$0]  %s12253_s4, 12288, %s47_s22, [#allocation6], %s10666_s13, %s10666_s13, %s10667_s14  }
  0x16   :  { %s10668_s17 = smov [#allocation8]   ;;  %s10669_s19 = smov [#allocation11]  }
  0x17   :  { %s70_s18 = sshll.u32 %s10668_s17, 4  ;;  %s94_s20 = sshll.u32 %s10669_s19, 4  ;;  %s71_s18 = int_to_ptr.vmem [resolvable:$true] %s70_s18  ;;  %s95_s20 = int_to_ptr.vmem [resolvable:$true] %s94_s20 }
  0x18   :  { %s10477_s24 = scalar_lea.hbm %s12255_s6, 4096 }
  0x19   :  { %p10478_p8 = scmp.ne.s32.totalorder %s12255_s6, %s10477_s24  ;;  %p10481_p9 = scmp.lt.u32.totalorder %s10477_s24, %s12255_s6 }
  0x1b   :  { %p10483_p10 = pnand %p10481_p9, %p10478_p8 }
  0x1d   :  { %10486 = shalt.err (!%p10483_p10)
}
  0x1e   :  { %s10487_s4 = scalar_lea.vmem %s71_s18, 4096  ;;  %p10492_p12 = scmp.lt.s32.totalorder %s71_s18, %s71_s18 }
  0x1f   :  { %p10488_p11 = scmp.ne.s32.totalorder %s71_s18, %s10487_s4  ;;  %p10493_p13 = scmp.lt.s32.totalorder %s10487_s4, %s10487_s4 }
  0x21   :  { %p10494_p0 = por %p10493_p13, %p10492_p12 }
  0x23   :  { %p10495_p1 = pnand %p10494_p0, %p10488_p11 }
  0x25   :  { %10498 = shalt.err (!%p10495_p1)
}
  0x26   :  { %s10670_s22 = smov 128   ;;  %s10671_s29 = smov 8  }
  0x27   :  { %76 = dma.hbm_to_vmem [thread:$0]  %s12255_s6, 4096, %s71_s18, [#allocation9], %s10670_s22, %s10670_s22, %s10671_s29  }
  0x28   :  { %s10499_s16 = scalar_lea.hbm %s12257_s8, 4096 }
  0x29   :  { %p10500_p2 = scmp.ne.s32.totalorder %s12257_s8, %s10499_s16  ;;  %p10503_p3 = scmp.lt.u32.totalorder %s10499_s16, %s12257_s8 }
  0x2b   :  { %p10505_p4 = pnand %p10503_p3, %p10500_p2 }
  0x2d   :  { %10508 = shalt.err (!%p10505_p4)
}
  0x2e   :  { %s10509_s24 = scalar_lea.vmem %s95_s20, 4096  ;;  %p10514_p6 = scmp.lt.s32.totalorder %s95_s20, %s95_s20 }
  0x2f   :  { %p10510_p5 = scmp.ne.s32.totalorder %s95_s20, %s10509_s24  ;;  %p10515_p7 = scmp.lt.s32.totalorder %s10509_s24, %s10509_s24 }
  0x31   :  { %p10516_p8 = por %p10515_p7, %p10514_p6 }
  0x33   :  { %p10517_p9 = pnand %p10516_p8, %p10510_p5 }
  0x35   :  { %10520 = shalt.err (!%p10517_p9)
}
  0x36   :  { %100 = dma.hbm_to_vmem [thread:$0]  %s12257_s8, 4096, %s95_s20, [#allocation12], %s10670_s22, %s10670_s22, %s10671_s29  }
  0x37   :  { %s10672_s25 = smov [#allocation2]   ;;  %s10521_s4 = scalar_lea.hbm %s12252_s3, 1024 }
  0x38   :  { %s34_s26 = sshll.u32 %s10672_s25, 4  ;;  %p10522_p10 = scmp.ne.s32.totalorder %s12252_s3, %s10521_s4  ;;  %s35_s26 = int_to_ptr.vmem [resolvable:$true] %s34_s26 }
  0x39   :  { %p10525_p11 = scmp.lt.u32.totalorder %s10521_s4, %s12252_s3 }
  0x3b   :  { %p10527_p12 = pnand %p10525_p11, %p10522_p10 }
  0x3d   :  { %10530 = shalt.err (!%p10527_p12)
}
  0x3e   :  { %s10531_s16 = scalar_lea.vmem %s35_s26, 1024  ;;  %p10536_p0 = scmp.lt.s32.totalorder %s35_s26, %s35_s26 }
  0x3f   :  { %p10532_p13 = scmp.ne.s32.totalorder %s35_s26, %s10531_s16  ;;  %p10537_p1 = scmp.lt.s32.totalorder %s10531_s16, %s10531_s16 }
  0x41   :  { %p10538_p2 = por %p10537_p1, %p10536_p0 }
  0x43   :  { %p10539_p3 = pnand %p10538_p2, %p10532_p13 }
  0x45   :  { %10542 = shalt.err (!%p10539_p3)
}
  0x46   :  { %s10673_s8 = smov 256   ;;  %s10674_s20 = smov 16  }
  0x47   :  { %40 = dma.hbm_to_vmem [thread:$0]  %s12252_s3, 1024, %s35_s26, [#allocation3], %s10673_s8, %s10673_s8, %s10674_s20  }
  0x48   :  { %s10675_s21 = smov [#allocation7]   ;;  %s10676_s24 = smov [#allocation10]  }
  0x49   :  { %s58_s23 = sshll.u32 %s10675_s21, 4  ;;  %s82_s6 = sshll.u32 %s10676_s24, 4  ;;  %s59_s23 = int_to_ptr.vmem [resolvable:$true] %s58_s23  ;;  %s10808_s6 = int_to_ptr.vmem [resolvable:$true] %s82_s6 }
  0x4a   :  { %s10543_s27 = scalar_lea.hbm %s12254_s5, 4096 }
  0x4b   :  { %p10544_p4 = scmp.ne.s32.totalorder %s12254_s5, %s10543_s27  ;;  %p10547_p5 = scmp.lt.u32.totalorder %s10543_s27, %s12254_s5 }
  0x4d   :  { %p10549_p6 = pnand %p10547_p5, %p10544_p4 }
  0x4f   :  { %10552 = shalt.err (!%p10549_p6)
}
  0x50   :  { %s10553_s3 = scalar_lea.vmem %s59_s23, 4096  ;;  %p10558_p8 = scmp.lt.s32.totalorder %s59_s23, %s59_s23 }
  0x51   :  { %p10554_p7 = scmp.ne.s32.totalorder %s59_s23, %s10553_s3  ;;  %p10559_p9 = scmp.lt.s32.totalorder %s10553_s3, %s10553_s3 }
  0x53   :  { %p10560_p10 = por %p10559_p9, %p10558_p8 }
  0x55   :  { %p10561_p11 = pnand %p10560_p10, %p10554_p7 }
  0x57   :  { %10564 = shalt.err (!%p10561_p11)
}
  0x58   :  { %64 = dma.hbm_to_vmem [thread:$0]  %s12254_s5, 4096, %s59_s23, [#allocation6], %s10670_s22, %s10670_s22, %s10671_s29  }
  0x59   :  { %s10565_s17 = scalar_lea.hbm %s12256_s7, 8192 }
  0x5a   :  { %p10566_p12 = scmp.ne.s32.totalorder %s12256_s7, %s10565_s17  ;;  %p10569_p13 = scmp.lt.u32.totalorder %s10565_s17, %s12256_s7 }
  0x5c   :  { %p10571_p0 = pnand %p10569_p13, %p10566_p12 }
  0x5e   :  { %10574 = shalt.err (!%p10571_p0)
}
  0x5f   :  { %s10575_s25 = scalar_lea.vmem %s10808_s6, 8192  ;;  %p10580_p2 = scmp.lt.s32.totalorder %s10808_s6, %s10808_s6 }
  0x60   :  { %p10576_p1 = scmp.ne.s32.totalorder %s10808_s6, %s10575_s25  ;;  %p10581_p3 = scmp.lt.s32.totalorder %s10575_s25, %s10575_s25 }
  0x62   :  { %p10582_p4 = por %p10581_p3, %p10580_p2 }
  0x64   :  { %p10583_p5 = pnand %p10582_p4, %p10576_p1 }
  0x66   :  { %10586 = shalt.err (!%p10583_p5)
}
  0x67   :  { %88 = dma.hbm_to_vmem [thread:$0]  %s12256_s7, 8192, %s10808_s6, [#allocation9], %s10673_s8, %s10673_s8, %s10674_s20  }
  0x68   :  { %s10677_s27 = smov [#allocation13]   ;;  %s10587_s13 = scalar_lea.hbm %s12258_s9, 16384 }
  0x69   :  { %s106_s28 = sshll.u32 %s10677_s27, 4  ;;  %p10588_p6 = scmp.ne.s32.totalorder %s12258_s9, %s10587_s13  ;;  %s107_s28 = int_to_ptr.vmem [resolvable:$true] %s106_s28 }
  0x6a   :  { %p10591_p7 = scmp.lt.u32.totalorder %s10587_s13, %s12258_s9 }
  0x6c   :  { %p10593_p8 = pnand %p10591_p7, %p10588_p6 }
  0x6e   :  { %10596 = shalt.err (!%p10593_p8)
}
  0x6f   :  { %s10597_s16 = scalar_lea.vmem %s107_s28, 16384  ;;  %p10602_p10 = scmp.lt.s32.totalorder %s107_s28, %s107_s28 }
  0x70   :  { %p10598_p9 = scmp.ne.s32.totalorder %s107_s28, %s10597_s16  ;;  %p10603_p11 = scmp.lt.s32.totalorder %s10597_s16, %s10597_s16 }
  0x72   :  { %p10604_p12 = por %p10603_p11, %p10602_p10 }
  0x74   :  { %p10605_p13 = pnand %p10604_p12, %p10598_p9 }
  0x76   :  { %10608 = shalt.err (!%p10605_p13)
}
  0x77   :  { %s10678_s7 = smov 512   ;;  %s10679_s6 = smov 32  }
  0x78   :  { %112 = dma.hbm_to_vmem [thread:$0]  %s12258_s9, 16384, %s107_s28, [#allocation12], %s10678_s7, %s10678_s7, %s10679_s6  }
  0x79   :  { %s10680_s21 = smov [#allocation14]   ;;  %s10609_s5 = scalar_lea.hbm %s12259_s10, 16384 }
  0x7a   :  { %s118_s24 = sshll.u32 %s10680_s21, 4  ;;  %p10610_p0 = scmp.ne.s32.totalorder %s12259_s10, %s10609_s5  ;;  %s119_s24 = int_to_ptr.vmem [resolvable:$true] %s118_s24 }
  0x7b   :  { %p10613_p1 = scmp.lt.u32.totalorder %s10609_s5, %s12259_s10 }
  0x7d   :  { %p10615_p2 = pnand %p10613_p1, %p10610_p0 }
  0x7f   :  { %10618 = shalt.err (!%p10615_p2)
}
  0x80   :  { %s10619_s13 = scalar_lea.vmem %s119_s24, 16384  ;;  %p10624_p4 = scmp.lt.s32.totalorder %s119_s24, %s119_s24 }
  0x81   :  { %p10620_p3 = scmp.ne.s32.totalorder %s119_s24, %s10619_s13  ;;  %p10625_p5 = scmp.lt.s32.totalorder %s10619_s13, %s10619_s13 }
  0x83   :  { %p10626_p6 = por %p10625_p5, %p10624_p4 }
  0x85   :  { %p10627_p7 = pnand %p10626_p6, %p10620_p3 }
  0x87   :  { %10630 = shalt.err (!%p10627_p7)
}
  0x88   :  { %124 = dma.hbm_to_vmem [thread:$0]  %s12259_s10, 16384, %s119_s24, [#allocation15], %s10670_s22, %s10670_s22, %s10671_s29  }
  0x89   :  { %10653 = dma.done.wait [#allocation3], 1024  }
  0x8a   :  { %10654 = vsyncadd [#allocation3], 4294966272 }
  0x8b   :  { %10655 = dma.done.wait [#allocation6], 16384  }
  0x8c   :  { %10656 = vsyncadd [#allocation6], 4294950912 }
  0x8d   :  { %10657 = dma.done.wait [#allocation9], 12288  }
  0x8e   :  { %10658 = vsyncadd [#allocation9], 4294955008 }
  0x8f   :  { %10659 = dma.done.wait [#allocation12], 20480  }
  0x90   :  { %10660 = vsyncadd [#allocation12], 4294946816 }
  0x91   :  { %10661 = dma.done.wait [#allocation15], 16384  }
  0x92   :  { %10662 = vsyncadd [#allocation15], 4294950912  ;;  %v9710_v0 = vld [vmem:[#allocation5 + $0x4] ss:$24 sps:$4 sm:$0xff]   ;;  %v9712_v1 = vld [vmem:[#allocation5] ss:$24 sps:$4 sm:$0xff]  }
  0x93   :  { %754 = vmatprep.subr.bf16.mxu0 %v9710_v0  ;;  %v9713_v2 = vld [vmem:[#allocation5 + $0x34] ss:$24 sps:$4 sm:$0xff]   ;;  %v9715_v3 = vld [vmem:[#allocation5 + $0x30] ss:$24 sps:$4 sm:$0xff]   ;;  %v9716_v4 = vld [vmem:[#allocation5 + $0x64] ss:$24 sps:$4 sm:$0xff]  }
  0x94   :  { %755 = vmatpush1.bf16.msra.mxu0 %v9712_v1  ;;  %v9718_v5 = vld [vmem:[#allocation5 + $0x60] ss:$24 sps:$4 sm:$0xff]   ;;  %v9719_v6 = vld [vmem:[#allocation5 + $0x94] ss:$24 sps:$4 sm:$0xff]   ;;  %v9721_v7 = vld [vmem:[#allocation5 + $0x90] ss:$24 sps:$4 sm:$0xff]  }
  0x95   :  { %756 = vmatprep.subr.bf16.mxu0 %v9713_v2  ;;  %v9722_v8 = vld [vmem:[#allocation5 + $0xc4] ss:$24 sps:$4 sm:$0xff]   ;;  %v9724_v9 = vld [vmem:[#allocation5 + $0xc0] ss:$24 sps:$4 sm:$0xff]   ;;  %v9725_v10 = vld [vmem:[#allocation5 + $0xf4] ss:$24 sps:$4 sm:$0xff]  }
  0x96   :  { %v9727_v11 = vld [vmem:[#allocation5 + $0xf0] ss:$24 sps:$4 sm:$0xff]   ;;  %v9728_v12 = vld [vmem:[#allocation5 + $0x124] ss:$24 sps:$4 sm:$0xff]   ;;  %v9730_v16 = vld [vmem:[#allocation5 + $0x120] ss:$24 sps:$4 sm:$0xff]  }
  0x97   :  { %v153_v13 = vld [vmem:[%s12251_s2 + $0x8] sm:$0xff]  ;;  %v155_v14 = vld [vmem:[%s12251_s2 + $0x18] sm:$0xff]  ;;  %v152_v35 = vld [vmem:[%s12251_s2] sm:$0xff]  ;;  %vm10682_vm0 = vmmov 0   ;;  %vm929_vm1 = vcmask 523264   ;;  %vm1122_vm2 = vcmask 64512  }
  0x98   :  { %757 = vmatpush1.bf16.msra.mxu0 %v9715_v3  ;;  %v10878_v15 = vpack.c.bf16 %v155_v14, %v153_v13  ;;  %v9731_v17 = vld [vmem:[#allocation5 + $0x154] ss:$24 sps:$4 sm:$0xff]   ;;  %v9733_v18 = vld [vmem:[#allocation5 + $0x150] ss:$24 sps:$4 sm:$0xff]   ;;  %v9734_v19 = vld [vmem:[#allocation5 + $0x184] ss:$24 sps:$4 sm:$0xff]  }
  0x99   :  { %758 = vmatprep.subr.bf16.mxu0 %v9716_v4  ;;  %v9736_v20 = vld [vmem:[#allocation5 + $0x180] ss:$24 sps:$4 sm:$0xff]   ;;  %v9737_v21 = vld [vmem:[#allocation5 + $0x1b4] ss:$24 sps:$4 sm:$0xff]   ;;  %v9739_v22 = vld [vmem:[#allocation5 + $0x1b0] ss:$24 sps:$4 sm:$0xff]  }
  0x9a   :  { %786 = vmatprep.mubr.bf16.mxu0 %v10878_v15  ;;  %v9740_v23 = vld [vmem:[#allocation5 + $0x1e4] ss:$24 sps:$4 sm:$0xff]   ;;  %v9742_v24 = vld [vmem:[#allocation5 + $0x1e0] ss:$24 sps:$4 sm:$0xff]   ;;  %v9743_v25 = vld [vmem:[#allocation5 + $0x214] ss:$24 sps:$4 sm:$0xff]  }
  0x9b   :  { %v9745_v26 = vld [vmem:[#allocation5 + $0x210] ss:$24 sps:$4 sm:$0xff]   ;;  %v9746_v27 = vld [vmem:[#allocation5 + $0x244] ss:$24 sps:$4 sm:$0xff]   ;;  %v9748_v28 = vld [vmem:[#allocation5 + $0x240] ss:$24 sps:$4 sm:$0xff]  }
  0x9c   :  { %759 = vmatpush1.bf16.msra.mxu0 %v9718_v5  ;;  %v9749_v29 = vld [vmem:[#allocation5 + $0x274] ss:$24 sps:$4 sm:$0xff]   ;;  %v9751_v30 = vld [vmem:[#allocation5 + $0x270] ss:$24 sps:$4 sm:$0xff]   ;;  %v9752_v31 = vld [vmem:[#allocation5 + $0x2a4] ss:$24 sps:$4 sm:$0xff]  }
  0x9d   :  { %760 = vmatprep.subr.bf16.mxu0 %v9719_v6  ;;  %v9754_v32 = vld [vmem:[#allocation5 + $0x2a0] ss:$24 sps:$4 sm:$0xff]   ;;  %v9755_v33 = vld [vmem:[#allocation5 + $0x2d4] ss:$24 sps:$4 sm:$0xff]   ;;  %v9757_v34 = vld [vmem:[#allocation5 + $0x2d0] ss:$24 sps:$4 sm:$0xff]  }
  0x9e   :  { %v154_v36 = vld [vmem:[%s12251_s2 + $0x10] sm:$0xff]  ;;  %v9760_v37 = vld [vmem:[#allocation5 + $0xc] ss:$24 sps:$4 sm:$0xff]   ;;  %v159_v39 = vld [vmem:[%s12251_s2 + $0x38] sm:$0xff]  ;;  %vm1174_vm3 = vcmask 1043456   ;;  %s10683_s10 = smov 64  }
  0x9f   :  { %v157_v38 = vld [vmem:[%s12251_s2 + $0x28] sm:$0xff]  ;;  %v10893_v41 = vpack.c.bf16 %v154_v36, %v152_v35  ;;  %v9763_v42 = vld [vmem:[#allocation5 + $0x3c] ss:$24 sps:$4 sm:$0xff]   ;;  %v9761_v44 = vld [vmem:[#allocation5 + $0x38] ss:$24 sps:$4 sm:$0xff]  }
  0xa0   :  { %761 = vmatpush1.bf16.msra.mxu0 %v9721_v7  ;;  %v9758_v40 = vld [vmem:[#allocation5 + $0x8] ss:$24 sps:$4 sm:$0xff]   ;;  %v10895_v43 = vpack.c.bf16 %v159_v39, %v157_v38  ;;  %v158_v46 = vld [vmem:[%s12251_s2 + $0x30] sm:$0xff]  ;;  %v9766_v47 = vld [vmem:[#allocation5 + $0x6c] ss:$24 sps:$4 sm:$0xff]  }
  0xa1   :  { %762 = vmatprep.subr.bf16.mxu0 %v9722_v8  ;;  %v156_v45 = vld [vmem:[%s12251_s2 + $0x20] sm:$0xff]  ;;  %v9769_v49 = vld [vmem:[#allocation5 + $0x9c] ss:$24 sps:$4 sm:$0xff]   ;;  %v9767_v51 = vld [vmem:[#allocation5 + $0x98] ss:$24 sps:$4 sm:$0xff]  }
  0xa2   :  { %v9764_v48 = vld [vmem:[#allocation5 + $0x68] ss:$24 sps:$4 sm:$0xff]   ;;  %v10905_v50 = vpack.c.bf16 %v158_v46, %v156_v45  ;;  %v9772_v52 = vld [vmem:[#allocation5 + $0xcc] ss:$24 sps:$4 sm:$0xff]   ;;  %v9775_v54 = vld [vmem:[#allocation5 + $0xfc] ss:$24 sps:$4 sm:$0xff]  }
  0xa3   :  { %v9770_v53 = vld [vmem:[#allocation5 + $0xc8] ss:$24 sps:$4 sm:$0xff]   ;;  %v9773_v55 = vld [vmem:[#allocation5 + $0xf8] ss:$24 sps:$4 sm:$0xff]   ;;  %v9778_v56 = vld [vmem:[#allocation5 + $0x12c] ss:$24 sps:$4 sm:$0xff]  }
  0xa4   :  { %763 = vmatpush1.bf16.msra.mxu0 %v9724_v9  ;;  %v9776_v57 = vld [vmem:[#allocation5 + $0x128] ss:$24 sps:$4 sm:$0xff]   ;;  %v9781_v58 = vld [vmem:[#allocation5 + $0x15c] ss:$24 sps:$4 sm:$0xff]   ;;  %v9779_v59 = vld [vmem:[#allocation5 + $0x158] ss:$24 sps:$4 sm:$0xff]  }
  0xa5   :  { %764 = vmatprep.subr.bf16.mxu0 %v9725_v10  ;;  %v9784_v60 = vld [vmem:[#allocation5 + $0x18c] ss:$24 sps:$4 sm:$0xff]   ;;  %v9782_v61 = vld [vmem:[#allocation5 + $0x188] ss:$24 sps:$4 sm:$0xff]   ;;  %v9787_v62 = vld [vmem:[#allocation5 + $0x1bc] ss:$24 sps:$4 sm:$0xff]  }
  0xa6   :  { %v9785_v63 = vld [vmem:[#allocation5 + $0x1b8] ss:$24 sps:$4 sm:$0xff]   ;;  %v9790_v0 = vld [vmem:[#allocation5 + $0x1ec] ss:$24 sps:$4 sm:$0xff]   ;;  %v9788_v1 = vld [vmem:[#allocation5 + $0x1e8] ss:$24 sps:$4 sm:$0xff]  }
  0xa7   :  { %v9793_v2 = vld [vmem:[#allocation5 + $0x21c] ss:$24 sps:$4 sm:$0xff]   ;;  %v9791_v3 = vld [vmem:[#allocation5 + $0x218] ss:$24 sps:$4 sm:$0xff]   ;;  %v9796_v4 = vld [vmem:[#allocation5 + $0x24c] ss:$24 sps:$4 sm:$0xff]  }
  0xa8   :  { %765 = vmatpush1.bf16.msra.mxu0 %v9727_v11  ;;  %v9794_v5 = vld [vmem:[#allocation5 + $0x248] ss:$24 sps:$4 sm:$0xff]   ;;  %v9799_v6 = vld [vmem:[#allocation5 + $0x27c] ss:$24 sps:$4 sm:$0xff]   ;;  %v9797_v7 = vld [vmem:[#allocation5 + $0x278] ss:$24 sps:$4 sm:$0xff]  }
  0xa9   :  { %766 = vmatprep.subr.bf16.mxu0 %v9728_v12  ;;  %v9802_v8 = vld [vmem:[#allocation5 + $0x2ac] ss:$24 sps:$4 sm:$0xff]   ;;  %v9800_v9 = vld [vmem:[#allocation5 + $0x2a8] ss:$24 sps:$4 sm:$0xff]   ;;  %v9805_v10 = vld [vmem:[#allocation5 + $0x2dc] ss:$24 sps:$4 sm:$0xff]  }
  0xaa   :  { %v9803_v11 = vld [vmem:[#allocation5 + $0x2d8] ss:$24 sps:$4 sm:$0xff]   ;;  %v10681_v12 = vmov 0.0   ;;  %v9811_v45 = vld [vmem:[#allocation5 + $0x44] ss:$24 sps:$4 sm:$0xff]  }
  0xab   :  { %9233 = vmatprep.subr.bf16.mxu1 %v10681_v12  ;;  %9235 = vmatprep.mubr.msk.bf16.mxu1 %vm10682_vm0, %v10681_v12  ;;  %v9809_v46 = vld [vmem:[#allocation5 + $0x40] ss:$24 sps:$4 sm:$0xff]  }
  0xac   :  { %767 = vmatpush1.bf16.msra.mxu0 %v9730_v16 }
  0xad   :  { %768 = vmatprep.subr.bf16.mxu0 %v9731_v17 }
  0xb0   :  { %769 = vmatpush1.bf16.msra.mxu0 %v9733_v18 }
  0xb1   :  { %770 = vmatprep.subr.bf16.mxu0 %v9734_v19 }
  0xb4   :  { %771 = vmatpush1.bf16.msra.mxu0 %v9736_v20 }
  0xb5   :  { %772 = vmatprep.subr.bf16.mxu0 %v9737_v21 }
  0xb8   :  { %773 = vmatpush1.bf16.msra.mxu0 %v9739_v22 }
  0xb9   :  { %774 = vmatprep.subr.bf16.mxu0 %v9740_v23 }
  0xbc   :  { %775 = vmatpush1.bf16.msra.mxu0 %v9742_v24 }
  0xbd   :  { %776 = vmatprep.subr.bf16.mxu0 %v9743_v25 }
  0xc0   :  { %777 = vmatpush1.bf16.msra.mxu0 %v9745_v26 }
  0xc1   :  { %778 = vmatprep.subr.bf16.mxu0 %v9746_v27 }
  0xc4   :  { %779 = vmatpush1.bf16.msra.mxu0 %v9748_v28 }
  0xc5   :  { %780 = vmatprep.subr.bf16.mxu0 %v9749_v29 }
  0xc8   :  { %781 = vmatpush1.bf16.msra.mxu0 %v9751_v30 }
  0xc9   :  { %782 = vmatprep.subr.bf16.mxu0 %v9752_v31 }
  0xcc   :  { %783 = vmatpush1.bf16.msra.mxu0 %v9754_v32 }
  0xcd   :  { %784 = vmatprep.subr.bf16.mxu0 %v9755_v33 }
  0xd0   :  { %785 = vmatpush1.bf16.msra.mxu0 %v9757_v34 }
  0xd1   :  { %807 = vmatprep.subr.bf16.mxu0 %v9760_v37 }
  0xd3   :  { %787 = vmatmul.mubr.bf16.vlgmr.msra.gmra.mrb[0].mxu0 %v10893_v41 }
  0xd4   :  { %808 = vmatpush1.bf16.msra.mxu0 %v9758_v40  ;;  %796 = vmatprep.mubr.bf16.mxu0 %v10895_v43 }
  0xd5   :  { %809 = vmatprep.subr.bf16.mxu0 %v9763_v42  ;;  %v9806_v42 = vld [vmem:[#allocation5 + $0x10] ss:$24 sps:$4 sm:$0xff]  }
  0xd8   :  { %810 = vmatpush1.bf16.msra.mxu0 %v9761_v44  ;;  %v9808_v44 = vld [vmem:[#allocation5 + $0x14] ss:$24 sps:$4 sm:$0xff]  }
  0xd9   :  { %811 = vmatprep.subr.bf16.mxu0 %v9766_v47  ;;  %v9814_v47 = vld [vmem:[#allocation5 + $0x74] ss:$24 sps:$4 sm:$0xff]  }
  0xdb   :  { %797 = vmatmul.mubr.bf16.gmra.mrb[4].mxu0 %v10905_v50 }
  0xdc   :  { %812 = vmatpush1.bf16.msra.mxu0 %v9764_v48  ;;  %839 = vmatprep.mubr.bf16.mxu0 %v10878_v15  ;;  %v9812_v48 = vld [vmem:[#allocation5 + $0x70] ss:$24 sps:$4 sm:$0xff]  }
  0xdd   :  { %813 = vmatprep.subr.bf16.mxu0 %v9769_v49  ;;  %v9817_v49 = vld [vmem:[#allocation5 + $0xa4] ss:$24 sps:$4 sm:$0xff]  }
  0xe0   :  { %814 = vmatpush1.bf16.msra.mxu0 %v9767_v51  ;;  %v9815_v51 = vld [vmem:[#allocation5 + $0xa0] ss:$24 sps:$4 sm:$0xff]  }
  0xe1   :  { %815 = vmatprep.subr.bf16.mxu0 %v9772_v52  ;;  %v9820_v52 = vld [vmem:[#allocation5 + $0xd4] ss:$24 sps:$4 sm:$0xff]  }
  0xe4   :  { %816 = vmatpush1.bf16.msra.mxu0 %v9770_v53  ;;  %v9818_v53 = vld [vmem:[#allocation5 + $0xd0] ss:$24 sps:$4 sm:$0xff]  }
  0xe5   :  { %817 = vmatprep.subr.bf16.mxu0 %v9775_v54  ;;  %v9823_v54 = vld [vmem:[#allocation5 + $0x104] ss:$24 sps:$4 sm:$0xff]  }
  0xe8   :  { %818 = vmatpush1.bf16.msra.mxu0 %v9773_v55  ;;  %v9821_v55 = vld [vmem:[#allocation5 + $0x100] ss:$24 sps:$4 sm:$0xff]  }
  0xe9   :  { %819 = vmatprep.subr.bf16.mxu0 %v9778_v56  ;;  %v9826_v56 = vld [vmem:[#allocation5 + $0x134] ss:$24 sps:$4 sm:$0xff]  }
  0xec   :  { %820 = vmatpush1.bf16.msra.mxu0 %v9776_v57  ;;  %v9824_v57 = vld [vmem:[#allocation5 + $0x130] ss:$24 sps:$4 sm:$0xff]  }
  0xed   :  { %821 = vmatprep.subr.bf16.mxu0 %v9781_v58  ;;  %v9829_v58 = vld [vmem:[#allocation5 + $0x164] ss:$24 sps:$4 sm:$0xff]  }
  0xf0   :  { %822 = vmatpush1.bf16.msra.mxu0 %v9779_v59  ;;  %v9827_v59 = vld [vmem:[#allocation5 + $0x160] ss:$24 sps:$4 sm:$0xff]  }
  0xf1   :  { %823 = vmatprep.subr.bf16.mxu0 %v9784_v60  ;;  %v9832_v60 = vld [vmem:[#allocation5 + $0x194] ss:$24 sps:$4 sm:$0xff]  }
  0xf4   :  { %824 = vmatpush1.bf16.msra.mxu0 %v9782_v61  ;;  %v9830_v61 = vld [vmem:[#allocation5 + $0x190] ss:$24 sps:$4 sm:$0xff]  }
  0xf5   :  { %825 = vmatprep.subr.bf16.mxu0 %v9787_v62  ;;  %v9835_v62 = vld [vmem:[#allocation5 + $0x1c4] ss:$24 sps:$4 sm:$0xff]  }
  0xf8   :  { %826 = vmatpush1.bf16.msra.mxu0 %v9785_v63  ;;  %v9833_v63 = vld [vmem:[#allocation5 + $0x1c0] ss:$24 sps:$4 sm:$0xff]  }
  0xf9   :  { %827 = vmatprep.subr.bf16.mxu0 %v9790_v0  ;;  %v9838_v0 = vld [vmem:[#allocation5 + $0x1f4] ss:$24 sps:$4 sm:$0xff]  }
  0xfc   :  { %828 = vmatpush1.bf16.msra.mxu0 %v9788_v1  ;;  %v9836_v1 = vld [vmem:[#allocation5 + $0x1f0] ss:$24 sps:$4 sm:$0xff]  }
  0xfd   :  { %829 = vmatprep.subr.bf16.mxu0 %v9793_v2  ;;  %v9841_v2 = vld [vmem:[#allocation5 + $0x224] ss:$24 sps:$4 sm:$0xff]  }
 0x100   :  { %830 = vmatpush1.bf16.msra.mxu0 %v9791_v3  ;;  %v9839_v3 = vld [vmem:[#allocation5 + $0x220] ss:$24 sps:$4 sm:$0xff]  }
 0x101   :  { %831 = vmatprep.subr.bf16.mxu0 %v9796_v4  ;;  %v9844_v4 = vld [vmem:[#allocation5 + $0x254] ss:$24 sps:$4 sm:$0xff]  }
 0x104   :  { %832 = vmatpush1.bf16.msra.mxu0 %v9794_v5  ;;  %v9842_v5 = vld [vmem:[#allocation5 + $0x250] ss:$24 sps:$4 sm:$0xff]  }
 0x105   :  { %833 = vmatprep.subr.bf16.mxu0 %v9799_v6  ;;  %v9847_v6 = vld [vmem:[#allocation5 + $0x284] ss:$24 sps:$4 sm:$0xff]  }
 0x108   :  { %834 = vmatpush1.bf16.msra.mxu0 %v9797_v7  ;;  %v9845_v7 = vld [vmem:[#allocation5 + $0x280] ss:$24 sps:$4 sm:$0xff]  }
 0x109   :  { %835 = vmatprep.subr.bf16.mxu0 %v9802_v8  ;;  %v9850_v8 = vld [vmem:[#allocation5 + $0x2b4] ss:$24 sps:$4 sm:$0xff]  }
 0x10c   :  { %836 = vmatpush1.bf16.msra.mxu0 %v9800_v9  ;;  %v9848_v9 = vld [vmem:[#allocation5 + $0x2b0] ss:$24 sps:$4 sm:$0xff]  }
 0x10d   :  { %837 = vmatprep.subr.bf16.mxu0 %v9805_v10  ;;  %v9853_v10 = vld [vmem:[#allocation5 + $0x2e4] ss:$24 sps:$4 sm:$0xff]  }
 0x110   :  { %838 = vmatpush1.bf16.msra.mxu0 %v9803_v11  ;;  %v9851_v11 = vld [vmem:[#allocation5 + $0x2e0] ss:$24 sps:$4 sm:$0xff]  }
 0x111   :  { %860 = vmatprep.subr.bf16.mxu0 %v9808_v44 }
 0x113   :  { %840 = vmatmul.mubr.bf16.vlgmr.msra.gmra.mrb[8].mxu0 %v10893_v41 }
 0x114   :  { %849 = vmatprep.mubr.bf16.mxu0 %v10895_v43  ;;  %861 = vmatpush1.bf16.msra.mxu0 %v9806_v42 }
 0x115   :  { %862 = vmatprep.subr.bf16.mxu0 %v9811_v45  ;;  %v10999_v45 = vld [vmem:[%s12249_s0 + $0x10] sm:$0xff] }
 0x118   :  { %863 = vmatpush1.bf16.msra.mxu0 %v9809_v46 }
 0x119   :  { %864 = vmatprep.subr.bf16.mxu0 %v9814_v47 }
 0x11b   :  { %850 = vmatmul.mubr.bf16.gmra.mrb[12].mxu0 %v10905_v50 }
 0x11c   :  { %892 = vmatprep.mubr.bf16.mxu0 %v10878_v15  ;;  %865 = vmatpush1.bf16.msra.mxu0 %v9812_v48 }
 0x11d   :  { %866 = vmatprep.subr.bf16.mxu0 %v9817_v49 }
 0x120   :  { %867 = vmatpush1.bf16.msra.mxu0 %v9815_v51 }
 0x121   :  { %868 = vmatprep.subr.bf16.mxu0 %v9820_v52 }
 0x124   :  { %869 = vmatpush1.bf16.msra.mxu0 %v9818_v53 }
 0x125   :  { %870 = vmatprep.subr.bf16.mxu0 %v9823_v54  ;;  %v11006_v54 = vld [vmem:[%s12249_s0 + $0x18] sm:$0xff] }
 0x128   :  { %871 = vmatpush1.bf16.msra.mxu0 %v9821_v55 }
 0x129   :  { %872 = vmatprep.subr.bf16.mxu0 %v9826_v56 }
 0x12c   :  { %873 = vmatpush1.bf16.msra.mxu0 %v9824_v57 }
 0x12d   :  { %874 = vmatprep.subr.bf16.mxu0 %v9829_v58 }
 0x130   :  { %875 = vmatpush1.bf16.msra.mxu0 %v9827_v59 }
 0x131   :  { %876 = vmatprep.subr.bf16.mxu0 %v9832_v60 }
 0x134   :  { %877 = vmatpush1.bf16.msra.mxu0 %v9830_v61 }
 0x135   :  { %878 = vmatprep.subr.bf16.mxu0 %v9835_v62 }
 0x138   :  { %879 = vmatpush1.bf16.msra.mxu0 %v9833_v63 }
 0x139   :  { %880 = vmatprep.subr.bf16.mxu0 %v9838_v0 }
 0x13c   :  { %881 = vmatpush1.bf16.msra.mxu0 %v9836_v1 }
 0x13d   :  { %882 = vmatprep.subr.bf16.mxu0 %v9841_v2 }
 0x140   :  { %883 = vmatpush1.bf16.msra.mxu0 %v9839_v3 }
 0x141   :  { %884 = vmatprep.subr.bf16.mxu0 %v9844_v4 }
 0x144   :  { %885 = vmatpush1.bf16.msra.mxu0 %v9842_v5 }
 0x145   :  { %886 = vmatprep.subr.bf16.mxu0 %v9847_v6 }
 0x148   :  { %887 = vmatpush1.bf16.msra.mxu0 %v9845_v7 }
 0x149   :  { %888 = vmatprep.subr.bf16.mxu0 %v9850_v8 }
 0x14c   :  { %889 = vmatpush1.bf16.msra.mxu0 %v9848_v9 }
 0x14d   :  { %890 = vmatprep.subr.bf16.mxu0 %v9853_v10 }
 0x150   :  { %891 = vmatpush1.bf16.msra.mxu0 %v9851_v11 }
 0x151   :  { %9293 = vmatprep.subr.bf16.mxu0 %v10681_v12 }
 0x153   :  { %893 = vmatmul.mubr.bf16.vlgmr.msra.gmra.mrb[16].mxu0 %v10893_v41 }
 0x154   :  { %902 = vmatprep.mubr.bf16.mxu0 %v10895_v43 }
 0x15b   :  { %903 = vmatmul.mubr.bf16.gmra.mrb[20].mxu0 %v10905_v50 }
 0x15c   :  { %9295 = vmatprep.mubr.msk.bf16.mxu0 %vm10682_vm0, %v10681_v12 }
 0x1a6   :  { %v788_v13 = vpop.f32.mrb[0].mxu0 }
 0x1a7   :  { %v10916_v14 = vpop.f32.mrb[1].mxu0  ;;  %v10935_v29 = vpack.c.bf16 %v788_v13, %v788_v13 }
 0x1a8   :  { %v792_v16 = vpop.f32.mrb[2].mxu0 }
 0x1a9   :  { %v10918_v17 = vpop.f32.mrb[3].mxu0  ;;  %v10950_v35 = vpack.c.bf16 %v792_v16, %v792_v16  ;;  %v10985_v16 = vld [vmem:[%s12249_s0] sm:$0xff] }
 0x1ae   :  { %v798_v18 = vpop.f32.mrb[4].mxu0 }
 0x1af   :  { %v10920_v19 = vpop.f32.mrb[5].mxu0  ;;  %v10961_v38 = vpack.c.bf16 %v798_v18, %v798_v18 }
 0x1b0   :  { %v802_v20 = vpop.f32.mrb[6].mxu0 }
 0x1b1   :  { %v10922_v21 = vpop.f32.mrb[7].mxu0  ;;  %v10970_v40 = vpack.c.bf16 %v802_v20, %v802_v20 }
 0x1e6   :  { %v841_v15 = vpop.f32.mrb[8].mxu0 }
 0x1e7   :  { %v10924_v22 = vpack.c.bf16 %v841_v15, %v841_v15  ;;  %v10926_v23 = vpop.f32.mrb[9].mxu0 }
 0x1e8   :  { %v845_v24 = vpop.f32.mrb[10].mxu0 }
 0x1e9   :  { %v10928_v25 = vpop.f32.mrb[11].mxu0  ;;  %v934_v26 = vsel %vm929_vm1, %v10924_v22, 0  ;;  %v10933_v27 = vpack.c.bf16 %v845_v24, %v845_v24 }
 0x1ea   :  { %9234 = vmatpush3.bf16.xpose.msra.mxu1 %v934_v26  ;;  %v10992_v26 = vld [vmem:[%s12249_s0 + $0x8] sm:$0xff] }
 0x1eb   :  { %9239 = vmatprep.subr.bf16.mxu1 %v10681_v12  ;;  %v980_v32 = vsel %vm929_vm1, %v10933_v27, 0 }
 0x1ee   :  { %v851_v28 = vpop.f32.mrb[12].mxu0 }
 0x1ef   :  { %v10937_v30 = vpop.f32.mrb[13].mxu0  ;;  %v10947_v34 = vpack.c.bf16 %v851_v28, %v851_v28 }
 0x1f0   :  { %v855_v31 = vpop.f32.mrb[14].mxu0 }
 0x1f1   :  { %9236 = vmatmul.mubr.msk.bf16.vlgmr.msra.gmra.mrb[0].mxu1 %vm929_vm1, %v10935_v29  ;;  %v10943_v33 = vpop.f32.mrb[15].mxu0  ;;  %v1026_v36 = vsel %vm929_vm1, %v10947_v34, 0  ;;  %v10959_v37 = vpack.c.bf16 %v855_v31, %v855_v31 }
 0x1f2   :  { %9240 = vmatpush3.bf16.xpose.msra.mxu1 %v980_v32  ;;  %9241 = vmatprep.mubr.msk.bf16.mxu1 %vm10682_vm0, %v10681_v12 }
 0x1f3   :  { %9245 = vmatprep.subr.bf16.mxu1 %v10681_v12  ;;  %v1072_v39 = vsel %vm929_vm1, %v10959_v37, 0 }
 0x1f9   :  { %9242 = vmatmul.mubr.msk.bf16.vlgmr.msra.gmra.mrb[4].mxu1 %vm929_vm1, %v10950_v35 }
 0x1fa   :  { %9246 = vmatpush3.bf16.xpose.msra.mxu1 %v1026_v36  ;;  %9247 = vmatprep.mubr.msk.bf16.mxu1 %vm10682_vm0, %v10681_v12 }
 0x1fb   :  { %9251 = vmatprep.subr.bf16.mxu1 %v10681_v12 }
 0x201   :  { %9248 = vmatmul.mubr.msk.bf16.vlgmr.msra.gmra.mrb[8].mxu1 %vm929_vm1, %v10961_v38 }
 0x202   :  { %9252 = vmatpush3.bf16.xpose.msra.mxu1 %v1072_v39  ;;  %9253 = vmatprep.mubr.msk.bf16.mxu1 %vm10682_vm0, %v10681_v12 }
 0x203   :  { %9257 = vmatprep.subr.bf16.mxu1 %v10681_v12 }
 0x209   :  { %9254 = vmatmul.mubr.msk.bf16.vlgmr.msra.gmra.mrb[12].mxu1 %vm929_vm1, %v10970_v40 }
 0x20a   :  { %9259 = vmatprep.mubr.msk.bf16.mxu1 %vm10682_vm0, %v10681_v12 }
 0x2c4   :  { %v970_v13 = vpop.f32.mrb[0].mxu1 }
 0x2c5   :  { %v1114_v18 = vmul.f32 0.125, %v970_v13  ;;  %v9237_v20 = vpop.f32.mrb[1].mxu1 }
 0x2c6   :  { %v973_v15 = vpop.f32.mrb[2].mxu1 }
 0x2c7   :  { %v9238_v24 = vpop.f32.mrb[3].mxu1  ;;  %v1118_v41 = vadd.f32 %v1114_v18, %v10985_v16  ;;  %v894_v15 = vpop.f32.mrb[16].mxu0 }
 0x2c8   :  { %v11013_v24 = vpack.c.bf16 %v894_v15, %v894_v15 }
 0x2c9   :  { %v1123_v43 = vsel %vm1122_vm2, %v1118_v41, -inf }
 0x2ca   :  { %1124 = vmax.xlane.f32.xlu0 %v1123_v43  ;;  %v1176_v43 = vsel %vm1174_vm3, %v11013_v24, 0 }
 0x2cb   :  { %9258 = vmatpush3.bf16.msra.mxu1 %v1176_v43 }
 0x2cc   :  { %v1016_v50 = vpop.f32.mrb[4].mxu1  ;;  %9263 = vmatprep.subr.bf16.mxu1 %v10681_v12 }
 0x2cd   :  { %v1115_v28 = vmul.f32 0.125, %v1016_v50  ;;  %v9243_v31 = vpop.f32.mrb[5].mxu1 }
 0x2ce   :  { %v1019_v32 = vpop.f32.mrb[6].mxu1 }
 0x2cf   :  { %v9244_v36 = vpop.f32.mrb[7].mxu1  ;;  %v1119_v39 = vadd.f32 %v1115_v28, %v10992_v26 }
 0x2d1   :  { %v1126_v42 = vsel %vm1122_vm2, %v1119_v39, -inf }
 0x2d2   :  { %1127 = vmax.xlane.f32.xlu0 %v1126_v42 }
 0x2d4   :  { %v1062_v44 = vpop.f32.mrb[8].mxu1 }
 0x2d5   :  { %v1116_v46 = vmul.f32 0.125, %v1062_v44  ;;  %v9249_v47 = vpop.f32.mrb[9].mxu1 }
 0x2d6   :  { %v1065_v48 = vpop.f32.mrb[10].mxu1 }
 0x2d7   :  { %v9250_v49 = vpop.f32.mrb[11].mxu1  ;;  %v1120_v51 = vadd.f32 %v1116_v46, %v10999_v45 }
 0x2d9   :  { %v1129_v52 = vsel %vm1122_vm2, %v1120_v51, -inf }
 0x2da   :  { %1130 = vmax.xlane.f32.xlu1 %v1129_v52 }
 0x2dc   :  { %v1108_v53 = vpop.f32.mrb[12].mxu1 }
 0x2dd   :  { %v1117_v55 = vmul.f32 0.125, %v1108_v53  ;;  %v9255_v56 = vpop.f32.mrb[13].mxu1 }
 0x2de   :  { %v1111_v57 = vpop.f32.mrb[14].mxu1 }
 0x2df   :  { %v9256_v58 = vpop.f32.mrb[15].mxu1  ;;  %v1121_v59 = vadd.f32 %v1117_v55, %v11006_v54 }
 0x2e1   :  { %v1132_v60 = vsel %vm1122_vm2, %v1121_v59, -inf }
 0x2e2   :  { %1133 = vmax.xlane.f32.xlu1 %v1132_v60 }
 0x357   :  { %v1125_v61 = vpop.xlane.xlu0 %1124 }
 0x358   :  { %v1135_v62 = vsub.f32 %v1118_v41, %v1125_v61  ;;  %v11015_v41 = vpop.f32.mrb[17].mxu0 }
 0x359   :  { %v898_v50 = vpop.f32.mrb[18].mxu0 }
 0x35a   :  { %v1139_v63 = vmul.f32 1.442695, %v1135_v62  ;;  %v11020_v31 = vpop.f32.mrb[19].mxu0  ;;  %v11039_v48 = vpack.c.bf16 %v898_v50, %v898_v50 }
 0x35b   :  { %v904_v36 = vpop.f32.mrb[20].mxu0 }
 0x35c   :  { %10286 = vpow2.f32 %v1139_v63 }
 0x35f   :  { %v1128_v0 = vpop.xlane.xlu0 %1127 }
 0x360   :  { %v1136_v1 = vsub.f32 %v1119_v39, %v1128_v0  ;;  %v11023_v39 = vpop.f32.mrb[21].mxu0 }
 0x361   :  { %v908_v42 = vpop.f32.mrb[22].mxu0 }
 0x362   :  { %v1141_v2 = vmul.f32 1.442695, %v1136_v1  ;;  %v11027_v44 = vpop.f32.mrb[23].mxu0  ;;  %v11055_v57 = vpack.c.bf16 %v908_v42, %v908_v42 }
 0x364   :  { %10288 = vpow2.f32 %v1141_v2  ;;  %v1314_v60 = vsel %vm1174_vm3, %v11055_v57, 0 }
 0x366   :  { %v10287_v3 = vpop.eup %10286 }
 0x367   :  { %v1131_v4 = vpop.xlane.xlu1 %1130  ;;  %v1147_v5 = vsel %vm1122_vm2, %v10287_v3, 0.0 }
 0x368   :  { %v1137_v6 = vsub.f32 %v1120_v51, %v1131_v4  ;;  %1148 = vadd.xlane.f32.xlu0 %v1147_v5 }
 0x36a   :  { %v1143_v7 = vmul.f32 1.442695, %v1137_v6 }
 0x36c   :  { %10290 = vpow2.f32 %v1143_v7 }
 0x36e   :  { %v10289_v8 = vpop.eup %10288 }
 0x36f   :  { %v1134_v9 = vpop.xlane.xlu1 %1133  ;;  %v1150_v10 = vsel %vm1122_vm2, %v10289_v8, 0.0 }
 0x370   :  { %v1138_v11 = vsub.f32 %v1121_v59, %v1134_v9  ;;  %1151 = vadd.xlane.f32.xlu1 %v1150_v10 }
 0x372   :  { %v1145_v13 = vmul.f32 1.442695, %v1138_v11 }
 0x374   :  { %10292 = vpow2.f32 %v1145_v13 }
 0x376   :  { %v10291_v18 = vpop.eup %10290 }
 0x377   :  { %v1153_v20 = vsel %vm1122_vm2, %v10291_v18, 0.0 }
 0x378   :  { %1154 = vadd.xlane.f32.xlu0 %v1153_v20 }
 0x37e   :  { %v10293_v28 = vpop.eup %10292 }
 0x37f   :  { %v1156_v32 = vsel %vm1122_vm2, %v10293_v28, 0.0 }
 0x380   :  { %1157 = vadd.xlane.f32.xlu1 %v1156_v32 }
 0x38e   :  { %1370 = vrot.lane.b32.xlu0 %v10924_v22, %s10683_s10 }
 0x391   :  { %1367 = vrot.lane.b32.xlu1 %v10935_v29, %s10683_s10 }
 0x392   :  { %1526 = vrot.lane.b32.xlu0 %v10959_v37, %s10683_s10  ;;  %v1222_v37 = vsel %vm1174_vm3, %v11039_v48, 0 }
 0x395   :  { %1422 = vrot.lane.b32.xlu1 %v10933_v27, %s10683_s10  ;;  %v11046_v27 = vpack.c.bf16 %v904_v36, %v904_v36 }
 0x397   :  { %v1268_v52 = vsel %vm1174_vm3, %v11046_v27, 0 }
 0x399   :  { %1419 = vrot.lane.b32.xlu1 %v10950_v35, %s10683_s10 }
 0x39d   :  { %1523 = vrot.lane.b32.xlu1 %v10970_v40, %s10683_s10 }
 0x3f5   :  { %v1149_v46 = vpop.xlane.xlu0 %1148 }
 0x3f6   :  { %10294 = vrcp.f32 %v1149_v46 }
 0x3fd   :  { %v1152_v22 = vpop.xlane.xlu1 %1151 }
 0x3fe   :  { %10296 = vrcp.f32 %v1152_v22 }
 0x400   :  { %v10295_v47 = vpop.eup %10294 }
 0x401   :  { %v1163_v29 = vmul.f32 %v10295_v47, %v10287_v3 }
 0x403   :  { %v1167_v49 = vpack.c.bf16 %v1163_v29, %v1163_v29 }
 0x405   :  { %v1155_v51 = vpop.xlane.xlu0 %1154  ;;  %9260 = vmatmul.mubr.msk.bf16.vlgmr.msra.gmra.mrb[16].mxu1 %vm1122_vm2, %v1167_v49 }
 0x406   :  { %10298 = vrcp.f32 %v1155_v51  ;;  %9264 = vmatpush3.bf16.msra.mxu1 %v1222_v37  ;;  %9265 = vmatprep.mubr.msk.bf16.mxu1 %vm10682_vm0, %v10681_v12 }
 0x407   :  { %9269 = vmatprep.subr.bf16.mxu1 %v10681_v12 }
 0x408   :  { %v10297_v35 = vpop.eup %10296 }
 0x409   :  { %v1164_v40 = vmul.f32 %v10297_v35, %v10289_v8  ;;  %v1371_v63 = vpop.permute.xlu0 %1370 }
 0x40a   :  { %v1376_v2 = vsel %vm929_vm1, %v1371_v63, 0 }
 0x40b   :  { %v1168_v53 = vpack.c.bf16 %v1164_v40, %v1164_v40 }
 0x40d   :  { %v1158_v55 = vpop.xlane.xlu1 %1157  ;;  %9266 = vmatmul.mubr.msk.bf16.vlgmr.msra.gmra.mrb[20].mxu1 %vm1122_vm2, %v1168_v53  ;;  %v1527_v5 = vpop.permute.xlu0 %1526 }
 0x40e   :  { %10300 = vrcp.f32 %v1158_v55  ;;  %9270 = vmatpush3.bf16.msra.mxu1 %v1268_v52  ;;  %9271 = vmatprep.mubr.msk.bf16.mxu1 %vm10682_vm0, %v10681_v12  ;;  %v1532_v7 = vsel %vm929_vm1, %v1527_v5, 0 }
 0x40f   :  { %9275 = vmatprep.subr.bf16.mxu1 %v10681_v12 }
 0x410   :  { %v10299_v56 = vpop.eup %10298 }
 0x411   :  { %v1165_v58 = vmul.f32 %v10299_v56, %v10291_v18  ;;  %v1368_v1 = vpop.permute.xlu1 %1367 }
 0x413   :  { %v1169_v59 = vpack.c.bf16 %v1165_v58, %v1165_v58 }
 0x415   :  { %9272 = vmatmul.mubr.msk.bf16.vlgmr.msra.gmra.mrb[24].mxu1 %vm1122_vm2, %v1169_v59  ;;  %v1423_v3 = vpop.permute.xlu1 %1422 }
 0x416   :  { %9276 = vmatpush3.bf16.msra.mxu1 %v1314_v60  ;;  %9277 = vmatprep.mubr.msk.bf16.mxu1 %vm10682_vm0, %v10681_v12  ;;  %v1428_v4 = vsel %vm929_vm1, %v1423_v3, 0 }
 0x417   :  { %9281 = vmatprep.subr.bf16.mxu1 %v10681_v12 }
 0x418   :  { %v10301_v61 = vpop.eup %10300 }
 0x419   :  { %v1166_v62 = vmul.f32 %v10301_v61, %v10293_v28  ;;  %v1420_v6 = vpop.permute.xlu1 %1419 }
 0x41b   :  { %v1170_v0 = vpack.c.bf16 %v1166_v62, %v1166_v62 }
 0x41d   :  { %9278 = vmatmul.mubr.msk.bf16.vlgmr.msra.gmra.mrb[28].mxu1 %vm1122_vm2, %v1170_v0  ;;  %v1524_v8 = vpop.permute.xlu1 %1523 }
 0x41e   :  { %9283 = vmatprep.mubr.msk.bf16.mxu1 %vm10682_vm0, %v10681_v12 }
 0x41f   :  { %9282 = vmatpush3.bf16.xpose.msra.mxu1 %v1376_v2 }
 0x420   :  { %9287 = vmatprep.subr.bf16.mxu1 %v10681_v12 }
 0x426   :  { %9284 = vmatmul.mubr.msk.bf16.vlgmr.msra.gmra.mrb[32].mxu1 %vm929_vm1, %v1368_v1 }
 0x427   :  { %9288 = vmatpush3.bf16.xpose.msra.mxu1 %v1428_v4  ;;  %9289 = vmatprep.mubr.msk.bf16.mxu1 %vm10682_vm0, %v10681_v12 }
 0x428   :  { %9299 = vmatprep.subr.bf16.mxu1 %v10681_v12 }
 0x42e   :  { %9290 = vmatmul.mubr.msk.bf16.vlgmr.msra.gmra.mrb[36].mxu1 %vm929_vm1, %v1420_v6 }
 0x42f   :  { %9300 = vmatpush3.bf16.xpose.msra.mxu1 %v1532_v7  ;;  %9301 = vmatprep.mubr.msk.bf16.mxu1 %vm10682_vm0, %v10681_v12 }
 0x430   :  { %9311 = vmatprep.subr.bf16.mxu1 %v10681_v12 }
 0x436   :  { %9302 = vmatmul.mubr.msk.bf16.vlgmr.msra.gmra.mrb[40].mxu1 %vm929_vm1, %v1524_v8 }
 0x437   :  { %9313 = vmatprep.mubr.msk.bf16.mxu1 %vm10682_vm0, %v10681_v12 }
 0x4d8   :  { %v11081_v9 = vpop.f32.mrb[16].mxu1 }
 0x4d9   :  { %v9261_v10 = vpop.f32.mrb[17].mxu1 }
 0x4da   :  { %v1215_v11 = vpop.f32.mrb[18].mxu1 }
 0x4db   :  { %v9262_v13 = vpop.f32.mrb[19].mxu1 }
 0x4e0   :  { %v11083_v18 = vpop.f32.mrb[20].mxu1 }
 0x4e1   :  { %v1356_v20 = vpack.c.bf16 %v11083_v18, %v11081_v9  ;;  %v9267_v15 = vpop.f32.mrb[21].mxu1 }
 0x4e2   :  { %v1261_v43 = vpop.f32.mrb[22].mxu1 }
 0x4e3   :  { %v9268_v50 = vpop.f32.mrb[23].mxu1 }
 0x4e8   :  { %v11087_v28 = vpop.f32.mrb[24].mxu1 }
 0x4e9   :  { %v9273_v32 = vpop.f32.mrb[25].mxu1 }
 0x4ea   :  { %v1307_v36 = vpop.f32.mrb[26].mxu1 }
 0x4eb   :  { %v9274_v42 = vpop.f32.mrb[27].mxu1 }
 0x4f0   :  { %v11089_v46 = vpop.f32.mrb[28].mxu1 }
 0x4f1   :  { %v1357_v22 = vpack.c.bf16 %v11089_v46, %v11087_v28  ;;  %v9279_v47 = vpop.f32.mrb[29].mxu1 }
 0x4f2   :  { %v1353_v29 = vpop.f32.mrb[30].mxu1 }
 0x4f3   :  { %v9280_v49 = vpop.f32.mrb[31].mxu1 }
 0x4f9   :  { %v1412_v37 = vpop.f32.mrb[32].mxu1 }
 0x4fa   :  { %v9285_v51 = vpop.f32.mrb[33].mxu1  ;;  %v1574_v32 = vmul.f32 0.125, %v1412_v37 }
 0x4fb   :  { %v1415_v35 = vpop.f32.mrb[34].mxu1 }
 0x4fc   :  { %v9286_v40 = vpop.f32.mrb[35].mxu1  ;;  %v11113_v36 = vadd.f32 %v1574_v32, %v10985_v16 }
 0x4fe   :  { %v1582_v42 = vsel %vm1122_vm2, %v11113_v36, -inf }
 0x501   :  { %v1464_v52 = vpop.f32.mrb[36].mxu1 }
 0x502   :  { %v1575_v53 = vmul.f32 0.125, %v1464_v52  ;;  %v9291_v55 = vpop.f32.mrb[37].mxu1 }
 0x503   :  { %v1467_v56 = vpop.f32.mrb[38].mxu1 }
 0x504   :  { %v9292_v58 = vpop.f32.mrb[39].mxu1  ;;  %v1579_v59 = vadd.f32 %v1575_v53, %v10992_v26  ;;  %v11128_v53 = vpack.c.bf16 %v10926_v23, %v10926_v23  ;;  %v11142_v23 = vpack.c.bf16 %v10916_v14, %v10916_v14  ;;  %v11157_v14 = vpack.c.bf16 %v10918_v17, %v10918_v17 }
 0x505   :  { %v11138_v58 = vpack.c.bf16 %v10928_v25, %v10928_v25  ;;  %v11153_v25 = vpack.c.bf16 %v10937_v30, %v10937_v30  ;;  %v11168_v30 = vpack.c.bf16 %v10943_v33, %v10943_v33  ;;  %v11172_v17 = vpack.c.bf16 %v10920_v19, %v10920_v19 }
 0x506   :  { %v1585_v60 = vsel %vm1122_vm2, %v1579_v59, -inf  ;;  %v2050_v56 = vsel %vm929_vm1, %v11128_v53, 0  ;;  %v11183_v33 = vpack.c.bf16 %v11015_v41, %v11015_v41  ;;  %v11187_v19 = vpack.c.bf16 %v10922_v21, %v10922_v21 }
 0x507   :  { %1586 = vmax.xlane.f32.xlu0 %v1585_v60  ;;  %v2142_v60 = vsel %vm929_vm1, %v11153_v25, 0 }
 0x509   :  { %v1568_v61 = vpop.f32.mrb[40].mxu1 }
 0x50a   :  { %v1577_v62 = vmul.f32 0.125, %v1568_v61  ;;  %v9303_v63 = vpop.f32.mrb[41].mxu1  ;;  %v2188_v61 = vsel %vm929_vm1, %v11168_v30, 0 }
 0x50b   :  { %v1571_v0 = vpop.f32.mrb[42].mxu1 }
 0x50c   :  { %v9304_v1 = vpop.f32.mrb[43].mxu1  ;;  %v1581_v2 = vadd.f32 %v1577_v62, %v11006_v54  ;;  %v2290_v62 = vsel %vm1174_vm3, %v11183_v33, 0 }
 0x50e   :  { %v1591_v3 = vsel %vm1122_vm2, %v1581_v2, -inf }
 0x50f   :  { %1592 = vmax.xlane.f32.xlu1 %v1591_v3 }
 0x51d   :  { %1474 = vrot.lane.b32.xlu0 %v10947_v34, %s10683_s10 }
 0x520   :  { %1471 = vrot.lane.b32.xlu1 %v10961_v38, %s10683_s10 }
 0x594   :  { %v1587_v4 = vpop.xlane.xlu0 %1586 }
 0x595   :  { %v1595_v5 = vsub.f32 %v1579_v59, %v1587_v4  ;;  %v2096_v59 = vsel %vm929_vm1, %v11138_v58, 0 }
 0x597   :  { %v1600_v6 = vmul.f32 1.442695, %v1595_v5 }
 0x598   :  { %v1475_v7 = vpop.permute.xlu0 %1474 }
 0x599   :  { %10302 = vpow2.f32 %v1600_v6  ;;  %v1480_v8 = vsel %vm929_vm1, %v1475_v7, 0 }
 0x59a   :  { %9294 = vmatpush3.bf16.xpose.msra.mxu0 %v1480_v8 }
 0x59b   :  { %9305 = vmatprep.subr.bf16.mxu0 %v10681_v12 }
 0x59c   :  { %v1593_v10 = vpop.xlane.xlu1 %1592 }
 0x59d   :  { %v1597_v11 = vsub.f32 %v1581_v2, %v1593_v10 }
 0x59f   :  { %v1604_v13 = vmul.f32 1.442695, %v1597_v11 }
 0x5a0   :  { %v1472_v15 = vpop.permute.xlu1 %1471 }
 0x5a1   :  { %10304 = vpow2.f32 %v1604_v13  ;;  %9296 = vmatmul.mubr.msk.bf16.vlgmr.msra.gmra.mrb[24].mxu0 %vm929_vm1, %v1472_v15 }
 0x5a2   :  { %9307 = vmatprep.mubr.msk.bf16.mxu0 %vm10682_vm0, %v10681_v12 }
 0x5a3   :  { %v10303_v34 = vpop.eup %10302 }
 0x5a4   :  { %v1609_v38 = vsel %vm1122_vm2, %v10303_v34, 0.0 }
 0x5a5   :  { %1610 = vadd.xlane.f32.xlu1 %v1609_v38 }
 0x5ab   :  { %v10305_v43 = vpop.eup %10304 }
 0x5ac   :  { %v1615_v50 = vsel %vm1122_vm2, %v10305_v43, 0.0 }
 0x5ad   :  { %1616 = vadd.xlane.f32.xlu0 %v1615_v50 }
 0x5b6   :  { %1680 = vrot.lane.b32.xlu1 %v11039_v48, %s10683_s10 }
 0x5ba   :  { %1778 = vrot.lane.b32.xlu1 %v11055_v57, %s10683_s10 }
 0x5de   :  { %1583 = vmax.xlane.f32.xlu1 %v1582_v42 }
 0x5ef   :  { %1729 = vrot.lane.b32.xlu1 %v11046_v27, %s10683_s10 }
 0x632   :  { %v1611_v47 = vpop.xlane.xlu1 %1610 }
 0x633   :  { %10306 = vrcp.f32 %v1611_v47 }
 0x636   :  { %v1681_v29 = vpop.permute.xlu1 %1680 }
 0x637   :  { %v1686_v49 = vsel %vm1174_vm3, %v1681_v29, 0 }
 0x638   :  { %9312 = vmatpush3.bf16.msra.mxu1 %v1686_v49 }
 0x639   :  { %9323 = vmatprep.subr.bf16.mxu1 %v10681_v12 }
 0x63a   :  { %v1617_v48 = vpop.xlane.xlu0 %1616  ;;  %v1779_v51 = vpop.permute.xlu1 %1778 }
 0x63b   :  { %10308 = vrcp.f32 %v1617_v48  ;;  %v1784_v40 = vsel %vm1174_vm3, %v1779_v51, 0 }
 0x63d   :  { %v10307_v57 = vpop.eup %10306 }
 0x63e   :  { %v1623_v37 = vmul.f32 %v10307_v57, %v10303_v34 }
 0x640   :  { %v1627_v35 = vpack.c.bf16 %v1623_v37, %v1623_v37 }
 0x642   :  { %9314 = vmatmul.mubr.msk.bf16.vlgmr.msra.gmra.mrb[44].mxu1 %vm1122_vm2, %v1627_v35 }
 0x643   :  { %9324 = vmatpush3.bf16.msra.mxu1 %v1784_v40  ;;  %9325 = vmatprep.mubr.msk.bf16.mxu1 %vm10682_vm0, %v10681_v12 }
 0x644   :  { %9329 = vmatprep.subr.bf16.mxu1 %v10681_v12 }
 0x645   :  { %v10309_v27 = vpop.eup %10308 }
 0x646   :  { %v1625_v52 = vmul.f32 %v10309_v27, %v10305_v43 }
 0x648   :  { %v1629_v55 = vpack.c.bf16 %v1625_v52, %v1625_v52 }
 0x64a   :  { %9326 = vmatmul.mubr.msk.bf16.vlgmr.msra.gmra.mrb[48].mxu1 %vm1122_vm2, %v1629_v55 }
 0x64b   :  { %9331 = vmatprep.mubr.msk.bf16.mxu1 %vm10682_vm0, %v10681_v12 }
 0x64c   :  { %9330 = vmatpush3.bf16.xpose.msra.mxu1 %v2050_v56 }
 0x64d   :  { %9335 = vmatprep.subr.bf16.mxu1 %v10681_v12 }
 0x653   :  { %9332 = vmatmul.mubr.msk.bf16.vlgmr.msra.gmra.mrb[52].mxu1 %vm929_vm1, %v11142_v23 }
 0x654   :  { %9336 = vmatpush3.bf16.xpose.msra.mxu1 %v2096_v59  ;;  %9337 = vmatprep.mubr.msk.bf16.mxu1 %vm10682_vm0, %v10681_v12 }
 0x655   :  { %9341 = vmatprep.subr.bf16.mxu1 %v10681_v12 }
 0x65b   :  { %9338 = vmatmul.mubr.msk.bf16.vlgmr.msra.gmra.mrb[56].mxu1 %vm929_vm1, %v11157_v14 }
 0x65c   :  { %9342 = vmatpush3.bf16.xpose.msra.mxu1 %v2142_v60  ;;  %9343 = vmatprep.mubr.msk.bf16.mxu1 %vm10682_vm0, %v10681_v12 }
 0x65d   :  { %9347 = vmatprep.subr.bf16.mxu1 %v10681_v12 }
 0x663   :  { %9344 = vmatmul.mubr.msk.bf16.vlgmr.msra.gmra.mrb[60].mxu1 %vm929_vm1, %v11172_v17 }
 0x664   :  { %9348 = vmatpush3.bf16.xpose.msra.mxu1 %v2188_v61  ;;  %9349 = vmatprep.mubr.msk.bf16.mxu1 %vm10682_vm0, %v10681_v12 }
 0x665   :  { %9353 = vmatprep.subr.bf16.mxu1 %v10681_v12 }
 0x66b   :  { %9350 = vmatmul.mubr.msk.bf16.vlgmr.msra.gmra.mrb[64].mxu1 %vm929_vm1, %v11187_v19  ;;  %v1584_v34 = vpop.xlane.xlu1 %1583 }
 0x66c   :  { %9354 = vmatpush3.bf16.msra.mxu1 %v2290_v62  ;;  %9355 = vmatprep.mubr.msk.bf16.mxu1 %vm10682_vm0, %v10681_v12  ;;  %v1594_v47 = vsub.f32 %v11113_v36, %v1584_v34 }
 0x66d   :  { %9365 = vmatprep.subr.bf16.mxu1 %v10681_v12 }
 0x66e   :  { %v1598_v48 = vmul.f32 1.442695, %v1594_v47 }
 0x66f   :  { %v1730_v47 = vpop.permute.xlu1 %1729 }
 0x670   :  { %10310 = vpow2.f32 %v1598_v48  ;;  %v1735_v48 = vsel %vm1174_vm3, %v1730_v47, 0 }
 0x674   :  { %v1516_v63 = vpop.f32.mrb[24].mxu0 }
 0x675   :  { %v1576_v0 = vmul.f32 0.125, %v1516_v63  ;;  %v9297_v41 = vpop.f32.mrb[25].mxu0 }
 0x676   :  { %v1519_v1 = vpop.f32.mrb[26].mxu0 }
 0x677   :  { %v9298_v2 = vpop.f32.mrb[27].mxu0  ;;  %v1580_v21 = vadd.f32 %v1576_v0, %v10999_v45 }
 0x679   :  { %v1588_v3 = vsel %vm1122_vm2, %v1580_v21, -inf }
 0x67a   :  { %1589 = vmax.xlane.f32.xlu0 %v1588_v3  ;;  %v10311_v61 = vpop.eup %10310 }
 0x67b   :  { %v1606_v0 = vsel %vm1122_vm2, %v10311_v61, 0.0 }
 0x707   :  { %v1590_v29 = vpop.xlane.xlu0 %1589 }
 0x708   :  { %v1596_v57 = vsub.f32 %v1580_v21, %v1590_v29 }
 0x70a   :  { %v1602_v27 = vmul.f32 1.442695, %v1596_v57 }
 0x70c   :  { %10312 = vpow2.f32 %v1602_v27  ;;  %v9860_v27 = vld [vmem:[#allocation7 + $0x60] ss:$8 sps:$4 sm:$0xff]  }
 0x715   :  { %v11198_v4 = vpop.f32.mrb[44].mxu1 }
 0x716   :  { %v9315_v5 = vpop.f32.mrb[45].mxu1  ;;  %v10313_v41 = vpop.eup %10312 }
 0x717   :  { %v1725_v6 = vpop.f32.mrb[46].mxu1  ;;  %v1612_v21 = vsel %vm1122_vm2, %v10313_v41, 0.0 }
 0x718   :  { %v9316_v7 = vpop.f32.mrb[47].mxu1 }
 0x71d   :  { %v11200_v8 = vpop.f32.mrb[48].mxu1 }
 0x71e   :  { %v9327_v10 = vpop.f32.mrb[49].mxu1 }
 0x71f   :  { %v1823_v11 = vpop.f32.mrb[50].mxu1 }
 0x720   :  { %v9328_v13 = vpop.f32.mrb[51].mxu1 }
 0x726   :  { %v2086_v15 = vpop.f32.mrb[52].mxu1 }
 0x727   :  { %v2230_v38 = vmul.f32 0.125, %v2086_v15  ;;  %v9333_v43 = vpop.f32.mrb[53].mxu1 }
 0x728   :  { %v2089_v50 = vpop.f32.mrb[54].mxu1 }
 0x729   :  { %v9334_v32 = vpop.f32.mrb[55].mxu1  ;;  %v2234_v42 = vadd.f32 %v2230_v38, %v10985_v16 }
 0x72b   :  { %v2238_v49 = vsel %vm1122_vm2, %v2234_v42, -inf }
 0x72c   :  { %2239 = vmax.xlane.f32.xlu0 %v2238_v49 }
 0x72e   :  { %v11205_v37 = vpop.f32.mrb[56].mxu1 }
 0x72f   :  { %v9339_v51 = vpop.f32.mrb[57].mxu1 }
 0x730   :  { %v2135_v35 = vpop.f32.mrb[58].mxu1 }
 0x731   :  { %v9340_v40 = vpop.f32.mrb[59].mxu1 }
 0x732   :  { %v9862_v40 = vld [vmem:[#allocation7 + $0x64] ss:$8 sps:$4 sm:$0xff]  }
 0x736   :  { %v2178_v52 = vpop.f32.mrb[60].mxu1 }
 0x737   :  { %v2232_v55 = vmul.f32 0.125, %v2178_v52  ;;  %v9345_v56 = vpop.f32.mrb[61].mxu1  ;;  %v9865_v52 = vld [vmem:[#allocation7 + $0x74] ss:$8 sps:$4 sm:$0xff]  }
 0x738   :  { %v2181_v16 = vpop.f32.mrb[62].mxu1 }
 0x739   :  { %v9346_v59 = vpop.f32.mrb[63].mxu1  ;;  %v2236_v36 = vadd.f32 %v2232_v55, %v10999_v45  ;;  %v10684_v55 = vmov 0  }
 0x73a   :  { %v11258_v59 = vpack.c.bf16 %v11023_v39, %v11023_v39 }
 0x73b   :  { %v2244_v60 = vsel %vm1122_vm2, %v2236_v36, -inf }
 0x73c   :  { %2245 = vmax.xlane.f32.xlu0 %v2244_v60 }
 0x73e   :  { %v2224_v62 = vpop.f32.mrb[64].mxu1 }
 0x73f   :  { %v9351_v63 = vpop.f32.mrb[65].mxu1  ;;  %v2233_v35 = vmul.f32 0.125, %v2224_v62 }
 0x740   :  { %v2227_v1 = vpop.f32.mrb[66].mxu1  ;;  %1607 = vadd.xlane.f32.xlu0 %v1606_v0 }
 0x741   :  { %v9352_v2 = vpop.f32.mrb[67].mxu1 }
 0x744   :  { %1613 = vadd.xlane.f32.xlu0 %v1612_v21 }
 0x75a   :  { %1631 = vrot.lane.b32.xlu0 %v11013_v24, %s10683_s10 }
 0x7b9   :  { %v2240_v3 = vpop.xlane.xlu0 %2239 }
 0x7ba   :  { %v2250_v45 = vsub.f32 %v2234_v42, %v2240_v3 }
 0x7bc   :  { %v2254_v5 = vmul.f32 1.442695, %v2250_v45 }
 0x7be   :  { %10314 = vpow2.f32 %v2254_v5 }
 0x7c8   :  { %v11213_v6 = vpop.eup %10314 }
 0x7c9   :  { %v2246_v7 = vpop.xlane.xlu0 %2245  ;;  %v2262_v10 = vsel %vm1122_vm2, %v11213_v6, 0.0 }
 0x7ca   :  { %v2252_v11 = vsub.f32 %v2236_v36, %v2246_v7  ;;  %2263 = vadd.xlane.f32.xlu1 %v2262_v10 }
 0x7cc   :  { %v2258_v13 = vmul.f32 1.442695, %v2252_v11 }
 0x7cd   :  { %v1608_v15 = vpop.xlane.xlu0 %1607 }
 0x7ce   :  { %10316 = vpow2.f32 %v2258_v13 }
 0x7cf   :  { %10318 = vrcp.f32 %v1608_v15 }
 0x7d1   :  { %v1614_v34 = vpop.xlane.xlu0 %1613 }
 0x7d2   :  { %10320 = vrcp.f32 %v1614_v34 }
 0x7d5   :  { %v1632_v38 = vpop.permute.xlu0 %1631 }
 0x7d6   :  { %v1637_v24 = vsel %vm1174_vm3, %v1632_v38, 0 }
 0x7d7   :  { %9306 = vmatpush3.bf16.msra.mxu0 %v1637_v24 }
 0x7d8   :  { %v11218_v43 = vpop.eup %10316  ;;  %9317 = vmatprep.subr.bf16.mxu0 %v10681_v12 }
 0x7d9   :  { %v10319_v50 = vpop.eup %10318  ;;  %v2268_v32 = vsel %vm1122_vm2, %v11218_v43, 0.0 }
 0x7da   :  { %2269 = vadd.xlane.f32.xlu0 %v2268_v32  ;;  %v1622_v42 = vmul.f32 %v10319_v50, %v10311_v61  ;;  %v2382_v61 = vsel %vm1174_vm3, %v11258_v59, 0 }
 0x7db   :  { %2588 = vrot.lane.b32.xlu1 %v11142_v23, %s10683_s10 }
 0x7dc   :  { %v1626_v29 = vpack.c.bf16 %v1622_v42, %v1622_v42  ;;  %v10321_v49 = vpop.eup %10320 }
 0x7dd   :  { %v1624_v57 = vmul.f32 %v10321_v49, %v10313_v41 }
 0x7de   :  { %9308 = vmatmul.mubr.msk.bf16.vlgmr.msra.gmra.mrb[28].mxu0 %vm1122_vm2, %v1626_v29  ;;  %v9866_v29 = vld [vmem:[#allocation7] ss:$8 sps:$4 sm:$0xff]  }
 0x7df   :  { %9318 = vmatpush3.bf16.msra.mxu0 %v1735_v48  ;;  %2643 = vrot.lane.b32.xlu1 %v11138_v58, %s10683_s10  ;;  %v1628_v51 = vpack.c.bf16 %v1624_v57, %v1624_v57  ;;  %v2231_v58 = vmul.f32 0.125, %v11205_v37  ;;  %v9859_v37 = vld [vmem:[#allocation7 + $0x54] ss:$8 sps:$4 sm:$0xff]  }
 0x7e0   :  { %9319 = vmatprep.mubr.msk.bf16.mxu0 %vm10682_vm0, %v10681_v12  ;;  %v9871_v57 = vld [vmem:[#allocation7 + $0x14] ss:$8 sps:$4 sm:$0xff]  }
 0x7e1   :  { %v11244_v23 = vadd.f32 %v2231_v58, %v10992_v26  ;;  %v9857_v26 = vld [vmem:[#allocation7 + $0x50] ss:$8 sps:$4 sm:$0xff]  }
 0x7e3   :  { %2640 = vrot.lane.b32.xlu1 %v11157_v14, %s10683_s10  ;;  %v2241_v14 = vsel %vm1122_vm2, %v11244_v23, -inf }
 0x7e6   :  { %9320 = vmatmul.mubr.msk.bf16.vlgmr.msra.gmra.mrb[32].mxu0 %vm1122_vm2, %v1628_v51 }
 0x7e7   :  { %1914 = vmatprep.mubr.bf16.mxu0 %v10684_v55 }
 0x7f0   :  { %2591 = vrot.lane.b32.xlu0 %v11128_v53, %s10683_s10  ;;  %v11249_v53 = vadd.f32 %v2233_v35, %v11006_v54  ;;  %v9863_v54 = vld [vmem:[#allocation7 + $0x70] ss:$8 sps:$4 sm:$0xff]  }
 0x7f4   :  { %2695 = vrot.lane.b32.xlu0 %v11153_v25, %s10683_s10  ;;  %v9854_v25 = vld [vmem:[#allocation7 + $0x40] ss:$8 sps:$4 sm:$0xff]  }
 0x7f8   :  { %2692 = vrot.lane.b32.xlu0 %v11172_v17, %s10683_s10  ;;  %v9856_v17 = vld [vmem:[#allocation7 + $0x44] ss:$8 sps:$4 sm:$0xff]  }
 0x7f9   :  { %1882 = vmatprep.subr.bf16.mxu0 %v9856_v17  ;;  %v9872_v17 = vld [vmem:[#allocation7 + $0x20] ss:$8 sps:$4 sm:$0xff]  }
 0x7fa   :  { %1883 = vmatpush1.bf16.msra.mxu0 %v9854_v25 }
 0x7fb   :  { %1884 = vmatprep.subr.bf16.mxu0 %v9859_v37 }
 0x7fc   :  { %2747 = vrot.lane.b32.xlu0 %v11168_v30, %s10683_s10  ;;  %v2247_v30 = vsel %vm1122_vm2, %v11249_v53, -inf }
 0x7fe   :  { %1885 = vmatpush1.bf16.msra.mxu0 %v9857_v26  ;;  %v9877_v26 = vld [vmem:[#allocation7 + $0x34] ss:$8 sps:$4 sm:$0xff]  }
 0x7ff   :  { %1886 = vmatprep.subr.bf16.mxu0 %v9862_v40 }
 0x802   :  { %1887 = vmatpush1.bf16.msra.mxu0 %v9860_v27  ;;  %v9875_v27 = vld [vmem:[#allocation7 + $0x30] ss:$8 sps:$4 sm:$0xff]  }
 0x803   :  { %1888 = vmatprep.subr.bf16.mxu0 %v9865_v52 }
 0x806   :  { %1889 = vmatpush1.bf16.msra.mxu0 %v9863_v54  ;;  %v11303_v54 = vpack.c.bf16 %v11020_v31, %v11020_v31 }
 0x807   :  { %2242 = vmax.xlane.f32.xlu1 %v2241_v14  ;;  %v9874_v14 = vld [vmem:[#allocation7 + $0x24] ss:$8 sps:$4 sm:$0xff]  }
 0x818   :  { %2744 = vrot.lane.b32.xlu1 %v11187_v19, %s10683_s10  ;;  %v9868_v19 = vld [vmem:[#allocation7 + $0x4] ss:$8 sps:$4 sm:$0xff]  }
 0x819   :  { %1981 = vmatprep.subr.bf16.mxu0 %v9868_v19 }
 0x81b   :  { %2248 = vmax.xlane.f32.xlu0 %v2247_v30 }
 0x857   :  { %v2264_v56 = vpop.xlane.xlu1 %2263 }
 0x858   :  { %10322 = vrcp.f32 %v2264_v56  ;;  %v11324_v56 = vpack.c.bf16 %v11027_v44, %v11027_v44 }
 0x85a   :  { %v2428_v28 = vsel %vm1174_vm3, %v11324_v56, 0 }
 0x85b   :  { %v2589_v1 = vpop.permute.xlu1 %2588 }
 0x85f   :  { %v2644_v21 = vpop.permute.xlu1 %2643 }
 0x860   :  { %v2649_v3 = vsel %vm929_vm1, %v2644_v21, 0 }
 0x862   :  { %v10323_v16 = vpop.eup %10322 }
 0x863   :  { %v2278_v36 = vmul.f32 %v10323_v16, %v11213_v6  ;;  %v2641_v5 = vpop.permute.xlu1 %2640 }
 0x865   :  { %v2282_v60 = vpack.c.bf16 %v2278_v36, %v2278_v36 }
 0x867   :  { %9356 = vmatmul.mubr.msk.bf16.vlgmr.msra.gmra.mrb[68].mxu1 %vm1122_vm2, %v2282_v60  ;;  %v2270_v62 = vpop.xlane.xlu0 %2269 }
 0x868   :  { %9366 = vmatpush3.bf16.msra.mxu1 %v2382_v61  ;;  %10324 = vrcp.f32 %v2270_v62  ;;  %9367 = vmatprep.mubr.msk.bf16.mxu1 %vm10682_vm0, %v10681_v12 }
 0x869   :  { %9377 = vmatprep.subr.bf16.mxu1 %v10681_v12 }
 0x86b   :  { %v2592_v0 = vpop.permute.xlu0 %2591 }
 0x86c   :  { %v2597_v2 = vsel %vm929_vm1, %v2592_v0, 0 }
 0x86f   :  { %v2696_v45 = vpop.permute.xlu0 %2695 }
 0x870   :  { %v2701_v7 = vsel %vm929_vm1, %v2696_v45, 0 }
 0x872   :  { %v10325_v63 = vpop.eup %10324 }
 0x873   :  { %v2280_v39 = vmul.f32 %v10325_v63, %v11218_v43  ;;  %v2693_v6 = vpop.permute.xlu0 %2692 }
 0x875   :  { %v2284_v41 = vpack.c.bf16 %v2280_v39, %v2280_v39 }
 0x877   :  { %9368 = vmatmul.mubr.msk.bf16.vlgmr.msra.gmra.mrb[72].mxu1 %vm1122_vm2, %v2284_v41  ;;  %v2748_v10 = vpop.permute.xlu0 %2747 }
 0x878   :  { %9378 = vmatpush3.bf16.xpose.msra.mxu1 %v2597_v2  ;;  %9379 = vmatprep.mubr.msk.bf16.mxu1 %vm10682_vm0, %v10681_v12  ;;  %v2753_v11 = vsel %vm929_vm1, %v2748_v10, 0 }
 0x879   :  { %9383 = vmatprep.subr.bf16.mxu1 %v10681_v12 }
 0x87f   :  { %9380 = vmatmul.mubr.msk.bf16.vlgmr.msra.gmra.mrb[76].mxu1 %vm929_vm1, %v2589_v1 }
 0x880   :  { %9384 = vmatpush3.bf16.xpose.msra.mxu1 %v2649_v3  ;;  %9385 = vmatprep.mubr.msk.bf16.mxu1 %vm10682_vm0, %v10681_v12  ;;  %v10438_v3 = vld [vmem:[%s12249_s0] sm:$0xff] }
 0x881   :  { %9389 = vmatprep.subr.bf16.mxu1 %v10681_v12 }
 0x887   :  { %9386 = vmatmul.mubr.msk.bf16.vlgmr.msra.gmra.mrb[80].mxu1 %vm929_vm1, %v2641_v5 }
 0x888   :  { %9390 = vmatpush3.bf16.xpose.msra.mxu1 %v2701_v7  ;;  %9391 = vmatprep.mubr.msk.bf16.mxu1 %vm10682_vm0, %v10681_v12 }
 0x889   :  { %9395 = vmatprep.subr.bf16.mxu1 %v10681_v12 }
 0x88f   :  { %9392 = vmatmul.mubr.msk.bf16.vlgmr.msra.gmra.mrb[84].mxu1 %vm929_vm1, %v2693_v6 }
 0x890   :  { %9396 = vmatpush3.bf16.xpose.msra.mxu1 %v2753_v11  ;;  %9397 = vmatprep.mubr.msk.bf16.mxu1 %vm10682_vm0, %v10681_v12 }
 0x891   :  { %9407 = vmatprep.subr.bf16.mxu1 %v10681_v12 }
 0x894   :  { %v2243_v13 = vpop.xlane.xlu1 %2242 }
 0x895   :  { %v2251_v15 = vsub.f32 %v11244_v23, %v2243_v13  ;;  %v9869_v23 = vld [vmem:[#allocation7 + $0x10] ss:$8 sps:$4 sm:$0xff]  }
 0x897   :  { %v2256_v34 = vmul.f32 1.442695, %v2251_v15  ;;  %v10439_v15 = vld [vmem:[%s12249_s0 + $0x8] sm:$0xff] }
 0x898   :  { %v2745_v38 = vpop.permute.xlu1 %2744 }
 0x899   :  { %10326 = vpow2.f32 %v2256_v34  ;;  %9398 = vmatmul.mubr.msk.bf16.vlgmr.msra.gmra.mrb[88].mxu1 %vm929_vm1, %v2745_v38 }
 0x89a   :  { %9409 = vmatprep.mubr.msk.bf16.mxu1 %vm10682_vm0, %v10681_v12 }
 0x8a3   :  { %v10327_v24 = vpop.eup %10326 }
 0x8a4   :  { %v2265_v43 = vsel %vm1122_vm2, %v10327_v24, 0.0 }
 0x8a5   :  { %2266 = vadd.xlane.f32.xlu0 %v2265_v43 }
 0x8a8   :  { %v2249_v50 = vpop.xlane.xlu0 %2248 }
 0x8a9   :  { %v2253_v32 = vsub.f32 %v11249_v53, %v2249_v50 }
 0x8ab   :  { %v2260_v42 = vmul.f32 1.442695, %v2253_v32 }
 0x8ad   :  { %10328 = vpow2.f32 %v2260_v42 }
 0x8b1   :  { %v1673_v47 = vpop.f32.mrb[28].mxu0 }
 0x8b2   :  { %v1826_v49 = vpack.c.bf16 %v11198_v4, %v1673_v47  ;;  %v9309_v48 = vpop.f32.mrb[29].mxu0  ;;  %v10440_v47 = vld [vmem:[%s12249_s0 + $0x10] sm:$0xff] }
 0x8b3   :  { %v1676_v51 = vpop.f32.mrb[30].mxu0 }
 0x8b4   :  { %v9310_v58 = vpop.f32.mrb[31].mxu0  ;;  %8633 = vmatmul.mubr.msk.bf16.vlgmr.msra.gmra.mrb[36].mxu0 %vm929_vm1, %v1826_v49 }
 0x8b5   :  { %1982 = vmatpush1.bf16.msra.mxu0 %v9866_v29  ;;  %1924 = vmatprep.mubr.bf16.mxu0 %v10684_v55 }
 0x8b6   :  { %1983 = vmatprep.subr.bf16.mxu0 %v9871_v57 }
 0x8b7   :  { %v10329_v35 = vpop.eup %10328 }
 0x8b8   :  { %v2271_v53 = vsel %vm1122_vm2, %v10329_v35, 0.0 }
 0x8b9   :  { %1984 = vmatpush1.bf16.msra.mxu0 %v9869_v23  ;;  %v1771_v25 = vpop.f32.mrb[32].mxu0  ;;  %2272 = vadd.xlane.f32.xlu0 %v2271_v53 }
 0x8ba   :  { %v1827_v4 = vpack.c.bf16 %v11200_v8, %v1771_v25  ;;  %v9321_v30 = vpop.f32.mrb[33].mxu0  ;;  %1985 = vmatprep.subr.bf16.mxu0 %v9874_v14  ;;  %v2336_v8 = vsel %vm1174_vm3, %v11303_v54, 0  ;;  %v10441_v14 = vld [vmem:[%s12249_s0 + $0x18] sm:$0xff]  ;;  %v9878_v25 = vld [vmem:[#allocation7 + $0x80] ss:$8 sps:$4 sm:$0xff]  }
 0x8bb   :  { %v1774_v37 = vpop.f32.mrb[34].mxu0  ;;  %v9881_v30 = vld [vmem:[#allocation7 + $0x90] ss:$8 sps:$4 sm:$0xff]  }
 0x8bc   :  { %v9322_v40 = vpop.f32.mrb[35].mxu0  ;;  %8634 = vmatmul.mubr.msk.bf16.gmra.mrb[40].mxu0 %vm929_vm1, %v1827_v4  ;;  %v9883_v4 = vld [vmem:[#allocation7 + $0x94] ss:$8 sps:$4 sm:$0xff]   ;;  %v9886_v37 = vld [vmem:[#allocation7 + $0xa4] ss:$8 sps:$4 sm:$0xff]  }
 0x8bd   :  { %1986 = vmatpush1.bf16.msra.mxu0 %v9872_v17  ;;  %2013 = vmatprep.mubr.bf16.mxu0 %v10684_v55  ;;  %v9880_v17 = vld [vmem:[#allocation7 + $0x84] ss:$8 sps:$4 sm:$0xff]   ;;  %v9887_v40 = vld [vmem:[#allocation7 + $0xb0] ss:$8 sps:$4 sm:$0xff]  }
 0x8be   :  { %1987 = vmatprep.subr.bf16.mxu0 %v9877_v26  ;;  %v9884_v26 = vld [vmem:[#allocation7 + $0xa0] ss:$8 sps:$4 sm:$0xff]  }
 0x8c1   :  { %1988 = vmatpush1.bf16.msra.mxu0 %v9875_v27  ;;  %v9889_v27 = vld [vmem:[#allocation7 + $0xb4] ss:$8 sps:$4 sm:$0xff]  }
 0x8c2   :  { %9359 = vmatprep.subr.bf16.mxu0 %v10681_v12 }
 0x8c4   :  { %8643 = vmatmul.mubr.msk.bf16.vlgmr.msra.gmra.mrb[36].mxu0 %vm929_vm1, %v1356_v20 }
 0x8c5   :  { %9360 = vmatpush3.bf16.msra.mxu0 %v2336_v8  ;;  %2023 = vmatprep.mubr.bf16.mxu0 %v10684_v55 }
 0x8c6   :  { %9371 = vmatprep.subr.bf16.mxu0 %v10681_v12 }
 0x8cc   :  { %8644 = vmatmul.mubr.msk.bf16.gmra.mrb[40].mxu0 %vm929_vm1, %v1357_v22 }
 0x8cd   :  { %9361 = vmatprep.mubr.msk.bf16.mxu0 %vm10682_vm0, %v10681_v12 }
 0x932   :  { %v2267_v31 = vpop.xlane.xlu0 %2266 }
 0x933   :  { %10330 = vrcp.f32 %v2267_v31 }
 0x93a   :  { %v11320_v52 = vpop.f32.mrb[68].mxu1 }
 0x93b   :  { %v9357_v9 = vpop.f32.mrb[69].mxu1 }
 0x93c   :  { %v2329_v18 = vpop.f32.mrb[70].mxu1 }
 0x93d   :  { %v10331_v20 = vpop.eup %10330  ;;  %v9358_v19 = vpop.f32.mrb[71].mxu1 }
 0x93e   :  { %v2279_v16 = vmul.f32 %v10331_v20, %v10327_v24 }
 0x940   :  { %v2283_v36 = vpack.c.bf16 %v2279_v16, %v2279_v16 }
 0x942   :  { %9362 = vmatmul.mubr.msk.bf16.vlgmr.msra.gmra.mrb[44].mxu0 %vm1122_vm2, %v2283_v36 }
 0x943   :  { %9372 = vmatpush3.bf16.msra.mxu0 %v2428_v28  ;;  %9373 = vmatprep.mubr.msk.bf16.mxu0 %vm10682_vm0, %v10681_v12 }
 0x944   :  { %2526 = vmatprep.subr.bf16.mxu0 %v9880_v17 }
 0x946   :  { %v2273_v46 = vpop.xlane.xlu0 %2272 }
 0x947   :  { %10332 = vrcp.f32 %v2273_v46 }
 0x94a   :  { %v11331_v22 = vpop.f32.mrb[72].mxu1 }
 0x94b   :  { %v9369_v60 = vpop.f32.mrb[73].mxu1 }
 0x94c   :  { %v2421_v61 = vpop.f32.mrb[74].mxu1 }
 0x94d   :  { %v9370_v62 = vpop.f32.mrb[75].mxu1 }
 0x951   :  { %v10333_v44 = vpop.eup %10332 }
 0x952   :  { %v2633_v63 = vpop.f32.mrb[76].mxu1  ;;  %v2281_v39 = vmul.f32 %v10333_v44, %v10329_v35 }
 0x953   :  { %v2795_v0 = vmul.f32 0.125, %v2633_v63  ;;  %v9381_v41 = vpop.f32.mrb[77].mxu1 }
 0x954   :  { %v2636_v1 = vpop.f32.mrb[78].mxu1  ;;  %v2285_v2 = vpack.c.bf16 %v2281_v39, %v2281_v39 }
 0x955   :  { %v9382_v21 = vpop.f32.mrb[79].mxu1  ;;  %v2799_v45 = vadd.f32 %v10438_v3, %v2795_v0 }
 0x956   :  { %9374 = vmatmul.mubr.msk.bf16.vlgmr.msra.gmra.mrb[48].mxu0 %vm1122_vm2, %v2285_v2 }
 0x957   :  { %v2803_v5 = vsel %vm1122_vm2, %v2799_v45, -inf  ;;  %2558 = vmatprep.mubr.bf16.mxu0 %v10684_v55  ;;  %2527 = vmatpush1.bf16.msra.mxu0 %v9878_v25  ;;  %v9890_v25 = vld [vmem:[#allocation7 + $0xc0] ss:$8 sps:$4 sm:$0xff]  }
 0x958   :  { %2804 = vmax.xlane.f32.xlu0 %v2803_v5  ;;  %2528 = vmatprep.subr.bf16.mxu0 %v9883_v4  ;;  %v9895_v4 = vld [vmem:[#allocation7 + $0xd4] ss:$8 sps:$4 sm:$0xff]  }
 0x95a   :  { %v2685_v6 = vpop.f32.mrb[80].mxu1 }
 0x95b   :  { %v2796_v7 = vmul.f32 0.125, %v2685_v6  ;;  %v9387_v10 = vpop.f32.mrb[81].mxu1  ;;  %2529 = vmatpush1.bf16.msra.mxu0 %v9881_v30  ;;  %v9893_v30 = vld [vmem:[#allocation7 + $0xd0] ss:$8 sps:$4 sm:$0xff]  }
 0x95c   :  { %v2688_v11 = vpop.f32.mrb[82].mxu1  ;;  %2530 = vmatprep.subr.bf16.mxu0 %v9886_v37  ;;  %v9898_v37 = vld [vmem:[#allocation7 + $0xe4] ss:$8 sps:$4 sm:$0xff]  }
 0x95d   :  { %v9388_v13 = vpop.f32.mrb[83].mxu1  ;;  %v2800_v34 = vadd.f32 %v10439_v15, %v2796_v7 }
 0x95f   :  { %v2806_v38 = vsel %vm1122_vm2, %v2800_v34, -inf  ;;  %2531 = vmatpush1.bf16.msra.mxu0 %v9884_v26  ;;  %v9896_v26 = vld [vmem:[#allocation7 + $0xe0] ss:$8 sps:$4 sm:$0xff]  }
 0x960   :  { %2807 = vmax.xlane.f32.xlu0 %v2806_v38  ;;  %2532 = vmatprep.subr.bf16.mxu0 %v9889_v27  ;;  %v9899_v27 = vld [vmem:[#allocation7 + $0xf0] ss:$8 sps:$4 sm:$0xff]  }
 0x962   :  { %v2737_v24 = vpop.f32.mrb[84].mxu1 }
 0x963   :  { %v2797_v43 = vmul.f32 0.125, %v2737_v24  ;;  %v9393_v50 = vpop.f32.mrb[85].mxu1  ;;  %2533 = vmatpush1.bf16.msra.mxu0 %v9887_v40  ;;  %v9901_v40 = vld [vmem:[#allocation7 + $0xf4] ss:$8 sps:$4 sm:$0xff]  }
 0x964   :  { %v2740_v32 = vpop.f32.mrb[86].mxu1  ;;  %9401 = vmatprep.subr.bf16.mxu0 %v10681_v12 }
 0x965   :  { %v9394_v42 = vpop.f32.mrb[87].mxu1  ;;  %v11346_v29 = vadd.f32 %v10440_v47, %v2797_v43 }
 0x967   :  { %v2809_v49 = vsel %vm1122_vm2, %v11346_v29, -inf }
 0x968   :  { %2810 = vmax.xlane.f32.xlu1 %v2809_v49 }
 0x96c   :  { %v2789_v48 = vpop.f32.mrb[88].mxu1 }
 0x96d   :  { %v2798_v57 = vmul.f32 0.125, %v2789_v48  ;;  %v9399_v51 = vpop.f32.mrb[89].mxu1 }
 0x96e   :  { %v2792_v58 = vpop.f32.mrb[90].mxu1 }
 0x96f   :  { %v9400_v23 = vpop.f32.mrb[91].mxu1  ;;  %v2802_v35 = vadd.f32 %v10441_v14, %v2798_v57  ;;  %v9892_v58 = vld [vmem:[#allocation7 + $0xc4] ss:$8 sps:$4 sm:$0xff]  }
 0x971   :  { %v2812_v53 = vsel %vm1122_vm2, %v2802_v35, -inf }
 0x972   :  { %2813 = vmax.xlane.f32.xlu0 %v2812_v53 }
 0x979   :  { %2901 = vrot.lane.b32.xlu1 %v11303_v54, %s10683_s10 }
 0x9e5   :  { %v2805_v8 = vpop.xlane.xlu0 %2804 }
 0x9e6   :  { %v2815_v54 = vsub.f32 %v2799_v45, %v2805_v8 }
 0x9e8   :  { %v2819_v31 = vmul.f32 1.442695, %v2815_v54 }
 0x9ea   :  { %10334 = vpow2.f32 %v2819_v31 }
 0x9ed   :  { %v2808_v9 = vpop.xlane.xlu0 %2807 }
 0x9ee   :  { %v2816_v18 = vsub.f32 %v2800_v34, %v2808_v9 }
 0x9f0   :  { %v2821_v20 = vmul.f32 1.442695, %v2816_v18 }
 0x9f2   :  { %10336 = vpow2.f32 %v2821_v20 }
 0x9f4   :  { %v10335_v19 = vpop.eup %10334 }
 0x9f5   :  { %v2811_v16 = vpop.xlane.xlu1 %2810  ;;  %v2827_v36 = vsel %vm1122_vm2, %v10335_v19, 0.0 }
 0x9f6   :  { %2828 = vadd.xlane.f32.xlu0 %v2827_v36  ;;  %v2817_v45 = vsub.f32 %v11346_v29, %v2811_v16 }
 0x9f8   :  { %v2823_v5 = vmul.f32 1.442695, %v2817_v45 }
 0x9f9   :  { %v2902_v28 = vpop.permute.xlu1 %2901 }
 0x9fa   :  { %v2907_v46 = vsel %vm1174_vm3, %v2902_v28, 0 }
 0x9fb   :  { %9408 = vmatpush3.bf16.msra.mxu1 %v2907_v46 }
 0x9fc   :  { %v10337_v60 = vpop.eup %10336  ;;  %9419 = vmatprep.subr.bf16.mxu1 %v10681_v12 }
 0x9fd   :  { %v2830_v61 = vsel %vm1122_vm2, %v10337_v60, 0.0 }
 0x9fe   :  { %2831 = vadd.xlane.f32.xlu0 %v2830_v61 }
 0x9ff   :  { %v2814_v62 = vpop.xlane.xlu0 %2813 }
 0xa00   :  { %v2818_v44 = vsub.f32 %v2802_v35, %v2814_v62 }
 0xa02   :  { %v2825_v63 = vmul.f32 1.442695, %v2818_v44 }
 0xa04   :  { %10338 = vpow2.f32 %v2825_v63 }
 0xa05   :  { %10340 = vpow2.f32 %v2823_v5 }
 0xa0e   :  { %v10339_v39 = vpop.eup %10338 }
 0xa0f   :  { %v2836_v0 = vsel %vm1122_vm2, %v10339_v39, 0.0  ;;  %v10341_v11 = vpop.eup %10340 }
 0xa10   :  { %2837 = vadd.xlane.f32.xlu1 %v2836_v0  ;;  %v2833_v13 = vsel %vm1122_vm2, %v10341_v11, 0.0 }
 0xa14   :  { %2852 = vrot.lane.b32.xlu0 %v11183_v33, %s10683_s10 }
 0xa15   :  { %v2372_v41 = vpop.f32.mrb[44].mxu0 }
 0xa16   :  { %v2470_v1 = vpack.c.bf16 %v2372_v41, %v11320_v52  ;;  %v9363_v2 = vpop.f32.mrb[45].mxu0 }
 0xa17   :  { %v2375_v21 = vpop.f32.mrb[46].mxu0 }
 0xa18   :  { %v9364_v3 = vpop.f32.mrb[47].mxu0  ;;  %8661 = vmatmul.mubr.msk.bf16.vlgmr.msra.gmra.mrb[36].mxu0 %vm929_vm1, %v2470_v1 }
 0xa19   :  { %2568 = vmatprep.mubr.bf16.mxu0 %v10684_v55 }
 0xa21   :  { %2999 = vrot.lane.b32.xlu1 %v11324_v56, %s10683_s10 }
 0xa29   :  { %v2464_v6 = vpop.f32.mrb[48].mxu0 }
 0xa2a   :  { %v2471_v33 = vpack.c.bf16 %v2464_v6, %v11331_v22  ;;  %v9375_v7 = vpop.f32.mrb[49].mxu0 }
 0xa2b   :  { %v2467_v10 = vpop.f32.mrb[50].mxu0 }
 0xa2c   :  { %v9376_v52 = vpop.f32.mrb[51].mxu0  ;;  %8662 = vmatmul.mubr.msk.bf16.gmra.mrb[40].mxu0 %vm929_vm1, %v2471_v33 }
 0xa2d   :  { %9403 = vmatprep.mubr.msk.bf16.mxu0 %vm10682_vm0, %v10681_v12 }
 0xa33   :  { %2834 = vadd.xlane.f32.xlu0 %v2833_v13  ;;  %v9904_v13 = vld [vmem:[#allocation8 + $0x4] ss:$8 sps:$4 sm:$0xff]  }
 0xa49   :  { %2950 = vrot.lane.b32.xlu0 %v11258_v59, %s10683_s10 }
 0xa83   :  { %v2829_v56 = vpop.xlane.xlu0 %2828 }
 0xa84   :  { %10342 = vrcp.f32 %v2829_v56  ;;  %v9907_v56 = vld [vmem:[#allocation8 + $0x14] ss:$8 sps:$4 sm:$0xff]  }
 0xa8b   :  { %v2832_v15 = vpop.xlane.xlu0 %2831 }
 0xa8c   :  { %10344 = vrcp.f32 %v2832_v15  ;;  %v9905_v15 = vld [vmem:[#allocation8 + $0x10] ss:$8 sps:$4 sm:$0xff]  }
 0xa8e   :  { %v10343_v22 = vpop.eup %10342 }
 0xa8f   :  { %v2843_v34 = vmul.f32 %v10343_v22, %v10335_v19  ;;  %v2853_v38 = vpop.permute.xlu0 %2852  ;;  %v9910_v22 = vld [vmem:[#allocation8 + $0x24] ss:$8 sps:$4 sm:$0xff]  }
 0xa90   :  { %v2858_v24 = vsel %vm1174_vm3, %v2853_v38, 0  ;;  %v9913_v38 = vld [vmem:[#allocation8 + $0x34] ss:$8 sps:$4 sm:$0xff]  }
 0xa91   :  { %v2847_v43 = vpack.c.bf16 %v2843_v34, %v2843_v34  ;;  %9402 = vmatpush3.bf16.msra.mxu0 %v2858_v24  ;;  %v9908_v34 = vld [vmem:[#allocation8 + $0x20] ss:$8 sps:$4 sm:$0xff]   ;;  %v9911_v24 = vld [vmem:[#allocation8 + $0x30] ss:$8 sps:$4 sm:$0xff]  }
 0xa92   :  { %9413 = vmatprep.subr.bf16.mxu0 %v10681_v12 }
 0xa94   :  { %9404 = vmatmul.mubr.msk.bf16.vlgmr.msra.gmra.mrb[52].mxu0 %vm1122_vm2, %v2847_v43  ;;  %v9916_v43 = vld [vmem:[#allocation8 + $0x44] ss:$8 sps:$4 sm:$0xff]  }
 0xa95   :  { %9415 = vmatprep.mubr.msk.bf16.mxu0 %vm10682_vm0, %v10681_v12 }
 0xa96   :  { %v10345_v50 = vpop.eup %10344 }
 0xa97   :  { %v2844_v59 = vmul.f32 %v10345_v50, %v10337_v60  ;;  %v9914_v50 = vld [vmem:[#allocation8 + $0x40] ss:$8 sps:$4 sm:$0xff]  }
 0xa99   :  { %v2848_v32 = vpack.c.bf16 %v2844_v59, %v2844_v59  ;;  %v9919_v59 = vld [vmem:[#allocation8 + $0x54] ss:$8 sps:$4 sm:$0xff]  }
 0xa9b   :  { %9410 = vmatmul.mubr.msk.bf16.vlgmr.msra.gmra.mrb[92].mxu1 %vm1122_vm2, %v2848_v32  ;;  %v9917_v32 = vld [vmem:[#allocation8 + $0x50] ss:$8 sps:$4 sm:$0xff]  }
 0xa9c   :  { %9421 = vmatprep.mubr.msk.bf16.mxu1 %vm10682_vm0, %v10681_v12 }
 0xa9d   :  { %v2838_v42 = vpop.xlane.xlu1 %2837 }
 0xa9e   :  { %10346 = vrcp.f32 %v2838_v42  ;;  %v9922_v42 = vld [vmem:[#allocation8 + $0x64] ss:$8 sps:$4 sm:$0xff]  }
 0xaa1   :  { %v3000_v47 = vpop.permute.xlu1 %2999 }
 0xaa2   :  { %v3005_v29 = vsel %vm1174_vm3, %v3000_v47, 0  ;;  %v9920_v47 = vld [vmem:[#allocation8 + $0x60] ss:$8 sps:$4 sm:$0xff]  }
 0xaa3   :  { %9420 = vmatpush3.bf16.msra.mxu1 %v3005_v29  ;;  %v9925_v29 = vld [vmem:[#allocation8 + $0x74] ss:$8 sps:$4 sm:$0xff]  }
 0xaa8   :  { %v10347_v49 = vpop.eup %10346 }
 0xaa9   :  { %v2846_v48 = vmul.f32 %v10347_v49, %v10339_v39  ;;  %v9923_v49 = vld [vmem:[#allocation8 + $0x70] ss:$8 sps:$4 sm:$0xff]  }
 0xaab   :  { %v2850_v57 = vpack.c.bf16 %v2846_v48, %v2846_v48  ;;  %v9928_v48 = vld [vmem:[#allocation8 + $0x84] ss:$8 sps:$4 sm:$0xff]  }
 0xaad   :  { %9422 = vmatmul.mubr.msk.bf16.vlgmr.msra.gmra.mrb[96].mxu1 %vm1122_vm2, %v2850_v57  ;;  %v9926_v57 = vld [vmem:[#allocation8 + $0x80] ss:$8 sps:$4 sm:$0xff]  }
 0xac0   :  { %v2835_v51 = vpop.xlane.xlu0 %2834 }
 0xac1   :  { %10348 = vrcp.f32 %v2835_v51 }
 0xac4   :  { %v2951_v23 = vpop.permute.xlu0 %2950 }
 0xac5   :  { %v2956_v14 = vsel %vm1174_vm3, %v2951_v23, 0 }
 0xac6   :  { %9414 = vmatpush3.bf16.msra.mxu0 %v2956_v14 }
 0xac7   :  { %3103 = vmatprep.subr.bf16.mxu0 %v9892_v58 }
 0xacb   :  { %v10349_v35 = vpop.eup %10348 }
 0xacc   :  { %v2845_v53 = vmul.f32 %v10349_v35, %v10341_v11  ;;  %v9902_v11 = vld [vmem:[#allocation8] ss:$8 sps:$4 sm:$0xff]  }
 0xace   :  { %v2849_v17 = vpack.c.bf16 %v2845_v53, %v2845_v53 }
 0xad0   :  { %9416 = vmatmul.mubr.msk.bf16.vlgmr.msra.gmra.mrb[56].mxu0 %vm1122_vm2, %v2849_v17 }
 0xad1   :  { %3104 = vmatpush1.bf16.msra.mxu0 %v9890_v25  ;;  %3135 = vmatprep.mubr.bf16.mxu0 %v10684_v55 }
 0xad2   :  { %3105 = vmatprep.subr.bf16.mxu0 %v9895_v4 }
 0xad5   :  { %3106 = vmatpush1.bf16.msra.mxu0 %v9893_v30 }
 0xad6   :  { %3107 = vmatprep.subr.bf16.mxu0 %v9898_v37 }
 0xad9   :  { %3108 = vmatpush1.bf16.msra.mxu0 %v9896_v26 }
 0xada   :  { %3109 = vmatprep.subr.bf16.mxu0 %v9901_v40 }
 0xadd   :  { %3110 = vmatpush1.bf16.msra.mxu0 %v9899_v27 }
 0xade   :  { %3465 = vmatprep.subr.bf16.mxu0 %v9904_v13  ;;  %v165_v13 = vld [vmem:[#allocation2 + $0x8] sm:$0xff] }
 0xb67   :  { %v2894_v8 = vpop.f32.mrb[52].mxu0 }
 0xb68   :  { %v9405_v54 = vpop.f32.mrb[53].mxu0 }
 0xb69   :  { %v2897_v31 = vpop.f32.mrb[54].mxu0  ;;  %v9929_v54 = vld [vmem:[#allocation8 + $0x90] ss:$8 sps:$4 sm:$0xff]  }
 0xb6a   :  { %v9406_v9 = vpop.f32.mrb[55].mxu0  ;;  %v9934_v31 = vld [vmem:[#allocation8 + $0xa4] ss:$8 sps:$4 sm:$0xff]  }
 0xb6b   :  { %v9932_v9 = vld [vmem:[#allocation8 + $0xa0] ss:$8 sps:$4 sm:$0xff]  }
 0xb6e   :  { %v2943_v18 = vpop.f32.mrb[92].mxu1 }
 0xb6f   :  { %v3047_v20 = vpack.c.bf16 %v2943_v18, %v2894_v8  ;;  %v9411_v19 = vpop.f32.mrb[93].mxu1  ;;  %v9931_v8 = vld [vmem:[#allocation8 + $0x94] ss:$8 sps:$4 sm:$0xff]  }
 0xb70   :  { %v2946_v16 = vpop.f32.mrb[94].mxu1  ;;  %v9937_v18 = vld [vmem:[#allocation8 + $0xb4] ss:$8 sps:$4 sm:$0xff]   ;;  %v9940_v19 = vld [vmem:[#allocation8 + $0xc4] ss:$8 sps:$4 sm:$0xff]  }
 0xb71   :  { %v9412_v36 = vpop.f32.mrb[95].mxu1  ;;  %8679 = vmatmul.mubr.msk.bf16.vlgmr.msra.gmra.mrb[36].mxu0 %vm929_vm1, %v3047_v20  ;;  %v9935_v20 = vld [vmem:[#allocation8 + $0xb0] ss:$8 sps:$4 sm:$0xff]   ;;  %v9938_v16 = vld [vmem:[#allocation8 + $0xc0] ss:$8 sps:$4 sm:$0xff]  }
 0xb72   :  { %3145 = vmatprep.mubr.bf16.mxu0 %v10684_v55  ;;  %3466 = vmatpush1.bf16.msra.mxu0 %v9902_v11  ;;  %v9943_v36 = vld [vmem:[#allocation8 + $0xd4] ss:$8 sps:$4 sm:$0xff]  }
 0xb73   :  { %3467 = vmatprep.subr.bf16.mxu0 %v9907_v56  ;;  %v167_v56 = vld [vmem:[#allocation2 + $0x18] sm:$0xff] }
 0xb76   :  { %3468 = vmatpush1.bf16.msra.mxu0 %v9905_v15  ;;  %v11441_v15 = vpack.c.bf16 %v167_v56, %v165_v13 }
 0xb77   :  { %3469 = vmatprep.subr.bf16.mxu0 %v9910_v22 }
 0xb78   :  { %3987 = vmatprep.mubr.bf16.mxu1 %v11441_v15 }
 0xb7a   :  { %3470 = vmatpush1.bf16.msra.mxu0 %v9908_v34 }
 0xb7b   :  { %3471 = vmatprep.subr.bf16.mxu0 %v9913_v38 }
 0xb7e   :  { %3472 = vmatpush1.bf16.msra.mxu0 %v9911_v24 }
 0xb7f   :  { %3473 = vmatprep.subr.bf16.mxu0 %v9916_v43 }
 0xb80   :  { %v3041_v28 = vpop.f32.mrb[96].mxu1 }
 0xb81   :  { %v9423_v46 = vpop.f32.mrb[97].mxu1 }
 0xb82   :  { %v3044_v60 = vpop.f32.mrb[98].mxu1  ;;  %3474 = vmatpush1.bf16.msra.mxu0 %v9914_v50  ;;  %v9944_v46 = vld [vmem:[#allocation8 + $0xe0] ss:$8 sps:$4 sm:$0xff]  }
 0xb83   :  { %v9424_v61 = vpop.f32.mrb[99].mxu1  ;;  %3475 = vmatprep.subr.bf16.mxu0 %v9919_v59  ;;  %v9946_v60 = vld [vmem:[#allocation8 + $0xe4] ss:$8 sps:$4 sm:$0xff]  }
 0xb84   :  { %v9949_v61 = vld [vmem:[#allocation8 + $0xf4] ss:$8 sps:$4 sm:$0xff]  }
 0xb86   :  { %3476 = vmatpush1.bf16.msra.mxu0 %v9917_v32  ;;  %v176_v32 = vld [vmem:[%s12260_s11] sm:$0x3f] }
 0xb87   :  { %3477 = vmatprep.subr.bf16.mxu0 %v9922_v42  ;;  %v177_v42 = vld [vmem:[%s12260_s11 + $0x8] sm:$0x3f] }
 0xb8a   :  { %3478 = vmatpush1.bf16.msra.mxu0 %v9920_v47 }
 0xb8b   :  { %3479 = vmatprep.subr.bf16.mxu0 %v9925_v29 }
 0xb8e   :  { %3480 = vmatpush1.bf16.msra.mxu0 %v9923_v49 }
 0xb8f   :  { %3481 = vmatprep.subr.bf16.mxu0 %v9928_v48 }
 0xb92   :  { %3482 = vmatpush1.bf16.msra.mxu0 %v9926_v57 }
 0xb93   :  { %3483 = vmatprep.subr.bf16.mxu0 %v9931_v8 }
 0xb96   :  { %3484 = vmatpush1.bf16.msra.mxu0 %v9929_v54 }
 0xb97   :  { %3485 = vmatprep.subr.bf16.mxu0 %v9934_v31  ;;  %v10442_v31 = vld [vmem:[%s12251_s2 + $0x8] sm:$0xff] }
 0xb9a   :  { %3486 = vmatpush1.bf16.msra.mxu0 %v9932_v9 }
 0xb9b   :  { %3487 = vmatprep.subr.bf16.mxu0 %v9937_v18  ;;  %v10444_v18 = vld [vmem:[%s12251_s2] sm:$0xff] }
 0xb9e   :  { %3488 = vmatpush1.bf16.msra.mxu0 %v9935_v20 }
 0xb9f   :  { %3489 = vmatprep.subr.bf16.mxu0 %v9940_v19  ;;  %v10445_v19 = vld [vmem:[%s12251_s2 + $0x10] sm:$0xff] }
 0xba2   :  { %3490 = vmatpush1.bf16.msra.mxu0 %v9938_v16 }
 0xba3   :  { %v2992_v62 = vpop.f32.mrb[56].mxu0  ;;  %3491 = vmatprep.subr.bf16.mxu0 %v9943_v36 }
 0xba4   :  { %v3048_v44 = vpack.c.bf16 %v3041_v28, %v2992_v62  ;;  %v9417_v63 = vpop.f32.mrb[57].mxu0  ;;  %v9941_v28 = vld [vmem:[#allocation8 + $0xd0] ss:$8 sps:$4 sm:$0xff]  }
 0xba5   :  { %v2995_v39 = vpop.f32.mrb[58].mxu0  ;;  %v9947_v62 = vld [vmem:[#allocation8 + $0xf0] ss:$8 sps:$4 sm:$0xff]  }
 0xba6   :  { %v9418_v0 = vpop.f32.mrb[59].mxu0  ;;  %8680 = vmatmul.mubr.msk.bf16.gmra.mrb[40].mxu0 %vm929_vm1, %v3048_v44  ;;  %v9952_v44 = vld [vmem:[#allocation10 + $0x4] ss:$16 sps:$4 sm:$0xff]  }
 0xba7   :  { %3492 = vmatpush1.bf16.msra.mxu0 %v9941_v28  ;;  %v9950_v28 = vld [vmem:[#allocation10] ss:$16 sps:$4 sm:$0xff]  }
 0xba8   :  { %3493 = vmatprep.subr.bf16.mxu0 %v9946_v60  ;;  %v9955_v60 = vld [vmem:[#allocation10 + $0x24] ss:$16 sps:$4 sm:$0xff]  }
 0xbab   :  { %3494 = vmatpush1.bf16.msra.mxu0 %v9944_v46 }
 0xbac   :  { %3495 = vmatprep.subr.bf16.mxu0 %v9949_v61  ;;  %v9953_v61 = vld [vmem:[#allocation10 + $0x20] ss:$16 sps:$4 sm:$0xff]  }
 0xbaf   :  { %3496 = vmatpush1.bf16.msra.mxu0 %v9947_v62  ;;  %v9958_v62 = vld [vmem:[#allocation10 + $0x44] ss:$16 sps:$4 sm:$0xff]  }
 0xbb0   :  { %3902 = vmatprep.subr.bf16.mxu0 %v9952_v44  ;;  %v9956_v44 = vld [vmem:[#allocation10 + $0x40] ss:$16 sps:$4 sm:$0xff]  }
 0xc44   :  { %v3137_v41 = vpop.f32.mrb[36].mxu0 }
 0xc45   :  { %v3139_v1 = vpop.f32.mrb[37].mxu0 }
 0xc46   :  { %v3141_v2 = vpop.f32.mrb[38].mxu0  ;;  %v3164_v21 = vadd.f32 %v3139_v1, %v3137_v41 }
 0xc47   :  { %v3143_v3 = vpop.f32.mrb[39].mxu0 }
 0xc48   :  { %3165 = vadd.xlane.f32.xlu0 %v3164_v21  ;;  %v3167_v45 = vadd.f32 %v3143_v3, %v3141_v2 }
 0xc4a   :  { %3168 = vadd.xlane.f32.xlu1 %v3167_v45 }
 0xc79   :  { %v11393_v5 = vpop.f32.mrb[40].mxu0 }
 0xc7a   :  { %v11395_v6 = vpop.f32.mrb[41].mxu0 }
 0xc7b   :  { %v11397_v33 = vpop.f32.mrb[42].mxu0  ;;  %v3170_v7 = vadd.f32 %v11395_v6, %v11393_v5 }
 0xc7c   :  { %v11401_v10 = vpop.f32.mrb[43].mxu0 }
 0xc7d   :  { %3171 = vadd.xlane.f32.xlu0 %v3170_v7  ;;  %v3173_v52 = vadd.f32 %v11401_v10, %v11397_v33 }
 0xc81   :  { %3174 = vadd.xlane.f32.xlu0 %v3173_v52 }
 0xcd5   :  { %v3166_v51 = vpop.xlane.xlu0 %3165 }
 0xcd6   :  { %v3177_v58 = vmul.f32 0.00390625, %v3166_v51 }
 0xcd7   :  { %v3169_v23 = vpop.xlane.xlu1 %3168 }
 0xcd8   :  { %v11405_v14 = vsub.f32 %v3137_v41, %v3177_v58  ;;  %v11407_v35 = vsub.f32 %v3139_v1, %v3177_v58  ;;  %v3178_v53 = vmul.f32 0.00390625, %v3169_v23 }
 0xcda   :  { %v11409_v25 = vsub.f32 %v3141_v2, %v3178_v53  ;;  %v11411_v17 = vsub.f32 %v3143_v3, %v3178_v53  ;;  %v3189_v4 = vmul.f32 %v11405_v14, %v11405_v14  ;;  %v3190_v30 = vmul.f32 %v11407_v35, %v11407_v35 }
 0xcdc   :  { %v3197_v26 = vadd.f32 %v3190_v30, %v3189_v4  ;;  %v3191_v37 = vmul.f32 %v11409_v25, %v11409_v25  ;;  %v3192_v40 = vmul.f32 %v11411_v17, %v11411_v17 }
 0xcde   :  { %3198 = vadd.xlane.f32.xlu0 %v3197_v26  ;;  %v3200_v27 = vadd.f32 %v3192_v40, %v3191_v37 }
 0xce2   :  { %3201 = vadd.xlane.f32.xlu0 %v3200_v27 }
 0xd0a   :  { %v3172_v63 = vpop.xlane.xlu0 %3171 }
 0xd0b   :  { %v3179_v39 = vmul.f32 0.00390625, %v3172_v63  ;;  %v9961_v63 = vld [vmem:[#allocation10 + $0x64] ss:$16 sps:$4 sm:$0xff]  }
 0xd0d   :  { %v11422_v0 = vsub.f32 %v11393_v5, %v3179_v39  ;;  %v11425_v41 = vsub.f32 %v11395_v6, %v3179_v39  ;;  %v9959_v39 = vld [vmem:[#allocation10 + $0x60] ss:$16 sps:$4 sm:$0xff]  }
 0xd0e   :  { %v3175_v1 = vpop.xlane.xlu0 %3174 }
 0xd0f   :  { %v3180_v2 = vmul.f32 0.00390625, %v3175_v1  ;;  %v3193_v21 = vmul.f32 %v11422_v0, %v11422_v0  ;;  %v3194_v3 = vmul.f32 %v11425_v41, %v11425_v41  ;;  %v9964_v1 = vld [vmem:[#allocation10 + $0x84] ss:$16 sps:$4 sm:$0xff]  }
 0xd11   :  { %v11432_v45 = vsub.f32 %v11397_v33, %v3180_v2  ;;  %v11435_v7 = vsub.f32 %v11401_v10, %v3180_v2  ;;  %v3203_v52 = vadd.f32 %v3194_v3, %v3193_v21  ;;  %v3229_v10 = vlaneseq  ;;  %v9962_v2 = vld [vmem:[#allocation10 + $0x80] ss:$16 sps:$4 sm:$0xff]   ;;  %v9967_v21 = vld [vmem:[#allocation10 + $0xa4] ss:$16 sps:$4 sm:$0xff]  }
 0xd12   :  { %v9965_v3 = vld [vmem:[#allocation10 + $0xa0] ss:$16 sps:$4 sm:$0xff]  }
 0xd13   :  { %3204 = vadd.xlane.f32.xlu0 %v3203_v52  ;;  %v3195_v5 = vmul.f32 %v11432_v45, %v11432_v45  ;;  %v3196_v6 = vmul.f32 %v11435_v7, %v11435_v7  ;;  %v11444_v43 = vshrl.u32 %v3229_v10, 7  ;;  %v9970_v52 = vld [vmem:[#allocation10 + $0xc4] ss:$16 sps:$4 sm:$0xff]  }
 0xd14   :  { %v9976_v10 = vld [vmem:[#allocation10 + $0x104] ss:$16 sps:$4 sm:$0xff]  }
 0xd15   :  { %v3206_v11 = vadd.f32 %v3196_v6, %v3195_v5  ;;  %v3231_v59 = vsub.s32 0, %v11444_v43  ;;  %v3247_v49 = vsub.s32 1, %v11444_v43  ;;  %v9968_v5 = vld [vmem:[#allocation10 + $0xc0] ss:$16 sps:$4 sm:$0xff]  }
 0xd17   :  { %3207 = vadd.xlane.f32.xlu0 %v3206_v11  ;;  %v11453_v47 = vrot.slane %v176_v32, %v3231_v59  ;;  %v11455_v29 = vrot.slane %v177_v42, %v3231_v59  ;;  %v11462_v53 = vrot.slane %v176_v32, %v3247_v49  ;;  %v11464_v4 = vrot.slane %v177_v42, %v3247_v49  ;;  %v9973_v11 = vld [vmem:[#allocation10 + $0xe4] ss:$16 sps:$4 sm:$0xff]   ;;  %v9977_v59 = vld [vmem:[#allocation10 + $0x120] ss:$16 sps:$4 sm:$0xff]  }
 0xd18   :  { %v9982_v32 = vld [vmem:[#allocation10 + $0x144] ss:$16 sps:$4 sm:$0xff]   ;;  %v9980_v49 = vld [vmem:[#allocation10 + $0x140] ss:$16 sps:$4 sm:$0xff]  }
 0xd6b   :  { %v3199_v33 = vpop.xlane.xlu0 %3198 }
 0xd6c   :  { %v3209_v22 = vmul.f32 0.00390625, %v3199_v33  ;;  %v9971_v33 = vld [vmem:[#allocation10 + $0xe0] ss:$16 sps:$4 sm:$0xff]  }
 0xd6e   :  { %v3213_v34 = vadd.f32 1e-05, %v3209_v22 }
 0xd6f   :  { %v3202_v38 = vpop.xlane.xlu0 %3201 }
 0xd70   :  { %10350 = vrsqrt.f32 %v3213_v34  ;;  %v3210_v24 = vmul.f32 0.00390625, %v3202_v38 }
 0xd72   :  { %v3214_v50 = vadd.f32 1e-05, %v3210_v24  ;;  %v9974_v24 = vld [vmem:[#allocation10 + $0x100] ss:$16 sps:$4 sm:$0xff]  }
 0xd74   :  { %10352 = vrsqrt.f32 %v3214_v50  ;;  %v9979_v50 = vld [vmem:[#allocation10 + $0x124] ss:$16 sps:$4 sm:$0xff]  }
 0xd7a   :  { %v10351_v48 = vpop.eup %10350 }
 0xd7b   :  { %v3221_v57 = vmul.f32 %v10351_v48, %v11405_v14  ;;  %v3222_v51 = vmul.f32 %v10351_v48, %v11407_v35  ;;  %v9985_v48 = vld [vmem:[#allocation10 + $0x164] ss:$16 sps:$4 sm:$0xff]  }
 0xd7d   :  { %v3237_v58 = vmul.f32 %v11453_v47, %v3221_v57  ;;  %v3238_v23 = vmul.f32 %v11455_v29, %v3222_v51 }
 0xd7e   :  { %v10353_v30 = vpop.eup %10352 }
 0xd7f   :  { %v3223_v26 = vmul.f32 %v10353_v30, %v11409_v25  ;;  %v3224_v37 = vmul.f32 %v10353_v30, %v11411_v17  ;;  %v3254_v14 = vadd.f32 %v11464_v4, %v3238_v23  ;;  %v3253_v35 = vadd.f32 %v11462_v53, %v3237_v58  ;;  %v10443_v25 = vld [vmem:[%s12251_s2 + $0x18] sm:$0xff] }
 0xd81   :  { %v3239_v40 = vmul.f32 %v11453_v47, %v3223_v26  ;;  %v3240_v27 = vmul.f32 %v11455_v29, %v3224_v37  ;;  %v11477_v9 = vadd.f32 %v10442_v31, %v3254_v14  ;;  %v11487_v20 = vadd.f32 %v10444_v18, %v3253_v35  ;;  %v9983_v26 = vld [vmem:[#allocation10 + $0x160] ss:$16 sps:$4 sm:$0xff]   ;;  %v9988_v37 = vld [vmem:[#allocation10 + $0x184] ss:$16 sps:$4 sm:$0xff]  }
 0xd82   :  { %v10448_v18 = vld [vmem:[%s12251_s2 + $0x20] sm:$0xff] }
 0xd83   :  { %v3256_v8 = vadd.f32 %v11464_v4, %v3240_v27  ;;  %v3255_v54 = vadd.f32 %v11462_v53, %v3239_v40 }
 0xd85   :  { %v11482_v17 = vadd.f32 %v10443_v25, %v3256_v8  ;;  %v11492_v16 = vadd.f32 %v10445_v19, %v3255_v54  ;;  %v9986_v8 = vld [vmem:[#allocation10 + $0x180] ss:$16 sps:$4 sm:$0xff]   ;;  %v9991_v54 = vld [vmem:[#allocation10 + $0x1a4] ss:$16 sps:$4 sm:$0xff]  }
 0xd87   :  { %v3270_v36 = vpack.c.bf16 %v11482_v17, %v11477_v9  ;;  %v3269_v46 = vpack.c.bf16 %v11492_v16, %v11487_v20 }
 0xd89   :  { %3497 = vmatprep.mubr.bf16.mxu0 %v3270_v36  ;;  %v9989_v36 = vld [vmem:[#allocation10 + $0x1a0] ss:$16 sps:$4 sm:$0xff]  }
 0xd8a   :  { %3498 = vmatmul.mubr.bf16.vlgmr.msra.gmra.mrb[60].mxu0 %v3269_v46 }
 0xd8b   :  { %3903 = vmatpush1.bf16.msra.mxu0 %v9950_v28 }
 0xd8c   :  { %3904 = vmatprep.subr.bf16.mxu0 %v9955_v60  ;;  %v9994_v60 = vld [vmem:[#allocation10 + $0x1c4] ss:$16 sps:$4 sm:$0xff]  }
 0xd8f   :  { %3905 = vmatpush1.bf16.msra.mxu0 %v9953_v61  ;;  %v9992_v61 = vld [vmem:[#allocation10 + $0x1c0] ss:$16 sps:$4 sm:$0xff]  }
 0xd90   :  { %3906 = vmatprep.subr.bf16.mxu0 %v9958_v62  ;;  %v9997_v62 = vld [vmem:[#allocation10 + $0x1e4] ss:$16 sps:$4 sm:$0xff]  }
 0xd93   :  { %3907 = vmatpush1.bf16.msra.mxu0 %v9956_v44  ;;  %v9995_v44 = vld [vmem:[#allocation10 + $0x1e0] ss:$16 sps:$4 sm:$0xff]  }
 0xd94   :  { %3908 = vmatprep.subr.bf16.mxu0 %v9961_v63  ;;  %v164_v63 = vld [vmem:[#allocation2] sm:$0xff] }
 0xd97   :  { %3909 = vmatpush1.bf16.msra.mxu0 %v9959_v39  ;;  %v166_v39 = vld [vmem:[#allocation2 + $0x10] sm:$0xff] }
 0xd98   :  { %3910 = vmatprep.subr.bf16.mxu0 %v9964_v1  ;;  %v169_v1 = vld [vmem:[#allocation2 + $0x28] sm:$0xff] }
 0xd9b   :  { %3911 = vmatpush1.bf16.msra.mxu0 %v9962_v2  ;;  %v171_v2 = vld [vmem:[#allocation2 + $0x38] sm:$0xff] }
 0xd9c   :  { %3912 = vmatprep.subr.bf16.mxu0 %v9967_v21  ;;  %v11535_v21 = vpack.c.bf16 %v166_v39, %v164_v63  ;;  %v10024_v63 = vld [vmem:[#allocation10 + $0x10c] ss:$16 sps:$4 sm:$0xff]   ;;  %v10022_v39 = vld [vmem:[#allocation10 + $0x108] ss:$16 sps:$4 sm:$0xff]  }
 0xd9f   :  { %3913 = vmatpush1.bf16.msra.mxu0 %v9965_v3  ;;  %v11537_v3 = vpack.c.bf16 %v171_v2, %v169_v1  ;;  %v10027_v1 = vld [vmem:[#allocation10 + $0x12c] ss:$16 sps:$4 sm:$0xff]   ;;  %v10025_v2 = vld [vmem:[#allocation10 + $0x128] ss:$16 sps:$4 sm:$0xff]  }
 0xda0   :  { %v3205_v6 = vpop.xlane.xlu0 %3204  ;;  %3914 = vmatprep.subr.bf16.mxu0 %v9970_v52  ;;  %v168_v52 = vld [vmem:[#allocation2 + $0x20] sm:$0xff] }
 0xda1   :  { %v3211_v13 = vmul.f32 0.00390625, %v3205_v6 }
 0xda3   :  { %v3215_v56 = vadd.f32 1e-05, %v3211_v13  ;;  %3915 = vmatpush1.bf16.msra.mxu0 %v9968_v5 }
 0xda4   :  { %v3208_v22 = vpop.xlane.xlu0 %3207  ;;  %3916 = vmatprep.subr.bf16.mxu0 %v9973_v11 }
 0xda5   :  { %10354 = vrsqrt.f32 %v3215_v56  ;;  %v3212_v34 = vmul.f32 0.00390625, %v3208_v22 }
 0xda7   :  { %v3216_v38 = vadd.f32 1e-05, %v3212_v34  ;;  %3917 = vmatpush1.bf16.msra.mxu0 %v9971_v33 }
 0xda8   :  { %3918 = vmatprep.subr.bf16.mxu0 %v9976_v10 }
 0xda9   :  { %10356 = vrsqrt.f32 %v3216_v38 }
 0xdab   :  { %3919 = vmatpush1.bf16.msra.mxu0 %v9974_v24 }
 0xdac   :  { %3920 = vmatprep.subr.bf16.mxu0 %v9979_v50 }
 0xdaf   :  { %v10355_v42 = vpop.eup %10354  ;;  %3921 = vmatpush1.bf16.msra.mxu0 %v9977_v59 }
 0xdb0   :  { %3922 = vmatprep.subr.bf16.mxu0 %v9982_v32  ;;  %v3226_v57 = vmul.f32 %v10355_v42, %v11425_v41  ;;  %v3225_v51 = vmul.f32 %v10355_v42, %v11422_v0 }
 0xdb2   :  { %v3242_v58 = vmul.f32 %v11455_v29, %v3226_v57  ;;  %v3241_v23 = vmul.f32 %v11453_v47, %v3225_v51 }
 0xdb3   :  { %v10357_v30 = vpop.eup %10356  ;;  %3923 = vmatpush1.bf16.msra.mxu0 %v9980_v49 }
 0xdb4   :  { %3924 = vmatprep.subr.bf16.mxu0 %v9985_v48  ;;  %v3228_v40 = vmul.f32 %v10357_v30, %v11435_v7  ;;  %v3227_v27 = vmul.f32 %v10357_v30, %v11432_v45  ;;  %v3258_v35 = vadd.f32 %v11464_v4, %v3242_v58  ;;  %v3257_v0 = vadd.f32 %v11462_v53, %v3241_v23  ;;  %v10446_v45 = vld [vmem:[%s12251_s2 + $0x28] sm:$0xff] }
 0xdb6   :  { %v3244_v14 = vmul.f32 %v11455_v29, %v3228_v40  ;;  %v3243_v41 = vmul.f32 %v11453_v47, %v3227_v27  ;;  %v11513_v7 = vadd.f32 %v10446_v45, %v3258_v35  ;;  %v10447_v47 = vld [vmem:[%s12251_s2 + $0x38] sm:$0xff]  ;;  %v11523_v19 = vadd.f32 %v10448_v18, %v3257_v0 }
 0xdb7   :  { %3925 = vmatpush1.bf16.msra.mxu0 %v9983_v26  ;;  %v9998_v0 = vld [vmem:[#allocation10 + $0x8] ss:$16 sps:$4 sm:$0xff]   ;;  %v10006_v45 = vld [vmem:[#allocation10 + $0x4c] ss:$16 sps:$4 sm:$0xff]  }
 0xdb8   :  { %3926 = vmatprep.subr.bf16.mxu0 %v9988_v37  ;;  %v3260_v31 = vadd.f32 %v11464_v4, %v3244_v14  ;;  %v3259_v25 = vadd.f32 %v11462_v53, %v3243_v41  ;;  %v10449_v53 = vld [vmem:[%s12251_s2 + $0x30] sm:$0xff]  ;;  %v10009_v18 = vld [vmem:[#allocation10 + $0x6c] ss:$16 sps:$4 sm:$0xff]  }
 0xdba   :  { %v11518_v29 = vadd.f32 %v10447_v47, %v3260_v31  ;;  %v11528_v4 = vadd.f32 %v10449_v53, %v3259_v25  ;;  %v10003_v31 = vld [vmem:[#allocation10 + $0x2c] ss:$16 sps:$4 sm:$0xff]   ;;  %v10004_v25 = vld [vmem:[#allocation10 + $0x48] ss:$16 sps:$4 sm:$0xff]  }
 0xdbb   :  { %3927 = vmatpush1.bf16.msra.mxu0 %v9986_v8  ;;  %v10000_v8 = vld [vmem:[#allocation10 + $0xc] ss:$16 sps:$4 sm:$0xff]   ;;  %v10007_v47 = vld [vmem:[#allocation10 + $0x68] ss:$16 sps:$4 sm:$0xff]  }
 0xdbc   :  { %3928 = vmatprep.subr.bf16.mxu0 %v9991_v54  ;;  %v3272_v28 = vpack.c.bf16 %v11518_v29, %v11513_v7  ;;  %v3271_v46 = vpack.c.bf16 %v11528_v4, %v11523_v19  ;;  %3955 = vmatprep.subr.bf16.mxu1 %v10000_v8  ;;  %v10001_v54 = vld [vmem:[#allocation10 + $0x28] ss:$16 sps:$4 sm:$0xff]   ;;  %v10012_v53 = vld [vmem:[#allocation10 + $0x8c] ss:$16 sps:$4 sm:$0xff]  }
 0xdbd   :  { %3956 = vmatpush1.bf16.msra.mxu1 %v9998_v0 }
 0xdbe   :  { %3507 = vmatprep.mubr.bf16.mxu0 %v3272_v28  ;;  %3957 = vmatprep.subr.bf16.mxu1 %v10003_v31  ;;  %v10015_v28 = vld [vmem:[#allocation10 + $0xac] ss:$16 sps:$4 sm:$0xff]  }
 0xdbf   :  { %3929 = vmatpush1.bf16.msra.mxu0 %v9989_v36  ;;  %v10010_v36 = vld [vmem:[#allocation10 + $0x88] ss:$16 sps:$4 sm:$0xff]  }
 0xdc0   :  { %3508 = vmatmul.mubr.bf16.gmra.mrb[64].mxu0 %v3271_v46  ;;  %3930 = vmatprep.subr.bf16.mxu0 %v9994_v60  ;;  %v10013_v46 = vld [vmem:[#allocation10 + $0xa8] ss:$16 sps:$4 sm:$0xff]   ;;  %v10018_v60 = vld [vmem:[#allocation10 + $0xcc] ss:$16 sps:$4 sm:$0xff]  }
 0xdc1   :  { %3934 = vmatprep.mubr.bf16.mxu0 %v11441_v15  ;;  %v170_v15 = vld [vmem:[#allocation2 + $0x30] sm:$0xff]  ;;  %3958 = vmatpush1.bf16.msra.mxu1 %v10001_v54 }
 0xdc2   :  { %v11542_v5 = vpack.c.bf16 %v170_v15, %v168_v52  ;;  %3959 = vmatprep.subr.bf16.mxu1 %v10006_v45  ;;  %v10030_v52 = vld [vmem:[#allocation10 + $0x14c] ss:$16 sps:$4 sm:$0xff]   ;;  %v10028_v15 = vld [vmem:[#allocation10 + $0x148] ss:$16 sps:$4 sm:$0xff]  }
 0xdc3   :  { %3931 = vmatpush1.bf16.msra.mxu0 %v9992_v61  ;;  %v10016_v61 = vld [vmem:[#allocation10 + $0xc8] ss:$16 sps:$4 sm:$0xff]  }
 0xdc4   :  { %3932 = vmatprep.subr.bf16.mxu0 %v9997_v62  ;;  %v10021_v62 = vld [vmem:[#allocation10 + $0xec] ss:$16 sps:$4 sm:$0xff]  }
 0xdc5   :  { %3960 = vmatpush1.bf16.msra.mxu1 %v10004_v25 }
 0xdc6   :  { %3961 = vmatprep.subr.bf16.mxu1 %v10009_v18 }
 0xdc7   :  { %3933 = vmatpush1.bf16.msra.mxu0 %v9995_v44  ;;  %v10019_v44 = vld [vmem:[#allocation10 + $0xe8] ss:$16 sps:$4 sm:$0xff]  }
 0xdc8   :  { %9425 = vmatprep.subr.bf16.mxu0 %v10681_v12 }
 0xdc9   :  { %3962 = vmatpush1.bf16.msra.mxu1 %v10007_v47 }
 0xdca   :  { %3935 = vmatmul.mubr.bf16.vlgmr.msra.gmra.mrb[68].mxu0 %v11535_v21  ;;  %3963 = vmatprep.subr.bf16.mxu1 %v10012_v53 }
 0xdcb   :  { %3944 = vmatprep.mubr.bf16.mxu0 %v11537_v3 }
 0xdcd   :  { %3964 = vmatpush1.bf16.msra.mxu1 %v10010_v36 }
 0xdce   :  { %3965 = vmatprep.subr.bf16.mxu1 %v10015_v28 }
 0xdd1   :  { %3966 = vmatpush1.bf16.msra.mxu1 %v10013_v46 }
 0xdd2   :  { %3945 = vmatmul.mubr.bf16.gmra.mrb[72].mxu0 %v11542_v5  ;;  %3967 = vmatprep.subr.bf16.mxu1 %v10018_v60 }
 0xdd3   :  { %9427 = vmatprep.mubr.msk.bf16.mxu0 %vm10682_vm0, %v10681_v12 }
 0xdd5   :  { %3968 = vmatpush1.bf16.msra.mxu1 %v10016_v61 }
 0xdd6   :  { %3969 = vmatprep.subr.bf16.mxu1 %v10021_v62 }
 0xdd9   :  { %3970 = vmatpush1.bf16.msra.mxu1 %v10019_v44 }
 0xdda   :  { %3971 = vmatprep.subr.bf16.mxu1 %v10024_v63  ;;  %v11629_v63 = vld [vmem:[%s12250_s1 + $0x8] sm:$0xff] }
 0xddd   :  { %3972 = vmatpush1.bf16.msra.mxu1 %v10022_v39 }
 0xdde   :  { %3973 = vmatprep.subr.bf16.mxu1 %v10027_v1 }
 0xde1   :  { %3974 = vmatpush1.bf16.msra.mxu1 %v10025_v2 }
 0xde2   :  { %3975 = vmatprep.subr.bf16.mxu1 %v10030_v52 }
 0xde5   :  { %3976 = vmatpush1.bf16.msra.mxu1 %v10028_v15 }
 0xe5d   :  { %v3499_v6 = vpop.f32.mrb[60].mxu0 }
 0xe5e   :  { %v11547_v11 = vpop.f32.mrb[61].mxu0  ;;  %v11566_v57 = vpack.c.bf16 %v3499_v6, %v3499_v6  ;;  %v10033_v6 = vld [vmem:[#allocation10 + $0x16c] ss:$16 sps:$4 sm:$0xff]  }
 0xe5f   :  { %v3503_v13 = vpop.f32.mrb[62].mxu0  ;;  %3977 = vmatprep.subr.bf16.mxu1 %v10033_v6 }
 0xe60   :  { %v11549_v56 = vpop.f32.mrb[63].mxu0  ;;  %v11581_v37 = vpack.c.bf16 %v3503_v13, %v3503_v13  ;;  %v10031_v13 = vld [vmem:[#allocation10 + $0x168] ss:$16 sps:$4 sm:$0xff]  }
 0xe61   :  { %3978 = vmatpush1.bf16.msra.mxu1 %v10031_v13 }
 0xe93   :  { %v3509_v33 = vpop.f32.mrb[64].mxu0 }
 0xe94   :  { %v11551_v22 = vpop.f32.mrb[65].mxu0  ;;  %v11592_v14 = vpack.c.bf16 %v3509_v33, %v3509_v33  ;;  %v10034_v33 = vld [vmem:[#allocation10 + $0x188] ss:$16 sps:$4 sm:$0xff]  }
 0xe95   :  { %v3513_v10 = vpop.f32.mrb[66].mxu0 }
 0xe96   :  { %v11553_v34 = vpop.f32.mrb[67].mxu0  ;;  %v11601_v41 = vpack.c.bf16 %v3513_v10, %v3513_v10  ;;  %v10036_v10 = vld [vmem:[#allocation10 + $0x18c] ss:$16 sps:$4 sm:$0xff]  }
 0xe97   :  { %3979 = vmatprep.subr.bf16.mxu1 %v10036_v10 }
 0xe98   :  { %3980 = vmatpush1.bf16.msra.mxu1 %v10034_v33 }
 0xe9d   :  { %v3936_v38 = vpop.f32.mrb[68].mxu0 }
 0xe9e   :  { %v11555_v24 = vpack.c.bf16 %v3936_v38, %v3936_v38  ;;  %v11557_v50 = vpop.f32.mrb[69].mxu0  ;;  %v10039_v38 = vld [vmem:[#allocation10 + $0x1ac] ss:$16 sps:$4 sm:$0xff]  }
 0xe9f   :  { %v3940_v59 = vpop.f32.mrb[70].mxu0  ;;  %3981 = vmatprep.subr.bf16.mxu1 %v10039_v38 }
 0xea0   :  { %v4028_v32 = vsel %vm929_vm1, %v11555_v24, 0  ;;  %v11561_v42 = vpop.f32.mrb[71].mxu0  ;;  %v11564_v49 = vpack.c.bf16 %v3940_v59, %v3940_v59  ;;  %v10037_v59 = vld [vmem:[#allocation10 + $0x1a8] ss:$16 sps:$4 sm:$0xff]  }
 0xea1   :  { %9426 = vmatpush3.bf16.xpose.msra.mxu0 %v4028_v32  ;;  %v10042_v32 = vld [vmem:[#allocation10 + $0x1cc] ss:$16 sps:$4 sm:$0xff]   ;;  %3982 = vmatpush1.bf16.msra.mxu1 %v10037_v59 }
 0xea2   :  { %9431 = vmatprep.subr.bf16.mxu0 %v10681_v12  ;;  %v4074_v23 = vsel %vm929_vm1, %v11564_v49, 0  ;;  %3983 = vmatprep.subr.bf16.mxu1 %v10042_v32 }
 0xea5   :  { %v3946_v48 = vpop.f32.mrb[72].mxu0 }
 0xea6   :  { %v11568_v51 = vpop.f32.mrb[73].mxu0  ;;  %v11578_v26 = vpack.c.bf16 %v3946_v48, %v3946_v48  ;;  %v10040_v48 = vld [vmem:[#allocation10 + $0x1c8] ss:$16 sps:$4 sm:$0xff]  }
 0xea7   :  { %v3950_v58 = vpop.f32.mrb[74].mxu0  ;;  %3984 = vmatpush1.bf16.msra.mxu1 %v10040_v48 }
 0xea8   :  { %9428 = vmatmul.mubr.msk.bf16.vlgmr.msra.gmra.mrb[76].mxu0 %vm929_vm1, %v11566_v57  ;;  %v11574_v30 = vpop.f32.mrb[75].mxu0  ;;  %v4120_v40 = vsel %vm929_vm1, %v11578_v26, 0  ;;  %v11590_v27 = vpack.c.bf16 %v3950_v58, %v3950_v58  ;;  %v10045_v58 = vld [vmem:[#allocation10 + $0x1ec] ss:$16 sps:$4 sm:$0xff]  }
 0xea9   :  { %9432 = vmatpush3.bf16.xpose.msra.mxu0 %v4074_v23  ;;  %9433 = vmatprep.mubr.msk.bf16.mxu0 %vm10682_vm0, %v10681_v12  ;;  %v10043_v23 = vld [vmem:[#allocation10 + $0x1e8] ss:$16 sps:$4 sm:$0xff]  }
 0xeaa   :  { %9437 = vmatprep.subr.bf16.mxu0 %v10681_v12  ;;  %v4166_v35 = vsel %vm929_vm1, %v11590_v27, 0  ;;  %3985 = vmatprep.subr.bf16.mxu1 %v10045_v58 }
 0xeab   :  { %3986 = vmatpush1.bf16.msra.mxu1 %v10043_v23 }
 0xeac   :  { %9467 = vmatprep.subr.bf16.mxu1 %v10681_v12 }
 0xeae   :  { %3988 = vmatmul.mubr.bf16.vlgmr.msra.gmra.mrb[100].mxu1 %v11535_v21 }
 0xeaf   :  { %3997 = vmatprep.mubr.bf16.mxu1 %v11537_v3  ;;  %v11616_v3 = vld [vmem:[%s12250_s1 + $0x18] sm:$0xff] }
 0xeb0   :  { %9434 = vmatmul.mubr.msk.bf16.vlgmr.msra.gmra.mrb[80].mxu0 %vm929_vm1, %v11581_v37 }
 0xeb1   :  { %9438 = vmatpush3.bf16.xpose.msra.mxu0 %v4120_v40  ;;  %9439 = vmatprep.mubr.msk.bf16.mxu0 %vm10682_vm0, %v10681_v12 }
 0xeb2   :  { %9443 = vmatprep.subr.bf16.mxu0 %v10681_v12 }
 0xeb6   :  { %3998 = vmatmul.mubr.bf16.gmra.mrb[104].mxu1 %v11542_v5 }
 0xeb7   :  { %9469 = vmatprep.mubr.msk.bf16.mxu1 %vm10682_vm0, %v10681_v12 }
 0xeb8   :  { %9440 = vmatmul.mubr.msk.bf16.vlgmr.msra.gmra.mrb[84].mxu0 %vm929_vm1, %v11592_v14 }
 0xeb9   :  { %9444 = vmatpush3.bf16.xpose.msra.mxu0 %v4166_v35  ;;  %9445 = vmatprep.mubr.msk.bf16.mxu0 %vm10682_vm0, %v10681_v12 }
 0xeba   :  { %9449 = vmatprep.subr.bf16.mxu0 %v10681_v12 }
 0xec0   :  { %9446 = vmatmul.mubr.msk.bf16.vlgmr.msra.gmra.mrb[88].mxu0 %vm929_vm1, %v11601_v41 }
 0xec1   :  { %9451 = vmatprep.mubr.msk.bf16.mxu0 %vm10682_vm0, %v10681_v12 }
 0xf7b   :  { %v4064_v40 = vpop.f32.mrb[76].mxu0 }
 0xf7c   :  { %v9429_v35 = vpop.f32.mrb[77].mxu0 }
 0xf7d   :  { %v4067_v0 = vpop.f32.mrb[78].mxu0 }
 0xf7e   :  { %v9430_v8 = vpop.f32.mrb[79].mxu0  ;;  %v4208_v0 = vmul.f32 0.125, %v4064_v40 }
 0xf7f   :  { %v11664_v8 = vld [vmem:[%s12250_s1] sm:$0xff] }
 0xf81   :  { %v3989_v15 = vpop.f32.mrb[100].mxu1 }
 0xf82   :  { %v11637_v6 = vpack.c.bf16 %v3989_v15, %v3989_v15  ;;  %v11639_v13 = vpop.f32.mrb[101].mxu1 }
 0xf83   :  { %v4110_v54 = vpop.f32.mrb[80].mxu0  ;;  %v11641_v33 = vpop.f32.mrb[102].mxu1 }
 0xf84   :  { %v9435_v31 = vpop.f32.mrb[81].mxu0  ;;  %v4209_v44 = vmul.f32 0.125, %v4110_v54  ;;  %v4268_v10 = vsel %vm1174_vm3, %v11637_v6, 0  ;;  %v11645_v38 = vpop.f32.mrb[103].mxu1 }
 0xf85   :  { %v4113_v25 = vpop.f32.mrb[82].mxu0  ;;  %9450 = vmatpush3.bf16.msra.mxu0 %v4268_v10  ;;  %v4212_v31 = vadd.f32 %v4208_v0, %v11664_v8 }
 0xf86   :  { %v9436_v45 = vpop.f32.mrb[83].mxu0  ;;  %v11632_v39 = vadd.f32 %v4209_v44, %v11629_v63  ;;  %9455 = vmatprep.subr.bf16.mxu0 %v10681_v12  ;;  %v11670_v25 = vld [vmem:[%s12250_s1 + $0x10] sm:$0xff] }
 0xf87   :  { %v4216_v45 = vsel %vm1122_vm2, %v4212_v31, -inf }
 0xf88   :  { %v4219_v1 = vsel %vm1122_vm2, %v11632_v39, -inf }
 0xf89   :  { %v11648_v59 = vpop.f32.mrb[104].mxu1 }
 0xf8a   :  { %v11650_v32 = vpop.f32.mrb[105].mxu1 }
 0xf8b   :  { %v4156_v47 = vpop.f32.mrb[84].mxu0  ;;  %v4003_v48 = vpop.f32.mrb[106].mxu1 }
 0xf8c   :  { %v9441_v18 = vpop.f32.mrb[85].mxu0  ;;  %v11652_v58 = vpop.f32.mrb[107].mxu1  ;;  %v11654_v23 = vpack.c.bf16 %v4003_v48, %v4003_v48  ;;  %v4210_v54 = vmul.f32 0.125, %v4156_v47 }
 0xf8d   :  { %v4159_v53 = vpop.f32.mrb[86].mxu0 }
 0xf8e   :  { %v9442_v36 = vpop.f32.mrb[87].mxu0  ;;  %v4406_v35 = vsel %vm1174_vm3, %v11654_v23, 0  ;;  %v4214_v18 = vadd.f32 %v4210_v54, %v11670_v25 }
 0xf8f   :  { %9468 = vmatpush3.bf16.msra.mxu1 %v4406_v35 }
 0xf90   :  { %9479 = vmatprep.subr.bf16.mxu1 %v10681_v12 }
 0xf93   :  { %v4202_v21 = vpop.f32.mrb[88].mxu0 }
 0xf94   :  { %v4211_v5 = vmul.f32 0.125, %v4202_v21  ;;  %v9447_v28 = vpop.f32.mrb[89].mxu0 }
 0xf95   :  { %v4205_v46 = vpop.f32.mrb[90].mxu0 }
 0xf96   :  { %v9448_v60 = vpop.f32.mrb[91].mxu0  ;;  %v4215_v61 = vadd.f32 %v4211_v5, %v11616_v3 }
 0xf98   :  { %v4225_v62 = vsel %vm1122_vm2, %v4215_v61, -inf }
 0xf99   :  { %4226 = vmax.xlane.f32.xlu1 %v4225_v62 }
 0xfaa   :  { %4514 = vrot.lane.b32.xlu1 %v11564_v49, %s10683_s10 }
 0xfae   :  { %4618 = vrot.lane.b32.xlu1 %v11590_v27, %s10683_s10 }
 0xfb2   :  { %4615 = vrot.lane.b32.xlu1 %v11601_v41, %s10683_s10 }
 0xfd6   :  { %4220 = vmax.xlane.f32.xlu1 %v4219_v1 }
0x1026   :  { %v4227_v49 = vpop.xlane.xlu1 %4226 }
0x1027   :  { %v4231_v2 = vsub.f32 %v4215_v61, %v4227_v49 }
0x1029   :  { %v4238_v52 = vmul.f32 1.442695, %v4231_v2 }
0x102a   :  { %v4515_v47 = vpop.permute.xlu1 %4514 }
0x102b   :  { %10358 = vpow2.f32 %v4238_v52  ;;  %v4520_v5 = vsel %vm929_vm1, %v4515_v47, 0 }
0x102e   :  { %v4619_v28 = vpop.permute.xlu1 %4618 }
0x102f   :  { %v4624_v60 = vsel %vm929_vm1, %v4619_v28, 0 }
0x1032   :  { %v4616_v61 = vpop.permute.xlu1 %4615 }
0x1035   :  { %v10359_v27 = vpop.eup %10358 }
0x1036   :  { %v4249_v41 = vsel %vm1122_vm2, %v10359_v27, 0.0 }
0x1037   :  { %4250 = vadd.xlane.f32.xlu0 %v4249_v41 }
0x104d   :  { %4511 = vrot.lane.b32.xlu0 %v11581_v37, %s10683_s10  ;;  %v4222_v37 = vsel %vm1122_vm2, %v4214_v18, -inf }
0x106c   :  { %4217 = vmax.xlane.f32.xlu0 %v4216_v45 }
0x1070   :  { %4223 = vmax.xlane.f32.xlu0 %v4222_v37 }
0x10c4   :  { %v4251_v40 = vpop.xlane.xlu0 %4250 }
0x10c5   :  { %10360 = vrcp.f32 %v4251_v40 }
0x10c8   :  { %v4512_v46 = vpop.permute.xlu0 %4511 }
0x10cf   :  { %v10361_v53 = vpop.eup %10360 }
0x10d0   :  { %v4259_v36 = vmul.f32 %v10361_v53, %v10359_v27  ;;  %v4221_v27 = vpop.xlane.xlu1 %4220 }
0x10d1   :  { %v4229_v48 = vsub.f32 %v11632_v39, %v4221_v27 }
0x10d2   :  { %v4263_v21 = vpack.c.bf16 %v4259_v36, %v4259_v36 }
0x10d3   :  { %v4234_v0 = vmul.f32 1.442695, %v4229_v48 }
0x10d4   :  { %9470 = vmatmul.mubr.msk.bf16.vlgmr.msra.gmra.mrb[108].mxu1 %vm1122_vm2, %v4263_v21 }
0x10d5   :  { %9480 = vmatpush3.bf16.xpose.msra.mxu1 %v4520_v5  ;;  %9481 = vmatprep.mubr.msk.bf16.mxu1 %vm10682_vm0, %v10681_v12 }
0x10d6   :  { %9491 = vmatprep.subr.bf16.mxu1 %v10681_v12 }
0x10dc   :  { %9482 = vmatmul.mubr.msk.bf16.vlgmr.msra.gmra.mrb[112].mxu1 %vm929_vm1, %v4512_v46 }
0x10dd   :  { %9492 = vmatpush3.bf16.xpose.msra.mxu1 %v4624_v60  ;;  %9493 = vmatprep.mubr.msk.bf16.mxu1 %vm10682_vm0, %v10681_v12 }
0x10de   :  { %9503 = vmatprep.subr.bf16.mxu1 %v10681_v12 }
0x10e4   :  { %9494 = vmatmul.mubr.msk.bf16.vlgmr.msra.gmra.mrb[116].mxu1 %vm929_vm1, %v4616_v61 }
0x10e5   :  { %9505 = vmatprep.mubr.msk.bf16.mxu1 %vm10682_vm0, %v10681_v12 }
0x10f9   :  { %v4218_v62 = vpop.xlane.xlu0 %4217 }
0x10fa   :  { %v4228_v44 = vsub.f32 %v4212_v31, %v4218_v62 }
0x10fc   :  { %v4232_v49 = vmul.f32 1.442695, %v4228_v44 }
0x10fd   :  { %v4224_v1 = vpop.xlane.xlu0 %4223 }
0x10fe   :  { %v4230_v2 = vsub.f32 %v4214_v18, %v4224_v1  ;;  %10362 = vpow2.f32 %v4232_v49 }
0x1100   :  { %v4236_v35 = vmul.f32 1.442695, %v4230_v2 }
0x1102   :  { %10364 = vpow2.f32 %v4236_v35 }
0x1103   :  { %10366 = vpow2.f32 %v4234_v0 }
0x1108   :  { %v10363_v36 = vpop.eup %10362 }
0x1109   :  { %v4240_v39 = vsel %vm1122_vm2, %v10363_v36, 0.0 }
0x110c   :  { %v10365_v28 = vpop.eup %10364 }
0x110d   :  { %v4246_v62 = vsel %vm1122_vm2, %v10365_v28, 0.0  ;;  %v10367_v1 = vpop.eup %10366 }
0x110e   :  { %v4243_v49 = vsel %vm1122_vm2, %v10367_v1, 0.0 }
0x11a7   :  { %v11688_v52 = vpop.f32.mrb[108].mxu1 }
0x11a8   :  { %v9471_v41 = vpop.f32.mrb[109].mxu1 }
0x11a9   :  { %v4445_v15 = vpop.f32.mrb[110].mxu1 }
0x11aa   :  { %v9472_v10 = vpop.f32.mrb[111].mxu1 }
0x11af   :  { %v4556_v54 = vpop.f32.mrb[112].mxu1 }
0x11b0   :  { %v4667_v45 = vmul.f32 0.125, %v4556_v54  ;;  %v9483_v37 = vpop.f32.mrb[113].mxu1 }
0x11b1   :  { %v4559_v40 = vpop.f32.mrb[114].mxu1 }
0x11b2   :  { %v9484_v31 = vpop.f32.mrb[115].mxu1  ;;  %v4671_v53 = vadd.f32 %v4667_v45, %v11629_v63 }
0x11b4   :  { %v4677_v18 = vsel %vm1122_vm2, %v4671_v53, -inf }
0x11b5   :  { %4678 = vmax.xlane.f32.xlu0 %v4677_v18 }
0x11b7   :  { %v4660_v47 = vpop.f32.mrb[116].mxu1 }
0x11b8   :  { %v4669_v21 = vmul.f32 0.125, %v4660_v47  ;;  %v9495_v5 = vpop.f32.mrb[117].mxu1 }
0x11b9   :  { %4241 = vadd.xlane.f32.xlu0 %v4240_v39  ;;  %v4663_v46 = vpop.f32.mrb[118].mxu1 }
0x11ba   :  { %v9496_v60 = vpop.f32.mrb[119].mxu1  ;;  %v4673_v61 = vadd.f32 %v4669_v21, %v11616_v3 }
0x11bc   :  { %v4683_v44 = vsel %vm1122_vm2, %v4673_v61, -inf }
0x11bd   :  { %4247 = vadd.xlane.f32.xlu0 %v4246_v62  ;;  %4684 = vmax.xlane.f32.xlu1 %v4683_v44 }
0x11c1   :  { %4244 = vadd.xlane.f32.xlu1 %v4243_v49 }
0x11d2   :  { %4462 = vrot.lane.b32.xlu1 %v11555_v24, %s10683_s10 }
0x11d3   :  { %4459 = vrot.lane.b32.xlu0 %v11566_v57, %s10683_s10 }
0x11d6   :  { %4566 = vrot.lane.b32.xlu1 %v11578_v26, %s10683_s10 }
0x11d7   :  { %4563 = vrot.lane.b32.xlu0 %v11592_v14, %s10683_s10  ;;  %v4021_v14 = vpack.c.bf16 %v11641_v33, %v11641_v33  ;;  %v11717_v33 = vpack.c.bf16 %v11648_v59, %v11648_v59 }
0x11d9   :  { %v4314_v40 = vsel %vm1174_vm3, %v4021_v14, 0  ;;  %v4360_v5 = vsel %vm1174_vm3, %v11717_v33, 0 }
0x1242   :  { %v4679_v2 = vpop.xlane.xlu0 %4678 }
0x1243   :  { %v4687_v27 = vsub.f32 %v4671_v53, %v4679_v2 }
0x1245   :  { %v4692_v41 = vmul.f32 1.442695, %v4687_v27 }
0x1246   :  { %v4242_v15 = vpop.xlane.xlu0 %4241 }
0x1247   :  { %10368 = vpow2.f32 %v4692_v41 }
0x1248   :  { %10370 = vrcp.f32 %v4242_v15 }
0x124a   :  { %v4685_v10 = vpop.xlane.xlu1 %4684  ;;  %v4248_v57 = vpop.xlane.xlu0 %4247 }
0x124b   :  { %v4689_v48 = vsub.f32 %v4673_v61, %v4685_v10 }
0x124d   :  { %v4696_v35 = vmul.f32 1.442695, %v4689_v48 }
0x124e   :  { %v4245_v0 = vpop.xlane.xlu1 %4244  ;;  %v4460_v62 = vpop.permute.xlu0 %4459 }
0x124f   :  { %10372 = vpow2.f32 %v4696_v35 }
0x1250   :  { %10374 = vrcp.f32 %v4245_v0 }
0x1251   :  { %v10369_v24 = vpop.eup %10368  ;;  %10376 = vrcp.f32 %v4248_v57  ;;  %v11750_v57 = vpack.c.bf16 %v11557_v50, %v11557_v50  ;;  %v11764_v50 = vpack.c.bf16 %v11547_v11, %v11547_v11  ;;  %v11779_v11 = vpack.c.bf16 %v11549_v56, %v11549_v56 }
0x1252   :  { %v10371_v54 = vpop.eup %10370  ;;  %v4701_v26 = vsel %vm1122_vm2, %v10369_v24, 0.0  ;;  %v4463_v59 = vpop.permute.xlu1 %4462  ;;  %v11794_v56 = vpack.c.bf16 %v11551_v22, %v11551_v22  ;;  %v11809_v22 = vpack.c.bf16 %v11553_v34, %v11553_v34 }
0x1253   :  { %v4256_v45 = vmul.f32 %v10371_v54, %v10363_v36  ;;  %4702 = vadd.xlane.f32.xlu1 %v4701_v26  ;;  %v4468_v60 = vsel %vm929_vm1, %v4463_v59, 0  ;;  %v4564_v44 = vpop.permute.xlu0 %4563  ;;  %v11760_v26 = vpack.c.bf16 %v11561_v42, %v11561_v42  ;;  %v11775_v42 = vpack.c.bf16 %v11568_v51, %v11568_v51 }
0x1254   :  { %v11790_v51 = vpack.c.bf16 %v11574_v30, %v11574_v30  ;;  %v11805_v30 = vpack.c.bf16 %v11639_v13, %v11639_v13 }
0x1255   :  { %v4260_v37 = vpack.c.bf16 %v4256_v45, %v4256_v45  ;;  %v5234_v45 = vsel %vm929_vm1, %v11775_v42, 0 }
0x1256   :  { %v4567_v61 = vpop.permute.xlu1 %4566 }
0x1257   :  { %9452 = vmatmul.mubr.msk.bf16.vlgmr.msra.gmra.mrb[92].mxu0 %vm1122_vm2, %v4260_v37  ;;  %v5280_v37 = vsel %vm929_vm1, %v11790_v51, 0 }
0x1258   :  { %9456 = vmatpush3.bf16.msra.mxu0 %v4314_v40  ;;  %9457 = vmatprep.mubr.msk.bf16.mxu0 %vm10682_vm0, %v10681_v12  ;;  %v5382_v40 = vsel %vm1174_vm3, %v11805_v30, 0 }
0x1259   :  { %v10373_v31 = vpop.eup %10372  ;;  %9461 = vmatprep.subr.bf16.mxu0 %v10681_v12 }
0x125a   :  { %v10375_v53 = vpop.eup %10374  ;;  %v4707_v18 = vsel %vm1122_vm2, %v10373_v31, 0.0 }
0x125b   :  { %v4257_v36 = vmul.f32 %v10375_v53, %v10367_v1  ;;  %4708 = vadd.xlane.f32.xlu0 %v4707_v18  ;;  %v10377_v21 = vpop.eup %10376 }
0x125c   :  { %v4258_v39 = vmul.f32 %v10377_v21, %v10365_v28  ;;  %v4572_v28 = vsel %vm929_vm1, %v4567_v61, 0 }
0x125d   :  { %v4261_v47 = vpack.c.bf16 %v4257_v36, %v4257_v36 }
0x125e   :  { %v4262_v46 = vpack.c.bf16 %v4258_v39, %v4258_v39 }
0x125f   :  { %9458 = vmatmul.mubr.msk.bf16.vlgmr.msra.gmra.mrb[96].mxu0 %vm1122_vm2, %v4261_v47 }
0x1260   :  { %9462 = vmatpush3.bf16.msra.mxu0 %v4360_v5  ;;  %9463 = vmatprep.mubr.msk.bf16.mxu0 %vm10682_vm0, %v10681_v12 }
0x1261   :  { %9473 = vmatprep.subr.bf16.mxu0 %v10681_v12 }
0x1264   :  { %4772 = vrot.lane.b32.xlu1 %v4021_v14, %s10683_s10  ;;  %v5188_v14 = vsel %vm929_vm1, %v11760_v26, 0 }
0x1267   :  { %9464 = vmatmul.mubr.msk.bf16.vlgmr.msra.gmra.mrb[100].mxu0 %vm1122_vm2, %v4262_v46 }
0x1268   :  { %9475 = vmatprep.mubr.msk.bf16.mxu0 %vm10682_vm0, %v10681_v12 }
0x1269   :  { %9474 = vmatpush3.bf16.xpose.msra.mxu0 %v4468_v60 }
0x126a   :  { %9485 = vmatprep.subr.bf16.mxu0 %v10681_v12 }
0x1270   :  { %9476 = vmatmul.mubr.msk.bf16.vlgmr.msra.gmra.mrb[104].mxu0 %vm929_vm1, %v4460_v62 }
0x1271   :  { %9486 = vmatpush3.bf16.xpose.msra.mxu0 %v4572_v28  ;;  %4870 = vrot.lane.b32.xlu0 %v11654_v23, %s10683_s10 }
0x1272   :  { %9487 = vmatprep.mubr.msk.bf16.mxu0 %vm10682_vm0, %v10681_v12  ;;  %9497 = vmatprep.subr.bf16.mxu0 %v10681_v12 }
0x1278   :  { %9488 = vmatmul.mubr.msk.bf16.vlgmr.msra.gmra.mrb[108].mxu0 %vm929_vm1, %v4564_v44 }
0x1279   :  { %9499 = vmatprep.mubr.msk.bf16.mxu0 %vm10682_vm0, %v10681_v12 }
0x12e0   :  { %v4703_v1 = vpop.xlane.xlu1 %4702 }
0x12e1   :  { %10378 = vrcp.f32 %v4703_v1 }
0x12e4   :  { %v4773_v49 = vpop.permute.xlu1 %4772 }
0x12e5   :  { %v4778_v2 = vsel %vm1174_vm3, %v4773_v49, 0 }
0x12e6   :  { %9504 = vmatpush3.bf16.msra.mxu1 %v4778_v2 }
0x12e7   :  { %9515 = vmatprep.subr.bf16.mxu1 %v10681_v12 }
0x12e8   :  { %v4709_v23 = vpop.xlane.xlu0 %4708 }
0x12e9   :  { %10380 = vrcp.f32 %v4709_v23 }
0x12eb   :  { %v10379_v27 = vpop.eup %10378 }
0x12ec   :  { %v4715_v41 = vmul.f32 %v10379_v27, %v10369_v24  ;;  %v4871_v15 = vpop.permute.xlu0 %4870  ;;  %v5142_v24 = vsel %vm929_vm1, %v11750_v57, 0 }
0x12ed   :  { %v4876_v48 = vsel %vm1174_vm3, %v4871_v15, 0 }
0x12ee   :  { %v4719_v10 = vpack.c.bf16 %v4715_v41, %v4715_v41 }
0x12f0   :  { %9506 = vmatmul.mubr.msk.bf16.vlgmr.msra.gmra.mrb[120].mxu1 %vm1122_vm2, %v4719_v10 }
0x12f1   :  { %9516 = vmatpush3.bf16.msra.mxu1 %v4876_v48  ;;  %9517 = vmatprep.mubr.msk.bf16.mxu1 %vm10682_vm0, %v10681_v12 }
0x12f2   :  { %9521 = vmatprep.subr.bf16.mxu1 %v10681_v12 }
0x12f3   :  { %v10381_v35 = vpop.eup %10380 }
0x12f4   :  { %v4717_v0 = vmul.f32 %v10381_v35, %v10373_v31 }
0x12f6   :  { %v4721_v54 = vpack.c.bf16 %v4717_v0, %v4717_v0 }
0x12f8   :  { %9518 = vmatmul.mubr.msk.bf16.vlgmr.msra.gmra.mrb[124].mxu1 %vm1122_vm2, %v4721_v54 }
0x12f9   :  { %9523 = vmatprep.mubr.msk.bf16.mxu1 %vm10682_vm0, %v10681_v12 }
0x12fa   :  { %9522 = vmatpush3.bf16.xpose.msra.mxu1 %v5142_v24 }
0x12fb   :  { %9527 = vmatprep.subr.bf16.mxu1 %v10681_v12 }
0x1301   :  { %9524 = vmatmul.mubr.msk.bf16.vlgmr.msra.gmra.mrb[128].mxu1 %vm929_vm1, %v11764_v50 }
0x1302   :  { %9528 = vmatpush3.bf16.xpose.msra.mxu1 %v5188_v14  ;;  %9529 = vmatprep.mubr.msk.bf16.mxu1 %vm10682_vm0, %v10681_v12 }
0x1303   :  { %9533 = vmatprep.subr.bf16.mxu1 %v10681_v12 }
0x1309   :  { %9530 = vmatmul.mubr.msk.bf16.vlgmr.msra.gmra.mrb[132].mxu1 %vm929_vm1, %v11779_v11 }
0x130a   :  { %9534 = vmatpush3.bf16.xpose.msra.mxu1 %v5234_v45  ;;  %9535 = vmatprep.mubr.msk.bf16.mxu1 %vm10682_vm0, %v10681_v12 }
0x130b   :  { %9539 = vmatprep.subr.bf16.mxu1 %v10681_v12 }
0x1311   :  { %9536 = vmatmul.mubr.msk.bf16.vlgmr.msra.gmra.mrb[136].mxu1 %vm929_vm1, %v11794_v56 }
0x1312   :  { %9540 = vmatpush3.bf16.xpose.msra.mxu1 %v5280_v37  ;;  %9541 = vmatprep.mubr.msk.bf16.mxu1 %vm10682_vm0, %v10681_v12 }
0x1313   :  { %9545 = vmatprep.subr.bf16.mxu1 %v10681_v12 }
0x1319   :  { %9542 = vmatmul.mubr.msk.bf16.vlgmr.msra.gmra.mrb[140].mxu1 %vm929_vm1, %v11809_v22 }
0x131a   :  { %9546 = vmatpush3.bf16.msra.mxu1 %v5382_v40  ;;  %9547 = vmatprep.mubr.msk.bf16.mxu1 %vm10682_vm0, %v10681_v12 }
0x131b   :  { %9557 = vmatprep.subr.bf16.mxu1 %v10681_v12 }
0x132a   :  { %v11818_v31 = vpop.f32.mrb[92].mxu0 }
0x132b   :  { %v9453_v13 = vpop.f32.mrb[93].mxu0 }
0x132c   :  { %v4307_v53 = vpop.f32.mrb[94].mxu0 }
0x132d   :  { %v9454_v18 = vpop.f32.mrb[95].mxu0 }
0x1332   :  { %v11820_v36 = vpop.f32.mrb[96].mxu0 }
0x1333   :  { %v4448_v34 = vpack.c.bf16 %v11820_v36, %v11818_v31  ;;  %v9459_v47 = vpop.f32.mrb[97].mxu0 }
0x1334   :  { %v4353_v21 = vpop.f32.mrb[98].mxu0 }
0x1335   :  { %v9460_v5 = vpop.f32.mrb[99].mxu0 }
0x133a   :  { %v11824_v39 = vpop.f32.mrb[100].mxu0 }
0x133b   :  { %v4449_v59 = vpack.c.bf16 %v11688_v52, %v11824_v39  ;;  %v9465_v46 = vpop.f32.mrb[101].mxu0 }
0x133c   :  { %v4399_v60 = vpop.f32.mrb[102].mxu0 }
0x133d   :  { %v9466_v61 = vpop.f32.mrb[103].mxu0 }
0x1343   :  { %v4504_v62 = vpop.f32.mrb[104].mxu0 }
0x1344   :  { %v4666_v28 = vmul.f32 0.125, %v4504_v62  ;;  %v9477_v44 = vpop.f32.mrb[105].mxu0 }
0x1345   :  { %v4507_v1 = vpop.f32.mrb[106].mxu0 }
0x1346   :  { %v9478_v49 = vpop.f32.mrb[107].mxu0  ;;  %v4670_v2 = vadd.f32 %v4666_v28, %v11664_v8 }
0x1348   :  { %v4674_v23 = vsel %vm1122_vm2, %v4670_v2, -inf }
0x1349   :  { %4675 = vmax.xlane.f32.xlu1 %v4674_v23 }
0x134b   :  { %v4608_v27 = vpop.f32.mrb[108].mxu0 }
0x134c   :  { %v4668_v41 = vmul.f32 0.125, %v4608_v27  ;;  %v9489_v15 = vpop.f32.mrb[109].mxu0 }
0x134d   :  { %v4611_v10 = vpop.f32.mrb[110].mxu0 }
0x134e   :  { %v4672_v48 = vadd.f32 %v4668_v41, %v11670_v25  ;;  %v9490_v35 = vpop.f32.mrb[111].mxu0 }
0x1350   :  { %v4680_v0 = vsel %vm1122_vm2, %v4672_v48, -inf }
0x1351   :  { %4681 = vmax.xlane.f32.xlu0 %v4680_v0 }
0x13c3   :  { %v11832_v54 = vpop.f32.mrb[120].mxu1 }
0x13c4   :  { %v9507_v24 = vpop.f32.mrb[121].mxu1 }
0x13c5   :  { %v4817_v14 = vpop.f32.mrb[122].mxu1 }
0x13c6   :  { %v9508_v45 = vpop.f32.mrb[123].mxu1 }
0x13cb   :  { %v11834_v37 = vpop.f32.mrb[124].mxu1 }
0x13cc   :  { %v9519_v40 = vpop.f32.mrb[125].mxu1 }
0x13cd   :  { %v4915_v13 = vpop.f32.mrb[126].mxu1 }
0x13ce   :  { %v9520_v53 = vpop.f32.mrb[127].mxu1 }
0x13d4   :  { %v5178_v18 = vpop.f32.mrb[128].mxu1 }
0x13d5   :  { %v5322_v47 = vmul.f32 0.125, %v5178_v18  ;;  %v9525_v21 = vpop.f32.mrb[129].mxu1 }
0x13d6   :  { %v4676_v5 = vpop.xlane.xlu1 %4675  ;;  %v5181_v46 = vpop.f32.mrb[130].mxu1 }
0x13d7   :  { %v4686_v60 = vsub.f32 %v4670_v2, %v4676_v5  ;;  %v9526_v61 = vpop.f32.mrb[131].mxu1  ;;  %v5326_v62 = vadd.f32 %v5322_v47, %v11664_v8 }
0x13d9   :  { %v4690_v28 = vmul.f32 1.442695, %v4686_v60  ;;  %v5330_v44 = vsel %vm1122_vm2, %v5326_v62, -inf }
0x13da   :  { %5331 = vmax.xlane.f32.xlu1 %v5330_v44 }
0x13db   :  { %10382 = vpow2.f32 %v4690_v28 }
0x13dc   :  { %v11838_v1 = vpop.f32.mrb[132].mxu1 }
0x13dd   :  { %v9531_v49 = vpop.f32.mrb[133].mxu1 }
0x13de   :  { %v4682_v23 = vpop.xlane.xlu0 %4681  ;;  %v5227_v27 = vpop.f32.mrb[134].mxu1 }
0x13df   :  { %v4688_v41 = vsub.f32 %v4672_v48, %v4682_v23  ;;  %v9532_v15 = vpop.f32.mrb[135].mxu1 }
0x13e1   :  { %v4694_v10 = vmul.f32 1.442695, %v4688_v41 }
0x13e3   :  { %10384 = vpow2.f32 %v4694_v10 }
0x13e4   :  { %v5270_v35 = vpop.f32.mrb[136].mxu1 }
0x13e5   :  { %v10383_v0 = vpop.eup %10382  ;;  %v5324_v2 = vmul.f32 0.125, %v5270_v35  ;;  %v9537_v24 = vpop.f32.mrb[137].mxu1 }
0x13e6   :  { %v5273_v14 = vpop.f32.mrb[138].mxu1  ;;  %v4698_v45 = vsel %vm1122_vm2, %v10383_v0, 0.0 }
0x13e7   :  { %v5328_v40 = vadd.f32 %v5324_v2, %v11670_v25  ;;  %4699 = vadd.xlane.f32.xlu1 %v4698_v45  ;;  %v9538_v13 = vpop.f32.mrb[139].mxu1 }
0x13e9   :  { %v5336_v53 = vsel %vm1122_vm2, %v5328_v40, -inf }
0x13ea   :  { %5337 = vmax.xlane.f32.xlu0 %v5336_v53 }
0x13ec   :  { %v5316_v18 = vpop.f32.mrb[140].mxu1 }
0x13ed   :  { %v10385_v47 = vpop.eup %10384  ;;  %v9543_v48 = vpop.f32.mrb[141].mxu1 }
0x13ee   :  { %v5319_v21 = vpop.f32.mrb[142].mxu1  ;;  %v4704_v5 = vsel %vm1122_vm2, %v10385_v47, 0.0  ;;  %v10049_v48 = vld [vmem:[#allocation11 + $0x50] ss:$8 sps:$4 sm:$0xff]  }
0x13ef   :  { %4705 = vadd.xlane.f32.xlu0 %v4704_v5  ;;  %v9544_v46 = vpop.f32.mrb[143].mxu1  ;;  %v10054_v21 = vld [vmem:[#allocation11 + $0x64] ss:$8 sps:$4 sm:$0xff]   ;;  %v10057_v5 = vld [vmem:[#allocation11 + $0x74] ss:$8 sps:$4 sm:$0xff]  }
0x13f8   :  { %4723 = vrot.lane.b32.xlu1 %v11637_v6, %s10683_s10 }
0x1405   :  { %4821 = vrot.lane.b32.xlu0 %v11717_v33, %s10683_s10 }
0x1467   :  { %v5332_v60 = vpop.xlane.xlu1 %5331 }
0x1468   :  { %v5342_v61 = vsub.f32 %v5326_v62, %v5332_v60 }
0x146a   :  { %v5346_v28 = vmul.f32 1.442695, %v5342_v61  ;;  %v11890_v61 = vpack.c.bf16 %v11650_v32, %v11650_v32 }
0x146c   :  { %10386 = vpow2.f32 %v5346_v28 }
0x1474   :  { %v4700_v44 = vpop.xlane.xlu1 %4699 }
0x1475   :  { %10388 = vrcp.f32 %v4700_v44 }
0x1476   :  { %v11848_v49 = vpop.eup %10386 }
0x1477   :  { %v5338_v23 = vpop.xlane.xlu0 %5337  ;;  %v5354_v27 = vsel %vm1122_vm2, %v11848_v49, 0.0 }
0x1478   :  { %v4724_v41 = vpop.permute.xlu1 %4723  ;;  %v5344_v15 = vsub.f32 %v5328_v40, %v5338_v23  ;;  %5355 = vadd.xlane.f32.xlu1 %v5354_v27  ;;  %v5474_v23 = vsel %vm1174_vm3, %v11890_v61, 0 }
0x1479   :  { %v4729_v6 = vsel %vm1174_vm3, %v4724_v41, 0 }
0x147a   :  { %v5350_v10 = vmul.f32 1.442695, %v5344_v15  ;;  %9498 = vmatpush3.bf16.msra.mxu0 %v4729_v6 }
0x147b   :  { %9509 = vmatprep.subr.bf16.mxu0 %v10681_v12 }
0x147c   :  { %10390 = vpow2.f32 %v5350_v10  ;;  %v4706_v33 = vpop.xlane.xlu0 %4705 }
0x147d   :  { %10392 = vrcp.f32 %v4706_v33 }
0x147f   :  { %v10389_v62 = vpop.eup %10388 }
0x1480   :  { %v4714_v35 = vmul.f32 %v10389_v62, %v10383_v0  ;;  %v4822_v2 = vpop.permute.xlu0 %4821 }
0x1481   :  { %v4827_v14 = vsel %vm1174_vm3, %v4822_v2, 0 }
0x1482   :  { %v4718_v24 = vpack.c.bf16 %v4714_v35, %v4714_v35 }
0x1484   :  { %9500 = vmatmul.mubr.msk.bf16.vlgmr.msra.gmra.mrb[112].mxu0 %vm1122_vm2, %v4718_v24 }
0x1485   :  { %9510 = vmatpush3.bf16.msra.mxu0 %v4827_v14  ;;  %9511 = vmatprep.mubr.msk.bf16.mxu0 %vm10682_vm0, %v10681_v12 }
0x1486   :  { %v10391_v45 = vpop.eup %10390 }
0x1487   :  { %v10393_v40 = vpop.eup %10392  ;;  %v5360_v13 = vsel %vm1122_vm2, %v10391_v45, 0.0 }
0x1488   :  { %v4716_v53 = vmul.f32 %v10393_v40, %v10385_v47  ;;  %5361 = vadd.xlane.f32.xlu0 %v5360_v13  ;;  %v5325_v47 = vmul.f32 0.125, %v5316_v18  ;;  %v10052_v18 = vld [vmem:[#allocation11 + $0x60] ss:$8 sps:$4 sm:$0xff]  }
0x1489   :  { %5683 = vrot.lane.b32.xlu1 %v11750_v57, %s10683_s10  ;;  %v5323_v57 = vmul.f32 0.125, %v11838_v1  ;;  %v10051_v1 = vld [vmem:[#allocation11 + $0x54] ss:$8 sps:$4 sm:$0xff]  }
0x148a   :  { %v4720_v0 = vpack.c.bf16 %v4716_v53, %v4716_v53 }
0x148c   :  { %9512 = vmatmul.mubr.msk.bf16.vlgmr.msra.gmra.mrb[116].mxu0 %vm1122_vm2, %v4720_v0 }
0x148d   :  { %5735 = vrot.lane.b32.xlu1 %v11760_v26, %s10683_s10  ;;  %5006 = vmatprep.mubr.bf16.mxu0 %v10684_v55  ;;  %v11877_v26 = vadd.f32 %v5323_v57, %v11629_v63 }
0x1491   :  { %5732 = vrot.lane.b32.xlu1 %v11779_v11, %s10683_s10  ;;  %v5333_v11 = vsel %vm1122_vm2, %v11877_v26, -inf }
0x149e   :  { %5680 = vrot.lane.b32.xlu0 %v11764_v50, %s10683_s10  ;;  %v11882_v50 = vadd.f32 %v5325_v47, %v11616_v3  ;;  %v10055_v3 = vld [vmem:[#allocation11 + $0x70] ss:$8 sps:$4 sm:$0xff]  }
0x14a2   :  { %5787 = vrot.lane.b32.xlu0 %v11775_v42, %s10683_s10  ;;  %v10046_v42 = vld [vmem:[#allocation11 + $0x40] ss:$8 sps:$4 sm:$0xff]  }
0x14a6   :  { %5784 = vrot.lane.b32.xlu0 %v11794_v56, %s10683_s10  ;;  %v10048_v56 = vld [vmem:[#allocation11 + $0x44] ss:$8 sps:$4 sm:$0xff]  }
0x14a7   :  { %4974 = vmatprep.subr.bf16.mxu0 %v10048_v56 }
0x14a8   :  { %4975 = vmatpush1.bf16.msra.mxu0 %v10046_v42 }
0x14a9   :  { %4976 = vmatprep.subr.bf16.mxu0 %v10051_v1  ;;  %v10058_v1 = vld [vmem:[#allocation11] ss:$8 sps:$4 sm:$0xff]  }
0x14aa   :  { %5839 = vrot.lane.b32.xlu0 %v11790_v51, %s10683_s10  ;;  %v5339_v51 = vsel %vm1122_vm2, %v11882_v50, -inf }
0x14ac   :  { %4977 = vmatpush1.bf16.msra.mxu0 %v10049_v48 }
0x14ad   :  { %4978 = vmatprep.subr.bf16.mxu0 %v10054_v21  ;;  %v10063_v21 = vld [vmem:[#allocation11 + $0x14] ss:$8 sps:$4 sm:$0xff]  }
0x14b0   :  { %4979 = vmatpush1.bf16.msra.mxu0 %v10052_v18 }
0x14b1   :  { %4980 = vmatprep.subr.bf16.mxu0 %v10057_v5 }
0x14b4   :  { %4981 = vmatpush1.bf16.msra.mxu0 %v10055_v3 }
0x14b5   :  { %5334 = vmax.xlane.f32.xlu1 %v5333_v11 }
0x14c6   :  { %5836 = vrot.lane.b32.xlu1 %v11809_v22, %s10683_s10  ;;  %v10060_v22 = vld [vmem:[#allocation11 + $0x4] ss:$8 sps:$4 sm:$0xff]  }
0x14c7   :  { %5073 = vmatprep.subr.bf16.mxu0 %v10060_v22  ;;  %v10061_v22 = vld [vmem:[#allocation11 + $0x10] ss:$8 sps:$4 sm:$0xff]  }
0x14c9   :  { %5340 = vmax.xlane.f32.xlu0 %v5339_v51 }
0x1505   :  { %v5356_v46 = vpop.xlane.xlu1 %5355 }
0x1506   :  { %10394 = vrcp.f32 %v5356_v46  ;;  %v10066_v46 = vld [vmem:[#allocation11 + $0x24] ss:$8 sps:$4 sm:$0xff]  }
0x1509   :  { %v5684_v32 = vpop.permute.xlu1 %5683 }
0x150d   :  { %v5736_v33 = vpop.permute.xlu1 %5735 }
0x150e   :  { %v5741_v62 = vsel %vm929_vm1, %v5736_v33, 0  ;;  %v11955_v33 = vpack.c.bf16 %v11652_v58, %v11652_v58 }
0x1510   :  { %v10395_v60 = vpop.eup %10394  ;;  %v5520_v52 = vsel %vm1174_vm3, %v11955_v33, 0 }
0x1511   :  { %v5370_v28 = vmul.f32 %v10395_v60, %v11848_v49  ;;  %v5689_v49 = vsel %vm929_vm1, %v5684_v32, 0  ;;  %v5733_v2 = vpop.permute.xlu1 %5732  ;;  %v10064_v60 = vld [vmem:[#allocation11 + $0x20] ss:$8 sps:$4 sm:$0xff]   ;;  %v11933_v32 = vpack.c.bf16 %v11645_v38, %v11645_v38 }
0x1513   :  { %v5374_v44 = vpack.c.bf16 %v5370_v28, %v5370_v28 }
0x1515   :  { %9548 = vmatmul.mubr.msk.bf16.vlgmr.msra.gmra.mrb[144].mxu1 %vm1122_vm2, %v5374_v44  ;;  %v5362_v27 = vpop.xlane.xlu0 %5361  ;;  %v10069_v44 = vld [vmem:[#allocation11 + $0x34] ss:$8 sps:$4 sm:$0xff]  }
0x1516   :  { %9558 = vmatpush3.bf16.msra.mxu1 %v5474_v23  ;;  %10396 = vrcp.f32 %v5362_v27  ;;  %9559 = vmatprep.mubr.msk.bf16.mxu1 %vm10682_vm0, %v10681_v12 }
0x1517   :  { %9569 = vmatprep.subr.bf16.mxu1 %v10681_v12 }
0x1519   :  { %v5681_v10 = vpop.permute.xlu0 %5680 }
0x151d   :  { %v5788_v35 = vpop.permute.xlu0 %5787 }
0x151e   :  { %v5793_v14 = vsel %vm929_vm1, %v5788_v35, 0 }
0x1520   :  { %v10397_v41 = vpop.eup %10396 }
0x1521   :  { %v5372_v15 = vmul.f32 %v10397_v41, %v10391_v45  ;;  %v5785_v24 = vpop.permute.xlu0 %5784  ;;  %v10067_v41 = vld [vmem:[#allocation11 + $0x30] ss:$8 sps:$4 sm:$0xff]  }
0x1523   :  { %v5376_v6 = vpack.c.bf16 %v5372_v15, %v5372_v15 }
0x1525   :  { %9560 = vmatmul.mubr.msk.bf16.vlgmr.msra.gmra.mrb[148].mxu1 %vm1122_vm2, %v5376_v6  ;;  %v5840_v45 = vpop.permute.xlu0 %5839 }
0x1526   :  { %9570 = vmatpush3.bf16.xpose.msra.mxu1 %v5689_v49  ;;  %9571 = vmatprep.mubr.msk.bf16.mxu1 %vm10682_vm0, %v10681_v12  ;;  %v5845_v40 = vsel %vm929_vm1, %v5840_v45, 0 }
0x1527   :  { %9575 = vmatprep.subr.bf16.mxu1 %v10681_v12 }
0x152d   :  { %9572 = vmatmul.mubr.msk.bf16.vlgmr.msra.gmra.mrb[152].mxu1 %vm929_vm1, %v5681_v10 }
0x152e   :  { %9576 = vmatpush3.bf16.xpose.msra.mxu1 %v5741_v62  ;;  %9577 = vmatprep.mubr.msk.bf16.mxu1 %vm10682_vm0, %v10681_v12 }
0x152f   :  { %9581 = vmatprep.subr.bf16.mxu1 %v10681_v12 }
0x1535   :  { %9578 = vmatmul.mubr.msk.bf16.vlgmr.msra.gmra.mrb[156].mxu1 %vm929_vm1, %v5733_v2 }
0x1536   :  { %9582 = vmatpush3.bf16.xpose.msra.mxu1 %v5793_v14  ;;  %9583 = vmatprep.mubr.msk.bf16.mxu1 %vm10682_vm0, %v10681_v12 }
0x1537   :  { %9587 = vmatprep.subr.bf16.mxu1 %v10681_v12 }
0x153d   :  { %9584 = vmatmul.mubr.msk.bf16.vlgmr.msra.gmra.mrb[160].mxu1 %vm929_vm1, %v5785_v24 }
0x153e   :  { %9588 = vmatpush3.bf16.xpose.msra.mxu1 %v5845_v40  ;;  %9589 = vmatprep.mubr.msk.bf16.mxu1 %vm10682_vm0, %v10681_v12 }
0x153f   :  { %9599 = vmatprep.subr.bf16.mxu1 %v10681_v12 }
0x1542   :  { %v5335_v13 = vpop.xlane.xlu1 %5334 }
0x1543   :  { %v5343_v53 = vsub.f32 %v11877_v26, %v5335_v13 }
0x1545   :  { %v5348_v0 = vmul.f32 1.442695, %v5343_v53 }
0x1546   :  { %v5837_v57 = vpop.permute.xlu1 %5836 }
0x1547   :  { %10398 = vpow2.f32 %v5348_v0  ;;  %9590 = vmatmul.mubr.msk.bf16.vlgmr.msra.gmra.mrb[164].mxu1 %vm929_vm1, %v5837_v57 }
0x1548   :  { %9601 = vmatprep.mubr.msk.bf16.mxu1 %vm10682_vm0, %v10681_v12 }
0x1551   :  { %v10399_v11 = vpop.eup %10398 }
0x1552   :  { %v5357_v47 = vsel %vm1122_vm2, %v10399_v11, 0.0 }
0x1553   :  { %5358 = vadd.xlane.f32.xlu0 %v5357_v47 }
0x1556   :  { %v5341_v42 = vpop.xlane.xlu0 %5340 }
0x1557   :  { %v5345_v56 = vsub.f32 %v11882_v50, %v5341_v42  ;;  %v4765_v51 = vpop.f32.mrb[112].mxu0 }
0x1558   :  { %v4918_v48 = vpack.c.bf16 %v11832_v54, %v4765_v51  ;;  %v9501_v26 = vpop.f32.mrb[113].mxu0 }
0x1559   :  { %v5352_v18 = vmul.f32 1.442695, %v5345_v56  ;;  %v4768_v3 = vpop.f32.mrb[114].mxu0 }
0x155a   :  { %v9502_v5 = vpop.f32.mrb[115].mxu0  ;;  %8801 = vmatmul.mubr.msk.bf16.vlgmr.msra.gmra.mrb[120].mxu0 %vm929_vm1, %v4918_v48 }
0x155b   :  { %10400 = vpow2.f32 %v5352_v18  ;;  %5074 = vmatpush1.bf16.msra.mxu0 %v10058_v1  ;;  %5016 = vmatprep.mubr.bf16.mxu0 %v10684_v55 }
0x155c   :  { %5075 = vmatprep.subr.bf16.mxu0 %v10063_v21 }
0x155f   :  { %5076 = vmatpush1.bf16.msra.mxu0 %v10061_v22  ;;  %v4863_v50 = vpop.f32.mrb[116].mxu0 }
0x1560   :  { %v4919_v28 = vpack.c.bf16 %v11834_v37, %v4863_v50  ;;  %v9513_v54 = vpop.f32.mrb[117].mxu0  ;;  %5077 = vmatprep.subr.bf16.mxu0 %v10066_v46  ;;  %v5428_v37 = vsel %vm1174_vm3, %v11933_v32, 0 }
0x1561   :  { %v4866_v23 = vpop.f32.mrb[118].mxu0 }
0x1562   :  { %v9514_v27 = vpop.f32.mrb[119].mxu0  ;;  %8802 = vmatmul.mubr.msk.bf16.gmra.mrb[124].mxu0 %vm929_vm1, %v4919_v28 }
0x1563   :  { %5078 = vmatpush1.bf16.msra.mxu0 %v10064_v60  ;;  %5105 = vmatprep.mubr.bf16.mxu0 %v10684_v55 }
0x1564   :  { %5079 = vmatprep.subr.bf16.mxu0 %v10069_v44 }
0x1565   :  { %v10401_v15 = vpop.eup %10400 }
0x1566   :  { %v5363_v6 = vsel %vm1122_vm2, %v10401_v15, 0.0 }
0x1567   :  { %5080 = vmatpush1.bf16.msra.mxu0 %v10067_v41  ;;  %5364 = vadd.xlane.f32.xlu0 %v5363_v6  ;;  %v10072_v6 = vld [vmem:[#allocation11 + $0x84] ss:$8 sps:$4 sm:$0xff]  }
0x1568   :  { %9551 = vmatprep.subr.bf16.mxu0 %v10681_v12 }
0x156a   :  { %8811 = vmatmul.mubr.msk.bf16.vlgmr.msra.gmra.mrb[120].mxu0 %vm929_vm1, %v4448_v34 }
0x156b   :  { %9552 = vmatpush3.bf16.msra.mxu0 %v5428_v37  ;;  %5115 = vmatprep.mubr.bf16.mxu0 %v10684_v55  ;;  %v10075_v37 = vld [vmem:[#allocation11 + $0x94] ss:$8 sps:$4 sm:$0xff]  }
0x156c   :  { %9563 = vmatprep.subr.bf16.mxu0 %v10681_v12 }
0x1572   :  { %8812 = vmatmul.mubr.msk.bf16.gmra.mrb[124].mxu0 %vm929_vm1, %v4449_v59 }
0x1573   :  { %9553 = vmatprep.mubr.msk.bf16.mxu0 %vm10682_vm0, %v10681_v12 }
0x15e0   :  { %v5359_v38 = vpop.xlane.xlu0 %5358 }
0x15e1   :  { %10402 = vrcp.f32 %v5359_v38  ;;  %v10073_v38 = vld [vmem:[#allocation11 + $0x90] ss:$8 sps:$4 sm:$0xff]  }
0x15e8   :  { %v11951_v49 = vpop.f32.mrb[144].mxu1 }
0x15e9   :  { %v9549_v31 = vpop.f32.mrb[145].mxu1 }
0x15ea   :  { %v5421_v36 = vpop.f32.mrb[146].mxu1  ;;  %v10076_v31 = vld [vmem:[#allocation11 + $0xa0] ss:$8 sps:$4 sm:$0xff]  }
0x15eb   :  { %v10403_v34 = vpop.eup %10402  ;;  %v9550_v10 = vpop.f32.mrb[147].mxu1  ;;  %v10078_v36 = vld [vmem:[#allocation11 + $0xa4] ss:$8 sps:$4 sm:$0xff]  }
0x15ec   :  { %v5371_v62 = vmul.f32 %v10403_v34, %v10399_v11  ;;  %v10079_v34 = vld [vmem:[#allocation11 + $0xb0] ss:$8 sps:$4 sm:$0xff]   ;;  %v10081_v10 = vld [vmem:[#allocation11 + $0xb4] ss:$8 sps:$4 sm:$0xff]  }
0x15ee   :  { %v5375_v35 = vpack.c.bf16 %v5371_v62, %v5371_v62 }
0x15f0   :  { %9554 = vmatmul.mubr.msk.bf16.vlgmr.msra.gmra.mrb[128].mxu0 %vm1122_vm2, %v5375_v35 }
0x15f1   :  { %9564 = vmatpush3.bf16.msra.mxu0 %v5520_v52  ;;  %9565 = vmatprep.mubr.msk.bf16.mxu0 %vm10682_vm0, %v10681_v12 }
0x15f2   :  { %5618 = vmatprep.subr.bf16.mxu0 %v10072_v6 }
0x15f4   :  { %v5365_v39 = vpop.xlane.xlu0 %5364 }
0x15f5   :  { %10404 = vrcp.f32 %v5365_v39 }
0x15f8   :  { %v11962_v59 = vpop.f32.mrb[148].mxu1 }
0x15f9   :  { %v9561_v2 = vpop.f32.mrb[149].mxu1 }
0x15fa   :  { %v5513_v24 = vpop.f32.mrb[150].mxu1 }
0x15fb   :  { %v9562_v14 = vpop.f32.mrb[151].mxu1 }
0x15ff   :  { %v10405_v58 = vpop.eup %10404 }
0x1600   :  { %v5373_v45 = vmul.f32 %v10405_v58, %v10401_v15  ;;  %v5725_v40 = vpop.f32.mrb[152].mxu1  ;;  %v10070_v15 = vld [vmem:[#allocation11 + $0x80] ss:$8 sps:$4 sm:$0xff]  }
0x1601   :  { %v5887_v13 = vmul.f32 0.125, %v5725_v40  ;;  %v9573_v53 = vpop.f32.mrb[153].mxu1 }
0x1602   :  { %v5728_v0 = vpop.f32.mrb[154].mxu1  ;;  %v5377_v57 = vpack.c.bf16 %v5373_v45, %v5373_v45 }
0x1603   :  { %v5891_v11 = vadd.f32 %v5887_v13, %v11664_v8  ;;  %v9574_v47 = vpop.f32.mrb[155].mxu1 }
0x1604   :  { %9566 = vmatmul.mubr.msk.bf16.vlgmr.msra.gmra.mrb[132].mxu0 %vm1122_vm2, %v5377_v57 }
0x1605   :  { %v5895_v42 = vsel %vm1122_vm2, %v5891_v11, -inf  ;;  %5650 = vmatprep.mubr.bf16.mxu0 %v10684_v55  ;;  %5619 = vmatpush1.bf16.msra.mxu0 %v10070_v15 }
0x1606   :  { %5896 = vmax.xlane.f32.xlu0 %v5895_v42  ;;  %5620 = vmatprep.subr.bf16.mxu0 %v10075_v37 }
0x1608   :  { %v5777_v56 = vpop.f32.mrb[156].mxu1 }
0x1609   :  { %v5888_v51 = vmul.f32 0.125, %v5777_v56  ;;  %v9579_v1 = vpop.f32.mrb[157].mxu1  ;;  %5621 = vmatpush1.bf16.msra.mxu0 %v10073_v38 }
0x160a   :  { %v5780_v48 = vpop.f32.mrb[158].mxu1  ;;  %5622 = vmatprep.subr.bf16.mxu0 %v10078_v36 }
0x160b   :  { %v9580_v26 = vpop.f32.mrb[159].mxu1  ;;  %v5892_v21 = vadd.f32 %v5888_v51, %v11629_v63  ;;  %v10450_v63 = vld [vmem:[%s12250_s1 + $0x18] sm:$0xff] }
0x160d   :  { %v5898_v18 = vsel %vm1122_vm2, %v5892_v21, -inf  ;;  %5623 = vmatpush1.bf16.msra.mxu0 %v10076_v31  ;;  %v10084_v31 = vld [vmem:[#allocation11 + $0xc4] ss:$8 sps:$4 sm:$0xff]  }
0x160e   :  { %5899 = vmax.xlane.f32.xlu1 %v5898_v18  ;;  %5624 = vmatprep.subr.bf16.mxu0 %v10081_v10 }
0x1610   :  { %v5829_v3 = vpop.f32.mrb[160].mxu1 }
0x1611   :  { %v5889_v8 = vmul.f32 0.125, %v5829_v3  ;;  %v9585_v5 = vpop.f32.mrb[161].mxu1  ;;  %5625 = vmatpush1.bf16.msra.mxu0 %v10079_v34 }
0x1612   :  { %v5832_v22 = vpop.f32.mrb[162].mxu1  ;;  %9593 = vmatprep.subr.bf16.mxu0 %v10681_v12 }
0x1613   :  { %v11971_v46 = vadd.f32 %v5889_v8, %v11670_v25  ;;  %v9586_v50 = vpop.f32.mrb[163].mxu1 }
0x1615   :  { %v5901_v60 = vsel %vm1122_vm2, %v11971_v46, -inf }
0x1616   :  { %5902 = vmax.xlane.f32.xlu0 %v5901_v60 }
0x161a   :  { %v5881_v28 = vpop.f32.mrb[164].mxu1 }
0x161b   :  { %v5890_v54 = vmul.f32 0.125, %v5881_v28  ;;  %v9591_v44 = vpop.f32.mrb[165].mxu1 }
0x161c   :  { %v5884_v23 = vpop.f32.mrb[166].mxu1 }
0x161d   :  { %v5894_v27 = vadd.f32 %v10450_v63, %v5890_v54  ;;  %v9592_v41 = vpop.f32.mrb[167].mxu1 }
0x161f   :  { %5993 = vrot.lane.b32.xlu1 %v11933_v32, %s10683_s10  ;;  %v5904_v25 = vsel %vm1122_vm2, %v5894_v27, -inf }
0x1620   :  { %5905 = vmax.xlane.f32.xlu0 %v5904_v25 }
0x1693   :  { %v5897_v32 = vpop.xlane.xlu0 %5896 }
0x1694   :  { %v5907_v62 = vsub.f32 %v5891_v11, %v5897_v32  ;;  %v10082_v32 = vld [vmem:[#allocation11 + $0xc0] ss:$8 sps:$4 sm:$0xff]  }
0x1696   :  { %v5911_v35 = vmul.f32 1.442695, %v5907_v62 }
0x1698   :  { %10406 = vpow2.f32 %v5911_v35  ;;  %v10087_v35 = vld [vmem:[#allocation11 + $0xd4] ss:$8 sps:$4 sm:$0xff]  }
0x169b   :  { %v5900_v52 = vpop.xlane.xlu1 %5899 }
0x169c   :  { %v5908_v39 = vsub.f32 %v5892_v21, %v5900_v52  ;;  %v10085_v52 = vld [vmem:[#allocation11 + $0xd0] ss:$8 sps:$4 sm:$0xff]  }
0x169e   :  { %v5913_v2 = vmul.f32 1.442695, %v5908_v39  ;;  %v10088_v39 = vld [vmem:[#allocation11 + $0xe0] ss:$8 sps:$4 sm:$0xff]  }
0x169f   :  { %v5994_v24 = vpop.permute.xlu1 %5993 }
0x16a0   :  { %10408 = vpow2.f32 %v5913_v2  ;;  %v5999_v14 = vsel %vm1174_vm3, %v5994_v24, 0  ;;  %v10090_v2 = vld [vmem:[#allocation11 + $0xe4] ss:$8 sps:$4 sm:$0xff]   ;;  %v10093_v24 = vld [vmem:[#allocation11 + $0xf4] ss:$8 sps:$4 sm:$0xff]  }
0x16a1   :  { %9600 = vmatpush3.bf16.msra.mxu1 %v5999_v14  ;;  %v10091_v14 = vld [vmem:[#allocation11 + $0xf0] ss:$8 sps:$4 sm:$0xff]  }
0x16a2   :  { %v10407_v58 = vpop.eup %10406  ;;  %9611 = vmatprep.subr.bf16.mxu1 %v10681_v12 }
0x16a3   :  { %v5919_v45 = vsel %vm1122_vm2, %v10407_v58, 0.0  ;;  %v5903_v40 = vpop.xlane.xlu0 %5902 }
0x16a4   :  { %5920 = vadd.xlane.f32.xlu0 %v5919_v45  ;;  %v5909_v21 = vsub.f32 %v11971_v46, %v5903_v40 }
0x16a6   :  { %v5915_v18 = vmul.f32 1.442695, %v5909_v21 }
0x16aa   :  { %v10409_v13 = vpop.eup %10408 }
0x16ab   :  { %v5922_v53 = vsel %vm1122_vm2, %v10409_v13, 0.0 }
0x16ac   :  { %5923 = vadd.xlane.f32.xlu0 %v5922_v53 }
0x16ad   :  { %v5906_v0 = vpop.xlane.xlu0 %5905 }
0x16ae   :  { %v5910_v57 = vsub.f32 %v5894_v27, %v5906_v0 }
0x16b0   :  { %v5917_v11 = vmul.f32 1.442695, %v5910_v57 }
0x16b2   :  { %10410 = vpow2.f32 %v5917_v11 }
0x16b3   :  { %10412 = vpow2.f32 %v5915_v18 }
0x16bc   :  { %v10411_v47 = vpop.eup %10410 }
0x16bd   :  { %v5928_v42 = vsel %vm1122_vm2, %v10411_v47, 0.0  ;;  %v10413_v22 = vpop.eup %10412 }
0x16be   :  { %5929 = vadd.xlane.f32.xlu1 %v5928_v42  ;;  %v5925_v50 = vsel %vm1122_vm2, %v10413_v22, 0.0 }
0x16c2   :  { %5944 = vrot.lane.b32.xlu0 %v11805_v30, %s10683_s10 }
0x16c3   :  { %v5464_v56 = vpop.f32.mrb[128].mxu0 }
0x16c4   :  { %v5562_v51 = vpack.c.bf16 %v5464_v56, %v11951_v49  ;;  %v9555_v1 = vpop.f32.mrb[129].mxu0 }
0x16c5   :  { %v5467_v48 = vpop.f32.mrb[130].mxu0 }
0x16c6   :  { %v9556_v26 = vpop.f32.mrb[131].mxu0  ;;  %8829 = vmatmul.mubr.msk.bf16.vlgmr.msra.gmra.mrb[120].mxu0 %vm929_vm1, %v5562_v51 }
0x16c7   :  { %5660 = vmatprep.mubr.bf16.mxu0 %v10684_v55 }
0x16cf   :  { %6091 = vrot.lane.b32.xlu1 %v11955_v33, %s10683_s10 }
0x16d7   :  { %v5556_v3 = vpop.f32.mrb[132].mxu0 }
0x16d8   :  { %v5563_v30 = vpack.c.bf16 %v5556_v3, %v11962_v59  ;;  %v9567_v8 = vpop.f32.mrb[133].mxu0 }
0x16d9   :  { %v5559_v5 = vpop.f32.mrb[134].mxu0 }
0x16da   :  { %v9568_v49 = vpop.f32.mrb[135].mxu0  ;;  %8830 = vmatmul.mubr.msk.bf16.gmra.mrb[124].mxu0 %vm929_vm1, %v5563_v30 }
0x16db   :  { %9595 = vmatprep.mubr.msk.bf16.mxu0 %vm10682_vm0, %v10681_v12 }
0x16e1   :  { %5926 = vadd.xlane.f32.xlu0 %v5925_v50 }
0x16f7   :  { %6042 = vrot.lane.b32.xlu0 %v11890_v61, %s10683_s10 }
0x1731   :  { %v5921_v33 = vpop.xlane.xlu0 %5920 }
0x1732   :  { %10414 = vrcp.f32 %v5921_v33 }
0x1739   :  { %v5924_v46 = vpop.xlane.xlu0 %5923 }
0x173a   :  { %10416 = vrcp.f32 %v5924_v46 }
0x173c   :  { %v10415_v59 = vpop.eup %10414 }
0x173d   :  { %v5935_v60 = vmul.f32 %v10415_v59, %v10407_v58  ;;  %v5945_v28 = vpop.permute.xlu0 %5944 }
0x173e   :  { %v5950_v54 = vsel %vm1174_vm3, %v5945_v28, 0 }
0x173f   :  { %v5939_v44 = vpack.c.bf16 %v5935_v60, %v5935_v60  ;;  %9594 = vmatpush3.bf16.msra.mxu0 %v5950_v54  ;;  %v6364_v54 = vld [vmem:[#allocation13] sm:$0xff] }
0x1740   :  { %9605 = vmatprep.subr.bf16.mxu0 %v10681_v12 }
0x1742   :  { %9596 = vmatmul.mubr.msk.bf16.vlgmr.msra.gmra.mrb[136].mxu0 %vm1122_vm2, %v5939_v44  ;;  %v6368_v44 = vld [vmem:[#allocation13 + $0x20] sm:$0xff] }
0x1743   :  { %9607 = vmatprep.mubr.msk.bf16.mxu0 %vm10682_vm0, %v10681_v12 }
0x1744   :  { %v10417_v23 = vpop.eup %10416 }
0x1745   :  { %v5936_v61 = vmul.f32 %v10417_v23, %v10409_v13  ;;  %v6365_v23 = vld [vmem:[#allocation13 + $0x8] sm:$0xff] }
0x1747   :  { %v5940_v63 = vpack.c.bf16 %v5936_v61, %v5936_v61  ;;  %v8849_v61 = vcombine.low %v6364_v54, %v6368_v44 }
0x1749   :  { %9602 = vmatmul.mubr.msk.bf16.vlgmr.msra.gmra.mrb[168].mxu1 %vm1122_vm2, %v5940_v63  ;;  %v8850_v63 = vcombine.high %v6364_v54, %v6368_v44  ;;  %v6416_v54 = vld [vmem:[#allocation13 + $0x1a0] sm:$0xff]  ;;  %v6413_v44 = vld [vmem:[#allocation13 + $0x188] sm:$0xff] }
0x174a   :  { %9613 = vmatprep.mubr.msk.bf16.mxu1 %vm10682_vm0, %v10681_v12 }
0x174b   :  { %v5930_v27 = vpop.xlane.xlu1 %5929 }
0x174c   :  { %10418 = vrcp.f32 %v5930_v27  ;;  %v6369_v27 = vld [vmem:[#allocation13 + $0x28] sm:$0xff] }
0x174f   :  { %v6092_v41 = vpop.permute.xlu1 %6091 }
0x1750   :  { %v6097_v25 = vsel %vm1174_vm3, %v6092_v41, 0  ;;  %v6372_v41 = vld [vmem:[#allocation13 + $0x40] sm:$0xff] }
0x1751   :  { %9612 = vmatpush3.bf16.msra.mxu1 %v6097_v25  ;;  %v6376_v25 = vld [vmem:[#allocation13 + $0x60] sm:$0xff] }
0x1752   :  { %7132 = vmatprep.subr.bf16.mxu1 %v8850_v63 }
0x1756   :  { %v10419_v15 = vpop.eup %10418 }
0x1757   :  { %v5938_v6 = vmul.f32 %v10419_v15, %v10411_v47  ;;  %v8851_v15 = vcombine.low %v6365_v23, %v6369_v27 }
0x1759   :  { %v5942_v37 = vpack.c.bf16 %v5938_v6, %v5938_v6  ;;  %v8852_v6 = vcombine.high %v6365_v23, %v6369_v27  ;;  %v6417_v23 = vld [vmem:[#allocation13 + $0x1a8] sm:$0xff] }
0x175b   :  { %9614 = vmatmul.mubr.msk.bf16.vlgmr.msra.gmra.mrb[172].mxu1 %vm1122_vm2, %v5942_v37  ;;  %v8858_v37 = vcombine.high %v6372_v41, %v6376_v25 }
0x175c   :  { %7133 = vmatpush1.bf16.msra.mxu1 %v8849_v61 }
0x175d   :  { %7134 = vmatprep.subr.bf16.mxu1 %v8858_v37  ;;  %v6425_v37 = vld [vmem:[#allocation13 + $0x1e8] sm:$0xff] }
0x176e   :  { %v5927_v38 = vpop.xlane.xlu0 %5926 }
0x176f   :  { %10420 = vrcp.f32 %v5927_v38  ;;  %v6373_v38 = vld [vmem:[#allocation13 + $0x48] sm:$0xff] }
0x1772   :  { %v6043_v36 = vpop.permute.xlu0 %6042 }
0x1773   :  { %v6048_v34 = vsel %vm1174_vm3, %v6043_v36, 0  ;;  %v6380_v36 = vld [vmem:[#allocation13 + $0x80] sm:$0xff] }
0x1774   :  { %9606 = vmatpush3.bf16.msra.mxu0 %v6048_v34 }
0x1775   :  { %6195 = vmatprep.subr.bf16.mxu0 %v10084_v31  ;;  %v6377_v31 = vld [vmem:[#allocation13 + $0x68] sm:$0xff] }
0x1776   :  { %v8860_v34 = vcombine.high %v6373_v38, %v6377_v31 }
0x1779   :  { %v10421_v12 = vpop.eup %10420 }
0x177a   :  { %v5937_v10 = vmul.f32 %v10421_v12, %v10413_v22  ;;  %v6384_v12 = vld [vmem:[#allocation13 + $0xa0] sm:$0xff] }
0x177c   :  { %v5941_v62 = vpack.c.bf16 %v5937_v10, %v5937_v10  ;;  %v6381_v10 = vld [vmem:[#allocation13 + $0x88] sm:$0xff] }
0x177e   :  { %9608 = vmatmul.mubr.msk.bf16.vlgmr.msra.gmra.mrb[140].mxu0 %vm1122_vm2, %v5941_v62  ;;  %v8857_v62 = vcombine.low %v6372_v41, %v6376_v25  ;;  %v8900_v41 = vcombine.high %v6413_v44, %v6417_v23  ;;  %v6420_v25 = vld [vmem:[#allocation13 + $0x1c0] sm:$0xff] }
0x177f   :  { %6196 = vmatpush1.bf16.msra.mxu0 %v10082_v32  ;;  %6227 = vmatprep.mubr.bf16.mxu0 %v10684_v55  ;;  %v6385_v32 = vld [vmem:[#allocation13 + $0xa8] sm:$0xff] }
0x1780   :  { %6197 = vmatprep.subr.bf16.mxu0 %v10087_v35  ;;  %v8859_v35 = vcombine.low %v6373_v38, %v6377_v31  ;;  %7135 = vmatpush1.bf16.msra.mxu1 %v8857_v62  ;;  %v8899_v31 = vcombine.low %v6413_v44, %v6417_v23  ;;  %v6433_v62 = vld [vmem:[#allocation13 + $0x228] sm:$0xff] }
0x1783   :  { %6198 = vmatpush1.bf16.msra.mxu0 %v10085_v52  ;;  %v8866_v52 = vcombine.high %v6380_v36, %v6384_v12 }
0x1784   :  { %6199 = vmatprep.subr.bf16.mxu0 %v10090_v2  ;;  %v6388_v2 = vld [vmem:[#allocation13 + $0xc0] sm:$0xff] }
0x1785   :  { %7136 = vmatprep.subr.bf16.mxu1 %v8866_v52 }
0x1787   :  { %6200 = vmatpush1.bf16.msra.mxu0 %v10088_v39  ;;  %v8868_v39 = vcombine.high %v6381_v10, %v6385_v32 }
0x1788   :  { %6201 = vmatprep.subr.bf16.mxu0 %v10093_v24  ;;  %v6392_v24 = vld [vmem:[#allocation13 + $0xe0] sm:$0xff] }
0x178b   :  { %6202 = vmatpush1.bf16.msra.mxu0 %v10091_v14  ;;  %v6389_v14 = vld [vmem:[#allocation13 + $0xc8] sm:$0xff] }
0x178c   :  { %7185 = vmatprep.subr.bf16.mxu0 %v8852_v6  ;;  %v6421_v6 = vld [vmem:[#allocation13 + $0x1c8] sm:$0xff] }
0x178d   :  { %v8907_v52 = vcombine.low %v6421_v6, %v6425_v37 }
0x1815   :  { %v5986_v58 = vpop.f32.mrb[136].mxu0 }
0x1816   :  { %v9597_v45 = vpop.f32.mrb[137].mxu0 }
0x1817   :  { %v5989_v40 = vpop.f32.mrb[138].mxu0  ;;  %v8865_v45 = vcombine.low %v6380_v36, %v6384_v12  ;;  %v6428_v12 = vld [vmem:[#allocation13 + $0x200] sm:$0xff] }
0x1818   :  { %v9598_v13 = vpop.f32.mrb[139].mxu0  ;;  %v8867_v40 = vcombine.low %v6381_v10, %v6385_v32  ;;  %v6432_v10 = vld [vmem:[#allocation13 + $0x220] sm:$0xff]  ;;  %v6429_v32 = vld [vmem:[#allocation13 + $0x208] sm:$0xff] }
0x1819   :  { %v8874_v13 = vcombine.high %v6388_v2, %v6392_v24  ;;  %7137 = vmatpush1.bf16.msra.mxu1 %v8865_v45 }
0x181b   :  { %7138 = vmatprep.subr.bf16.mxu1 %v8874_v13 }
0x181c   :  { %v6035_v53 = vpop.f32.mrb[168].mxu1 }
0x181d   :  { %v6139_v0 = vpack.c.bf16 %v6035_v53, %v5986_v58  ;;  %v9603_v57 = vpop.f32.mrb[169].mxu1  ;;  %v6393_v58 = vld [vmem:[#allocation13 + $0xe8] sm:$0xff] }
0x181e   :  { %v6038_v11 = vpop.f32.mrb[170].mxu1  ;;  %v8876_v53 = vcombine.high %v6389_v14, %v6393_v58  ;;  %v6400_v57 = vld [vmem:[#allocation13 + $0x120] sm:$0xff] }
0x181f   :  { %v9604_v47 = vpop.f32.mrb[171].mxu1  ;;  %8847 = vmatmul.mubr.msk.bf16.vlgmr.msra.gmra.mrb[120].mxu0 %vm929_vm1, %v6139_v0  ;;  %v6396_v0 = vld [vmem:[#allocation13 + $0x100] sm:$0xff]  ;;  %v6397_v11 = vld [vmem:[#allocation13 + $0x108] sm:$0xff] }
0x1820   :  { %6237 = vmatprep.mubr.bf16.mxu0 %v10684_v55  ;;  %7186 = vmatpush1.bf16.msra.mxu0 %v8851_v15  ;;  %v6401_v47 = vld [vmem:[#allocation13 + $0x128] sm:$0xff]  ;;  %v6424_v15 = vld [vmem:[#allocation13 + $0x1e0] sm:$0xff] }
0x1821   :  { %7187 = vmatprep.subr.bf16.mxu0 %v8860_v34  ;;  %v8906_v36 = vcombine.high %v6420_v25, %v6424_v15  ;;  %v8908_v34 = vcombine.high %v6421_v6, %v6425_v37 }
0x1824   :  { %7188 = vmatpush1.bf16.msra.mxu0 %v8859_v35  ;;  %v8905_v35 = vcombine.low %v6420_v25, %v6424_v15  ;;  %v6457_v15 = vld [vmem:[#allocation13 + $0x2e8] sm:$0xff] }
0x1825   :  { %7189 = vmatprep.subr.bf16.mxu0 %v8868_v39  ;;  %v8914_v39 = vcombine.high %v6428_v12, %v6432_v10 }
0x1828   :  { %7190 = vmatpush1.bf16.msra.mxu0 %v8867_v40 }
0x1829   :  { %7191 = vmatprep.subr.bf16.mxu0 %v8876_v53 }
0x182e   :  { %v6133_v42 = vpop.f32.mrb[172].mxu1 }
0x182f   :  { %v9615_v56 = vpop.f32.mrb[173].mxu1 }
0x1830   :  { %v6136_v51 = vpop.f32.mrb[174].mxu1  ;;  %v8875_v56 = vcombine.low %v6389_v14, %v6393_v58  ;;  %v8915_v14 = vcombine.low %v6429_v32, %v6433_v62 }
0x1831   :  { %v9616_v1 = vpop.f32.mrb[175].mxu1  ;;  %v8882_v51 = vcombine.high %v6396_v0, %v6400_v57 }
0x1832   :  { %v8884_v1 = vcombine.high %v6397_v11, %v6401_v47  ;;  %7192 = vmatpush1.bf16.msra.mxu0 %v8875_v56 }
0x1834   :  { %7193 = vmatprep.subr.bf16.mxu0 %v8884_v1  ;;  %v6436_v1 = vld [vmem:[#allocation13 + $0x240] sm:$0xff] }
0x1851   :  { %v6084_v48 = vpop.f32.mrb[140].mxu0 }
0x1852   :  { %v6140_v26 = vpack.c.bf16 %v6133_v42, %v6084_v48  ;;  %v9609_v21 = vpop.f32.mrb[141].mxu0  ;;  %v8873_v42 = vcombine.low %v6388_v2, %v6392_v24  ;;  %v6404_v48 = vld [vmem:[#allocation13 + $0x140] sm:$0xff]  ;;  %v8916_v2 = vcombine.high %v6429_v32, %v6433_v62  ;;  %v8913_v24 = vcombine.low %v6428_v12, %v6432_v10  ;;  %v6465_v10 = vld [vmem:[#allocation13 + $0x328] sm:$0xff] }
0x1853   :  { %v6087_v18 = vpop.f32.mrb[142].mxu0  ;;  %v6405_v21 = vld [vmem:[#allocation13 + $0x148] sm:$0xff] }
0x1854   :  { %v9610_v3 = vpop.f32.mrb[143].mxu0  ;;  %8848 = vmatmul.mubr.msk.bf16.gmra.mrb[124].mxu0 %vm929_vm1, %v6140_v26  ;;  %v6408_v26 = vld [vmem:[#allocation13 + $0x160] sm:$0xff]  ;;  %v6409_v18 = vld [vmem:[#allocation13 + $0x168] sm:$0xff]  ;;  %7139 = vmatpush1.bf16.msra.mxu1 %v8873_v42 }
0x1855   :  { %v8881_v3 = vcombine.low %v6396_v0, %v6400_v57  ;;  %7140 = vmatprep.subr.bf16.mxu1 %v8882_v51  ;;  %v8889_v61 = vcombine.low %v6404_v48, %v6408_v26  ;;  %v8891_v63 = vcombine.low %v6405_v21, %v6409_v18 }
0x1858   :  { %7141 = vmatpush1.bf16.msra.mxu1 %v8881_v3 }
0x18f2   :  { %v12018_v30 = vpop.f32.mrb[120].mxu0 }
0x18f3   :  { %v12020_v8 = vpop.f32.mrb[121].mxu0 }
0x18f4   :  { %v6256_v5 = vadd.f32 %v12020_v8, %v12018_v30  ;;  %v12024_v49 = vpop.f32.mrb[122].mxu0 }
0x18f5   :  { %v12026_v55 = vpop.f32.mrb[123].mxu0 }
0x18f6   :  { %v6259_v22 = vadd.f32 %v12026_v55, %v12024_v49  ;;  %6257 = vadd.xlane.f32.xlu0 %v6256_v5  ;;  %v8883_v5 = vcombine.low %v6397_v11, %v6401_v47 }
0x18f8   :  { %6260 = vadd.xlane.f32.xlu1 %v6259_v22  ;;  %v8890_v22 = vcombine.high %v6404_v48, %v6408_v26  ;;  %7194 = vmatpush1.bf16.msra.mxu0 %v8883_v5  ;;  %v6440_v48 = vld [vmem:[#allocation13 + $0x260] sm:$0xff]  ;;  %v6437_v26 = vld [vmem:[#allocation13 + $0x248] sm:$0xff] }
0x18fa   :  { %7142 = vmatprep.subr.bf16.mxu1 %v8890_v22  ;;  %v6448_v22 = vld [vmem:[#allocation13 + $0x2a0] sm:$0xff] }
0x18fb   :  { %7143 = vmatpush1.bf16.msra.mxu1 %v8889_v61 }
0x1927   :  { %v12030_v50 = vpop.f32.mrb[124].mxu0 }
0x1928   :  { %v12032_v33 = vpop.f32.mrb[125].mxu0 }
0x1929   :  { %v6262_v46 = vadd.f32 %v12032_v33, %v12030_v50  ;;  %v12036_v59 = vpop.f32.mrb[126].mxu0 }
0x192a   :  { %v12038_v60 = vpop.f32.mrb[127].mxu0 }
0x192b   :  { %v6265_v28 = vadd.f32 %v12038_v60, %v12036_v59  ;;  %6263 = vadd.xlane.f32.xlu0 %v6262_v46  ;;  %v8892_v46 = vcombine.high %v6405_v21, %v6409_v18  ;;  %v8922_v21 = vcombine.high %v6436_v1, %v6440_v48  ;;  %v6441_v18 = vld [vmem:[#allocation13 + $0x268] sm:$0xff] }
0x192c   :  { %v8923_v3 = vcombine.low %v6437_v26, %v6441_v18  ;;  %v8924_v5 = vcombine.high %v6437_v26, %v6441_v18  ;;  %v6485_v18 = vld [vmem:[#allocation13 + $0x3c8] sm:$0xff] }
0x192d   :  { %7195 = vmatprep.subr.bf16.mxu0 %v8892_v46  ;;  %v6445_v46 = vld [vmem:[#allocation13 + $0x288] sm:$0xff] }
0x192e   :  { %7196 = vmatpush1.bf16.msra.mxu0 %v8891_v63  ;;  %v6452_v63 = vld [vmem:[#allocation13 + $0x2c0] sm:$0xff] }
0x192f   :  { %6266 = vadd.xlane.f32.xlu0 %v6265_v28  ;;  %v6412_v28 = vld [vmem:[#allocation13 + $0x180] sm:$0xff]  ;;  %7197 = vmatprep.subr.bf16.mxu0 %v8900_v41  ;;  %v6453_v41 = vld [vmem:[#allocation13 + $0x2c8] sm:$0xff] }
0x1930   :  { %v8898_v27 = vcombine.high %v6412_v28, %v6416_v54  ;;  %v8897_v38 = vcombine.low %v6412_v28, %v6416_v54  ;;  %v6449_v54 = vld [vmem:[#allocation13 + $0x2a8] sm:$0xff]  ;;  %v8939_v37 = vcombine.low %v6453_v41, %v6457_v15 }
0x1931   :  { %v8931_v23 = vcombine.low %v6445_v46, %v6449_v54  ;;  %v8932_v61 = vcombine.high %v6445_v46, %v6449_v54  ;;  %v12064_v46 = vld [vmem:[#allocation13 + $0x30] sm:$0xff] }
0x1932   :  { %7144 = vmatprep.subr.bf16.mxu1 %v8898_v27  ;;  %7198 = vmatpush1.bf16.msra.mxu0 %v8899_v31  ;;  %v6456_v27 = vld [vmem:[#allocation13 + $0x2e0] sm:$0xff] }
0x1933   :  { %7145 = vmatpush1.bf16.msra.mxu1 %v8897_v38  ;;  %7199 = vmatprep.subr.bf16.mxu0 %v8908_v34  ;;  %v8938_v25 = vcombine.high %v6452_v63, %v6456_v27  ;;  %v8937_v6 = vcombine.low %v6452_v63, %v6456_v27  ;;  %v8940_v38 = vcombine.high %v6453_v41, %v6457_v15  ;;  %v6460_v31 = vld [vmem:[#allocation13 + $0x300] sm:$0xff]  ;;  %v6461_v34 = vld [vmem:[#allocation13 + $0x308] sm:$0xff] }
0x1934   :  { %7146 = vmatprep.subr.bf16.mxu1 %v8906_v36  ;;  %v6464_v36 = vld [vmem:[#allocation13 + $0x320] sm:$0xff]  ;;  %v8947_v62 = vcombine.low %v6461_v34, %v6465_v10 }
0x1935   :  { %v8946_v12 = vcombine.high %v6460_v31, %v6464_v36  ;;  %v8945_v32 = vcombine.low %v6460_v31, %v6464_v36 }
0x1936   :  { %7200 = vmatpush1.bf16.msra.mxu0 %v8907_v52  ;;  %v6468_v52 = vld [vmem:[#allocation13 + $0x340] sm:$0xff] }
0x1937   :  { %7147 = vmatpush1.bf16.msra.mxu1 %v8905_v35  ;;  %7201 = vmatprep.subr.bf16.mxu0 %v8916_v2  ;;  %v8948_v35 = vcombine.high %v6461_v34, %v6465_v10  ;;  %v6469_v2 = vld [vmem:[#allocation13 + $0x348] sm:$0xff] }
0x1938   :  { %7148 = vmatprep.subr.bf16.mxu1 %v8914_v39  ;;  %v6472_v39 = vld [vmem:[#allocation13 + $0x360] sm:$0xff] }
0x193a   :  { %7202 = vmatpush1.bf16.msra.mxu0 %v8915_v14  ;;  %v6473_v14 = vld [vmem:[#allocation13 + $0x368] sm:$0xff] }
0x193b   :  { %7149 = vmatpush1.bf16.msra.mxu1 %v8913_v24  ;;  %7203 = vmatprep.subr.bf16.mxu0 %v8924_v5  ;;  %v8954_v24 = vcombine.high %v6468_v52, %v6472_v39 }
0x193c   :  { %7150 = vmatprep.subr.bf16.mxu1 %v8922_v21 }
0x193e   :  { %7204 = vmatpush1.bf16.msra.mxu0 %v8923_v3 }
0x193f   :  { %7205 = vmatprep.subr.bf16.mxu0 %v8932_v61 }
0x1942   :  { %7206 = vmatpush1.bf16.msra.mxu0 %v8931_v23  ;;  %v12072_v23 = vld [vmem:[#allocation13 + $0x38] sm:$0xff] }
0x1943   :  { %7207 = vmatprep.subr.bf16.mxu0 %v8940_v38 }
0x1946   :  { %7208 = vmatpush1.bf16.msra.mxu0 %v8939_v37 }
0x1947   :  { %7209 = vmatprep.subr.bf16.mxu0 %v8948_v35 }
0x194a   :  { %7210 = vmatpush1.bf16.msra.mxu0 %v8947_v62 }
0x1983   :  { %v6258_v58 = vpop.xlane.xlu0 %6257 }
0x1984   :  { %v6268_v45 = vmul.f32 0.00390625, %v6258_v58  ;;  %v8953_v58 = vcombine.low %v6468_v52, %v6472_v39 }
0x1985   :  { %v6261_v40 = vpop.xlane.xlu1 %6260 }
0x1986   :  { %v12043_v13 = vsub.f32 %v12018_v30, %v6268_v45  ;;  %v12046_v53 = vsub.f32 %v12020_v8, %v6268_v45  ;;  %v6269_v0 = vmul.f32 0.00390625, %v6261_v40  ;;  %v8955_v45 = vcombine.low %v6469_v2, %v6473_v14 }
0x1987   :  { %v8956_v40 = vcombine.high %v6469_v2, %v6473_v14  ;;  %v10451_v2 = vld [vmem:[%s12260_s11 + $0x8] sm:$0x3f]  ;;  %v6338_v14 = vsub.s32 3, %v11444_v43 }
0x1988   :  { %v6280_v57 = vmul.f32 %v12043_v13, %v12043_v13  ;;  %v6281_v11 = vmul.f32 %v12046_v53, %v12046_v53  ;;  %v12053_v47 = vsub.f32 %v12024_v49, %v6269_v0  ;;  %v12056_v42 = vsub.f32 %v12026_v55, %v6269_v0  ;;  %v6444_v55 = vld [vmem:[#allocation13 + $0x280] sm:$0xff] }
0x1989   :  { %v8921_v49 = vcombine.low %v6436_v1, %v6440_v48  ;;  %v8930_v28 = vcombine.high %v6444_v55, %v6448_v22  ;;  %v8929_v44 = vcombine.low %v6444_v55, %v6448_v22  ;;  %v6476_v0 = vld [vmem:[#allocation13 + $0x380] sm:$0xff]  ;;  %7211 = vmatprep.subr.bf16.mxu0 %v8956_v40  ;;  %v12062_v22 = vld [vmem:[#allocation13 + $0x10] sm:$0xff] }
0x198a   :  { %v6282_v30 = vmul.f32 %v12053_v47, %v12053_v47  ;;  %v6283_v8 = vmul.f32 %v12056_v42, %v12056_v42  ;;  %v6288_v56 = vadd.f32 %v6281_v11, %v6280_v57  ;;  %v6480_v57 = vld [vmem:[#allocation13 + $0x3a0] sm:$0xff]  ;;  %v6477_v11 = vld [vmem:[#allocation13 + $0x388] sm:$0xff]  ;;  %7212 = vmatpush1.bf16.msra.mxu0 %v8955_v45  ;;  %v8853_v54 = vcombine.low %v12062_v22, %v12064_v46 }
0x198b   :  { %7151 = vmatpush1.bf16.msra.mxu1 %v8921_v49  ;;  %v6488_v1 = vld [vmem:[#allocation13 + $0x3e0] sm:$0xff]  ;;  %v6489_v49 = vld [vmem:[#allocation13 + $0x3e8] sm:$0xff] }
0x198c   :  { %6289 = vadd.xlane.f32.xlu0 %v6288_v56  ;;  %v6291_v51 = vadd.f32 %v6283_v8, %v6282_v30  ;;  %7152 = vmatprep.subr.bf16.mxu1 %v8930_v28  ;;  %v8961_v30 = vcombine.low %v6476_v0, %v6480_v57  ;;  %v8962_v8 = vcombine.high %v6476_v0, %v6480_v57  ;;  %v6481_v56 = vld [vmem:[#allocation13 + $0x3a8] sm:$0xff]  ;;  %v12066_v28 = vld [vmem:[#allocation13 + $0x18] sm:$0xff] }
0x198d   :  { %v8963_v48 = vcombine.low %v6477_v11, %v6481_v56  ;;  %v8964_v26 = vcombine.high %v6477_v11, %v6481_v56  ;;  %v8972_v3 = vcombine.high %v6485_v18, %v6489_v49  ;;  %v8971_v55 = vcombine.low %v6485_v18, %v6489_v49 }
0x198e   :  { %v8855_v63 = vcombine.low %v12066_v28, %v12072_v23  ;;  %v8856_v27 = vcombine.high %v12066_v28, %v12072_v23  ;;  %v6398_v28 = vld [vmem:[#allocation13 + $0x110] sm:$0xff]  ;;  %v6399_v23 = vld [vmem:[#allocation13 + $0x118] sm:$0xff] }
0x198f   :  { %7153 = vmatpush1.bf16.msra.mxu1 %v8929_v44  ;;  %7213 = vmatprep.subr.bf16.mxu0 %v8964_v26  ;;  %v8854_v44 = vcombine.high %v12062_v22, %v12064_v46 }
0x1990   :  { %6292 = vadd.xlane.f32.xlu0 %v6291_v51  ;;  %7154 = vmatprep.subr.bf16.mxu1 %v8938_v25  ;;  %v6484_v51 = vld [vmem:[#allocation13 + $0x3c0] sm:$0xff] }
0x1991   :  { %v8970_v21 = vcombine.high %v6484_v51, %v6488_v1  ;;  %v8969_v5 = vcombine.low %v6484_v51, %v6488_v1  ;;  %7214 = vmatpush1.bf16.msra.mxu0 %v8963_v48 }
0x1992   :  { %7215 = vmatprep.subr.bf16.mxu0 %v8972_v3  ;;  %v6374_v3 = vld [vmem:[#allocation13 + $0x50] sm:$0xff] }
0x1993   :  { %7155 = vmatpush1.bf16.msra.mxu1 %v8937_v6 }
0x1994   :  { %7156 = vmatprep.subr.bf16.mxu1 %v8946_v12 }
0x1995   :  { %7216 = vmatpush1.bf16.msra.mxu0 %v8971_v55 }
0x1996   :  { %7291 = vmatprep.subr.bf16.mxu0 %v8856_v27  ;;  %v6379_v27 = vld [vmem:[#allocation13 + $0x78] sm:$0xff] }
0x1997   :  { %7157 = vmatpush1.bf16.msra.mxu1 %v8945_v32 }
0x1998   :  { %7158 = vmatprep.subr.bf16.mxu1 %v8954_v24 }
0x199b   :  { %7159 = vmatpush1.bf16.msra.mxu1 %v8953_v58  ;;  %v10452_v58 = vld [vmem:[%s12260_s11] sm:$0x3f] }
0x199c   :  { %7160 = vmatprep.subr.bf16.mxu1 %v8962_v8  ;;  %v12116_v56 = vrot.slane %v10452_v58, %v6338_v14 }
0x199f   :  { %7161 = vmatpush1.bf16.msra.mxu1 %v8961_v30  ;;  %v12113_v30 = vrot.slane %v10451_v2, %v6338_v14 }
0x19a0   :  { %7162 = vmatprep.subr.bf16.mxu1 %v8970_v21 }
0x19a3   :  { %7163 = vmatpush1.bf16.msra.mxu1 %v8969_v5 }
0x19a4   :  { %7238 = vmatprep.subr.bf16.mxu1 %v8854_v44  ;;  %v6378_v44 = vld [vmem:[#allocation13 + $0x70] sm:$0xff] }
0x19b8   :  { %v6264_v61 = vpop.xlane.xlu0 %6263 }
0x19b9   :  { %v6270_v41 = vmul.f32 0.00390625, %v6264_v61  ;;  %v6375_v61 = vld [vmem:[#allocation13 + $0x58] sm:$0xff] }
0x19bb   :  { %v12079_v25 = vsub.f32 %v12030_v50, %v6270_v41  ;;  %v12082_v15 = vsub.f32 %v12032_v33, %v6270_v41 }
0x19bc   :  { %v6267_v6 = vpop.xlane.xlu0 %6266 }
0x19bd   :  { %v6284_v37 = vmul.f32 %v12079_v25, %v12079_v25  ;;  %v6285_v38 = vmul.f32 %v12082_v15, %v12082_v15  ;;  %v6271_v31 = vmul.f32 0.00390625, %v6267_v6  ;;  %v8862_v6 = vcombine.high %v6374_v3, %v6378_v44 }
0x19bf   :  { %v12089_v36 = vsub.f32 %v12036_v59, %v6271_v31  ;;  %v12092_v34 = vsub.f32 %v12038_v60, %v6271_v31  ;;  %v6294_v12 = vadd.f32 %v6285_v38, %v6284_v37  ;;  %v6322_v60 = vsub.s32 2, %v11444_v43  ;;  %v6382_v37 = vld [vmem:[#allocation13 + $0x90] sm:$0xff]  ;;  %v6387_v38 = vld [vmem:[#allocation13 + $0xb8] sm:$0xff] }
0x19c0   :  { %v8861_v31 = vcombine.low %v6374_v3, %v6378_v44  ;;  %v6422_v44 = vld [vmem:[#allocation13 + $0x1d0] sm:$0xff] }
0x19c1   :  { %v6286_v50 = vmul.f32 %v12089_v36, %v12089_v36  ;;  %v6287_v33 = vmul.f32 %v12092_v34, %v12092_v34  ;;  %6295 = vadd.xlane.f32.xlu0 %v6294_v12  ;;  %v12102_v24 = vrot.slane %v10451_v2, %v6322_v60  ;;  %v12108_v45 = vrot.slane %v10452_v58, %v6322_v60  ;;  %v6406_v58 = vld [vmem:[#allocation13 + $0x150] sm:$0xff] }
0x19c2   :  { %v8863_v12 = vcombine.low %v6375_v61, %v6379_v27 }
0x19c3   :  { %v6297_v10 = vadd.f32 %v6287_v33, %v6286_v50 }
0x19c5   :  { %6298 = vadd.xlane.f32.xlu1 %v6297_v10  ;;  %v6390_v10 = vld [vmem:[#allocation13 + $0xd0] sm:$0xff] }
0x1a19   :  { %v6290_v32 = vpop.xlane.xlu0 %6289 }
0x1a1a   :  { %v6300_v62 = vmul.f32 0.00390625, %v6290_v32  ;;  %v6394_v32 = vld [vmem:[#allocation13 + $0xf0] sm:$0xff] }
0x1a1b   :  { %v8878_v22 = vcombine.high %v6390_v10, %v6394_v32 }
0x1a1c   :  { %v6304_v35 = vadd.f32 1e-05, %v6300_v62  ;;  %v6391_v62 = vld [vmem:[#allocation13 + $0xd8] sm:$0xff] }
0x1a1d   :  { %v6293_v52 = vpop.xlane.xlu0 %6292 }
0x1a1e   :  { %10422 = vrsqrt.f32 %v6304_v35  ;;  %v6301_v59 = vmul.f32 0.00390625, %v6293_v52  ;;  %v6395_v35 = vld [vmem:[#allocation13 + $0xf8] sm:$0xff] }
0x1a1f   :  { %v8880_v46 = vcombine.high %v6391_v62, %v6395_v35  ;;  %v8879_v60 = vcombine.low %v6391_v62, %v6395_v35 }
0x1a20   :  { %v6305_v39 = vadd.f32 1e-05, %v6301_v59 }
0x1a22   :  { %10424 = vrsqrt.f32 %v6305_v39  ;;  %v8877_v39 = vcombine.low %v6390_v10, %v6394_v32  ;;  %v6435_v10 = vld [vmem:[#allocation13 + $0x238] sm:$0xff] }
0x1a28   :  { %v10423_v40 = vpop.eup %10422 }
0x1a29   :  { %v6312_v0 = vmul.f32 %v10423_v40, %v12043_v13  ;;  %v6313_v57 = vmul.f32 %v10423_v40, %v12046_v53  ;;  %v6410_v40 = vld [vmem:[#allocation13 + $0x170] sm:$0xff] }
0x1a2b   :  { %v6329_v11 = vmul.f32 %v12102_v24, %v6313_v57  ;;  %v6328_v8 = vmul.f32 %v12108_v45, %v6312_v0  ;;  %v6407_v0 = vld [vmem:[#allocation13 + $0x158] sm:$0xff] }
0x1a2c   :  { %v10425_v51 = vpop.eup %10424  ;;  %v6411_v57 = vld [vmem:[#allocation13 + $0x178] sm:$0xff] }
0x1a2d   :  { %v6314_v1 = vmul.f32 %v10425_v51, %v12053_v47  ;;  %v6315_v48 = vmul.f32 %v10425_v51, %v12056_v42  ;;  %v6345_v21 = vadd.f32 %v12113_v30, %v6329_v11  ;;  %v6344_v53 = vadd.f32 %v12116_v56, %v6328_v8 }
0x1a2e   :  { %v8894_v51 = vcombine.high %v6406_v58, %v6410_v40 }
0x1a2f   :  { %v6331_v26 = vmul.f32 %v12102_v24, %v6315_v48  ;;  %v6330_v13 = vmul.f32 %v12108_v45, %v6314_v1  ;;  %v12127_v5 = vadd.f32 %v6345_v21, %v11477_v9  ;;  %v12133_v42 = vadd.f32 %v6344_v53, %v11487_v20  ;;  %v6386_v20 = vld [vmem:[#allocation13 + $0xb0] sm:$0xff]  ;;  %v6415_v21 = vld [vmem:[#allocation13 + $0x198] sm:$0xff] }
0x1a30   :  { %v8870_v50 = vcombine.high %v6382_v37, %v6386_v20  ;;  %v8869_v52 = vcombine.low %v6382_v37, %v6386_v20  ;;  %v8896_v1 = vcombine.high %v6407_v0, %v6411_v57  ;;  %v6414_v48 = vld [vmem:[#allocation13 + $0x190] sm:$0xff]  ;;  %v8893_v53 = vcombine.low %v6406_v58, %v6410_v40 }
0x1a31   :  { %v6347_v18 = vadd.f32 %v12113_v30, %v6331_v26  ;;  %v6346_v49 = vadd.f32 %v12116_v56, %v6330_v13  ;;  %v6418_v26 = vld [vmem:[#allocation13 + $0x1b0] sm:$0xff]  ;;  %v6419_v13 = vld [vmem:[#allocation13 + $0x1b8] sm:$0xff] }
0x1a32   :  { %v8904_v3 = vcombine.high %v6415_v21, %v6419_v13  ;;  %v8903_v37 = vcombine.low %v6415_v21, %v6419_v13  ;;  %v6446_v40 = vld [vmem:[#allocation13 + $0x290] sm:$0xff]  ;;  %v6455_v13 = vld [vmem:[#allocation13 + $0x2d8] sm:$0xff] }
0x1a33   :  { %v12130_v47 = vadd.f32 %v6347_v18, %v11482_v17  ;;  %v12136_v55 = vadd.f32 %v6346_v49, %v11492_v16  ;;  %v8864_v17 = vcombine.high %v6375_v61, %v6379_v27  ;;  %v6383_v16 = vld [vmem:[#allocation13 + $0x98] sm:$0xff]  ;;  %v8895_v18 = vcombine.low %v6407_v0, %v6411_v57  ;;  %v6426_v61 = vld [vmem:[#allocation13 + $0x1f0] sm:$0xff] }
0x1a34   :  { %v8872_v33 = vcombine.high %v6383_v16, %v6387_v38  ;;  %v8871_v59 = vcombine.low %v6383_v16, %v6387_v38  ;;  %v8902_v49 = vcombine.high %v6414_v48, %v6418_v26  ;;  %v6423_v27 = vld [vmem:[#allocation13 + $0x1d8] sm:$0xff]  ;;  %v8910_v16 = vcombine.high %v6422_v44, %v6426_v61  ;;  %v6450_v0 = vld [vmem:[#allocation13 + $0x2b0] sm:$0xff] }
0x1a35   :  { %v12140_v41 = vpack.c.bf16 %v12130_v47, %v12127_v5  ;;  %v12144_v9 = vpack.c.bf16 %v12136_v55, %v12133_v42  ;;  %v8909_v62 = vcombine.low %v6422_v44, %v6426_v61  ;;  %v6447_v57 = vld [vmem:[#allocation13 + $0x298] sm:$0xff]  ;;  %v6458_v21 = vld [vmem:[#allocation13 + $0x2f0] sm:$0xff] }
0x1a37   :  { %7164 = vmatprep.mubr.bf16.mxu1 %v12140_v41  ;;  %7217 = vmatprep.mubr.bf16.mxu0 %v12140_v41 }
0x1a38   :  { %7165 = vmatmul.mubr.bf16.vlgmr.msra.gmra.mrb[176].mxu1 %v12144_v9  ;;  %7218 = vmatmul.mubr.bf16.vlgmr.msra.gmra.mrb[144].mxu0 %v12144_v9 }
0x1a39   :  { %7239 = vmatpush1.bf16.msra.mxu1 %v8853_v54  ;;  %7292 = vmatpush1.bf16.msra.mxu0 %v8855_v63  ;;  %v6402_v54 = vld [vmem:[#allocation13 + $0x130] sm:$0xff]  ;;  %v6403_v63 = vld [vmem:[#allocation13 + $0x138] sm:$0xff] }
0x1a3a   :  { %7240 = vmatprep.subr.bf16.mxu1 %v8862_v6  ;;  %7293 = vmatprep.subr.bf16.mxu0 %v8864_v17  ;;  %v8886_v2 = vcombine.high %v6398_v28, %v6402_v54  ;;  %v8888_v14 = vcombine.high %v6399_v23, %v6403_v63  ;;  %v8885_v11 = vcombine.low %v6398_v28, %v6402_v54  ;;  %v6427_v6 = vld [vmem:[#allocation13 + $0x1f8] sm:$0xff]  ;;  %v6442_v54 = vld [vmem:[#allocation13 + $0x270] sm:$0xff] }
0x1a3b   :  { %v8887_v8 = vcombine.low %v6399_v23, %v6403_v63  ;;  %v8901_v17 = vcombine.low %v6414_v48, %v6418_v26  ;;  %v8912_v38 = vcombine.high %v6423_v27, %v6427_v6  ;;  %v8911_v35 = vcombine.low %v6423_v27, %v6427_v6  ;;  %v6439_v23 = vld [vmem:[#allocation13 + $0x258] sm:$0xff]  ;;  %v6454_v26 = vld [vmem:[#allocation13 + $0x2d0] sm:$0xff] }
0x1a3c   :  { %v6443_v63 = vld [vmem:[#allocation13 + $0x278] sm:$0xff]  ;;  %v8942_v44 = vcombine.high %v6454_v26, %v6458_v21 }
0x1a3d   :  { %7241 = vmatpush1.bf16.msra.mxu1 %v8861_v31  ;;  %7294 = vmatpush1.bf16.msra.mxu0 %v8863_v12  ;;  %v6430_v31 = vld [vmem:[#allocation13 + $0x210] sm:$0xff]  ;;  %v8928_v58 = vcombine.high %v6439_v23, %v6443_v63 }
0x1a3e   :  { %7242 = vmatprep.subr.bf16.mxu1 %v8870_v50  ;;  %7295 = vmatprep.subr.bf16.mxu0 %v8872_v33  ;;  %v6434_v50 = vld [vmem:[#allocation13 + $0x230] sm:$0xff]  ;;  %v6431_v33 = vld [vmem:[#allocation13 + $0x218] sm:$0xff] }
0x1a41   :  { %7243 = vmatpush1.bf16.msra.mxu1 %v8869_v52  ;;  %7296 = vmatpush1.bf16.msra.mxu0 %v8871_v59  ;;  %v8918_v59 = vcombine.high %v6430_v31, %v6434_v50 }
0x1a42   :  { %7244 = vmatprep.subr.bf16.mxu1 %v8878_v22  ;;  %7297 = vmatprep.subr.bf16.mxu0 %v8880_v46  ;;  %v8920_v22 = vcombine.high %v6431_v33, %v6435_v10  ;;  %v6438_v46 = vld [vmem:[#allocation13 + $0x250] sm:$0xff] }
0x1a45   :  { %7245 = vmatpush1.bf16.msra.mxu1 %v8877_v39  ;;  %7298 = vmatpush1.bf16.msra.mxu0 %v8879_v60  ;;  %v8917_v60 = vcombine.low %v6430_v31, %v6434_v50  ;;  %v8941_v50 = vcombine.low %v6454_v26, %v6458_v21 }
0x1a46   :  { %7246 = vmatprep.subr.bf16.mxu1 %v8886_v2  ;;  %7299 = vmatprep.subr.bf16.mxu0 %v8888_v14  ;;  %v8919_v2 = vcombine.low %v6431_v33, %v6435_v10  ;;  %v8926_v14 = vcombine.high %v6438_v46, %v6442_v54 }
0x1a49   :  { %7247 = vmatpush1.bf16.msra.mxu1 %v8885_v11  ;;  %7300 = vmatpush1.bf16.msra.mxu0 %v8887_v8  ;;  %v6451_v11 = vld [vmem:[#allocation13 + $0x2b8] sm:$0xff]  ;;  %v8925_v8 = vcombine.low %v6438_v46, %v6442_v54 }
0x1a4a   :  { %7248 = vmatprep.subr.bf16.mxu1 %v8894_v51  ;;  %7301 = vmatprep.subr.bf16.mxu0 %v8896_v1  ;;  %v8927_v51 = vcombine.low %v6439_v23, %v6443_v63  ;;  %v8934_v1 = vcombine.high %v6446_v40, %v6450_v0  ;;  %v8936_v48 = vcombine.high %v6447_v57, %v6451_v11 }
0x1a4d   :  { %7249 = vmatpush1.bf16.msra.mxu1 %v8893_v53  ;;  %7302 = vmatpush1.bf16.msra.mxu0 %v8895_v18  ;;  %v6459_v53 = vld [vmem:[#allocation13 + $0x2f8] sm:$0xff] }
0x1a4e   :  { %v6296_v20 = vpop.xlane.xlu0 %6295  ;;  %7250 = vmatprep.subr.bf16.mxu1 %v8902_v49  ;;  %7303 = vmatprep.subr.bf16.mxu0 %v8904_v3  ;;  %v8933_v49 = vcombine.low %v6446_v40, %v6450_v0  ;;  %v8935_v3 = vcombine.low %v6447_v57, %v6451_v11  ;;  %v8944_v6 = vcombine.high %v6455_v13, %v6459_v53  ;;  %v6479_v57 = vld [vmem:[#allocation13 + $0x398] sm:$0xff]  ;;  %v6490_v11 = vld [vmem:[#allocation13 + $0x3f0] sm:$0xff] }
0x1a4f   :  { %v6302_v12 = vmul.f32 0.00390625, %v6296_v20  ;;  %v6463_v20 = vld [vmem:[#allocation13 + $0x318] sm:$0xff]  ;;  %v8943_v33 = vcombine.low %v6455_v13, %v6459_v53 }
0x1a51   :  { %v6306_v32 = vadd.f32 1e-05, %v6302_v12  ;;  %7251 = vmatpush1.bf16.msra.mxu1 %v8901_v17  ;;  %7304 = vmatpush1.bf16.msra.mxu0 %v8903_v37  ;;  %v6462_v17 = vld [vmem:[#allocation13 + $0x310] sm:$0xff] }
0x1a52   :  { %v6299_v52 = vpop.xlane.xlu1 %6298  ;;  %7252 = vmatprep.subr.bf16.mxu1 %v8910_v16  ;;  %7305 = vmatprep.subr.bf16.mxu0 %v8912_v38  ;;  %v6466_v37 = vld [vmem:[#allocation13 + $0x330] sm:$0xff]  ;;  %v6467_v16 = vld [vmem:[#allocation13 + $0x338] sm:$0xff] }
0x1a53   :  { %10426 = vrsqrt.f32 %v6306_v32  ;;  %v6303_v28 = vmul.f32 0.00390625, %v6299_v52  ;;  %v8950_v10 = vcombine.high %v6462_v17, %v6466_v37  ;;  %v8952_v32 = vcombine.high %v6463_v20, %v6467_v16  ;;  %v6471_v52 = vld [vmem:[#allocation13 + $0x358] sm:$0xff] }
0x1a54   :  { %v8951_v23 = vcombine.low %v6463_v20, %v6467_v16  ;;  %v10106_v20 = vld [vmem:[#allocation14 + $0x40] ss:$8 sps:$4 sm:$0xff]   ;;  %v10109_v16 = vld [vmem:[#allocation14 + $0x50] ss:$8 sps:$4 sm:$0xff]  }
0x1a55   :  { %v6307_v39 = vadd.f32 1e-05, %v6303_v28  ;;  %7253 = vmatpush1.bf16.msra.mxu1 %v8909_v62  ;;  %7306 = vmatpush1.bf16.msra.mxu0 %v8911_v35  ;;  %v6470_v62 = vld [vmem:[#allocation13 + $0x350] sm:$0xff] }
0x1a56   :  { %7254 = vmatprep.subr.bf16.mxu1 %v8918_v59  ;;  %7307 = vmatprep.subr.bf16.mxu0 %v8920_v22  ;;  %v6474_v35 = vld [vmem:[#allocation13 + $0x370] sm:$0xff]  ;;  %v6475_v59 = vld [vmem:[#allocation13 + $0x378] sm:$0xff] }
0x1a57   :  { %10428 = vrsqrt.f32 %v6307_v39  ;;  %v8960_v63 = vcombine.high %v6471_v52, %v6475_v59  ;;  %v8957_v40 = vcombine.low %v6470_v62, %v6474_v35  ;;  %v8959_v0 = vcombine.low %v6471_v52, %v6475_v59  ;;  %v10127_v52 = vld [vmem:[#allocation14 + $0xb0] ss:$8 sps:$4 sm:$0xff]   ;;  %v10132_v59 = vld [vmem:[#allocation14 + $0xc4] ss:$8 sps:$4 sm:$0xff]  }
0x1a59   :  { %7255 = vmatpush1.bf16.msra.mxu1 %v8917_v60  ;;  %7308 = vmatpush1.bf16.msra.mxu0 %v8919_v2 }
0x1a5a   :  { %7256 = vmatprep.subr.bf16.mxu1 %v8926_v14  ;;  %7309 = vmatprep.subr.bf16.mxu0 %v8928_v58  ;;  %v6478_v58 = vld [vmem:[#allocation13 + $0x390] sm:$0xff] }
0x1a5d   :  { %v10427_v18 = vpop.eup %10426  ;;  %7257 = vmatpush1.bf16.msra.mxu1 %v8925_v8  ;;  %7310 = vmatpush1.bf16.msra.mxu0 %v8927_v51  ;;  %v6491_v8 = vld [vmem:[#allocation13 + $0x3f8] sm:$0xff] }
0x1a5e   :  { %v6316_v61 = vmul.f32 %v10427_v18, %v12079_v25  ;;  %v6317_v27 = vmul.f32 %v10427_v18, %v12082_v15  ;;  %7258 = vmatprep.subr.bf16.mxu1 %v8934_v1  ;;  %7311 = vmatprep.subr.bf16.mxu0 %v8936_v48 }
0x1a60   :  { %v6333_v38 = vmul.f32 %v12102_v24, %v6317_v27  ;;  %v6332_v31 = vmul.f32 %v12108_v45, %v6316_v61  ;;  %v10102_v61 = vld [vmem:[#allocation14 + $0x24] ss:$8 sps:$4 sm:$0xff]   ;;  %v10100_v27 = vld [vmem:[#allocation14 + $0x20] ss:$8 sps:$4 sm:$0xff]  }
0x1a61   :  { %v10429_v12 = vpop.eup %10428  ;;  %7259 = vmatpush1.bf16.msra.mxu1 %v8933_v49  ;;  %7312 = vmatpush1.bf16.msra.mxu0 %v8935_v3  ;;  %v10096_v49 = vld [vmem:[#allocation14 + $0x4] ss:$8 sps:$4 sm:$0xff]   ;;  %v10094_v3 = vld [vmem:[#allocation14] ss:$8 sps:$4 sm:$0xff]  }
0x1a62   :  { %v6318_v25 = vmul.f32 %v10429_v12, %v12089_v36  ;;  %v6319_v15 = vmul.f32 %v10429_v12, %v12092_v34  ;;  %7260 = vmatprep.subr.bf16.mxu1 %v8942_v44  ;;  %7313 = vmatprep.subr.bf16.mxu0 %v8944_v6  ;;  %v6349_v46 = vadd.f32 %v12113_v30, %v6333_v38  ;;  %v10099_v44 = vld [vmem:[#allocation14 + $0x14] ss:$8 sps:$4 sm:$0xff]   ;;  %v10114_v38 = vld [vmem:[#allocation14 + $0x64] ss:$8 sps:$4 sm:$0xff]  }
0x1a63   :  { %v6348_v54 = vadd.f32 %v12116_v56, %v6332_v31  ;;  %v8949_v36 = vcombine.low %v6462_v17, %v6466_v37  ;;  %v8958_v34 = vcombine.high %v6470_v62, %v6474_v35  ;;  %v10105_v6 = vld [vmem:[#allocation14 + $0x34] ss:$8 sps:$4 sm:$0xff]   ;;  %v10103_v17 = vld [vmem:[#allocation14 + $0x30] ss:$8 sps:$4 sm:$0xff]   ;;  %v10108_v37 = vld [vmem:[#allocation14 + $0x44] ss:$8 sps:$4 sm:$0xff]  }
0x1a64   :  { %v6335_v22 = vmul.f32 %v12102_v24, %v6319_v15  ;;  %v6334_v28 = vmul.f32 %v12108_v45, %v6318_v25  ;;  %v12169_v24 = vadd.f32 %v6349_v46, %v11513_v7  ;;  %v10112_v31 = vld [vmem:[#allocation14 + $0x60] ss:$8 sps:$4 sm:$0xff]   ;;  %v10117_v12 = vld [vmem:[#allocation14 + $0x74] ss:$8 sps:$4 sm:$0xff]   ;;  %v10121_v15 = vld [vmem:[#allocation14 + $0x90] ss:$8 sps:$4 sm:$0xff]  }
0x1a65   :  { %7261 = vmatpush1.bf16.msra.mxu1 %v8941_v50  ;;  %7314 = vmatpush1.bf16.msra.mxu0 %v8943_v33  ;;  %v12175_v45 = vadd.f32 %v6348_v54, %v11523_v19  ;;  %v6486_v19 = vld [vmem:[#allocation13 + $0x3d0] sm:$0xff]  ;;  %v10120_v33 = vld [vmem:[#allocation14 + $0x84] ss:$8 sps:$4 sm:$0xff]   ;;  %v10124_v62 = vld [vmem:[#allocation14 + $0xa0] ss:$8 sps:$4 sm:$0xff]  }
0x1a66   :  { %7262 = vmatprep.subr.bf16.mxu1 %v8950_v10  ;;  %7315 = vmatprep.subr.bf16.mxu0 %v8952_v32  ;;  %v6351_v39 = vadd.f32 %v12113_v30, %v6335_v22  ;;  %v6350_v60 = vadd.f32 %v12116_v56, %v6334_v28  ;;  %v6482_v30 = vld [vmem:[#allocation13 + $0x3b0] sm:$0xff]  ;;  %v6483_v56 = vld [vmem:[#allocation13 + $0x3b8] sm:$0xff]  ;;  %v8974_v21 = vcombine.high %v6486_v19, %v6490_v11  ;;  %v10118_v10 = vld [vmem:[#allocation14 + $0x80] ss:$8 sps:$4 sm:$0xff]  }
0x1a67   :  { %v8966_v51 = vcombine.high %v6478_v58, %v6482_v30  ;;  %v8968_v1 = vcombine.high %v6479_v57, %v6483_v56  ;;  %v8965_v48 = vcombine.low %v6478_v58, %v6482_v30  ;;  %v8967_v26 = vcombine.low %v6479_v57, %v6483_v56  ;;  %v10115_v50 = vld [vmem:[#allocation14 + $0x70] ss:$8 sps:$4 sm:$0xff]   ;;  %v10123_v25 = vld [vmem:[#allocation14 + $0x94] ss:$8 sps:$4 sm:$0xff]   ;;  %v10126_v32 = vld [vmem:[#allocation14 + $0xa4] ss:$8 sps:$4 sm:$0xff]  }
0x1a68   :  { %v12172_v2 = vadd.f32 %v6351_v39, %v11518_v29  ;;  %v12178_v14 = vadd.f32 %v6350_v60, %v11528_v4  ;;  %v6487_v4 = vld [vmem:[#allocation13 + $0x3d8] sm:$0xff]  ;;  %v8973_v53 = vcombine.low %v6486_v19, %v6490_v11  ;;  %v10130_v22 = vld [vmem:[#allocation14 + $0xc0] ss:$8 sps:$4 sm:$0xff]   ;;  %v10138_v54 = vld [vmem:[#allocation14 + $0xe4] ss:$8 sps:$4 sm:$0xff]  }
0x1a69   :  { %7263 = vmatpush1.bf16.msra.mxu1 %v8949_v36  ;;  %7316 = vmatpush1.bf16.msra.mxu0 %v8951_v23  ;;  %v8976_v13 = vcombine.high %v6487_v4, %v6491_v8  ;;  %v8975_v18 = vcombine.low %v6487_v4, %v6491_v8  ;;  %v10129_v35 = vld [vmem:[#allocation14 + $0xb4] ss:$8 sps:$4 sm:$0xff]   ;;  %v10133_v28 = vld [vmem:[#allocation14 + $0xd0] ss:$8 sps:$4 sm:$0xff]   ;;  %v10136_v36 = vld [vmem:[#allocation14 + $0xe0] ss:$8 sps:$4 sm:$0xff]  }
0x1a6a   :  { %7264 = vmatprep.subr.bf16.mxu1 %v8958_v34  ;;  %7317 = vmatprep.subr.bf16.mxu0 %v8960_v63  ;;  %v6363_v7 = vpack.c.bf16 %v12172_v2, %v12169_v24  ;;  %v6362_v29 = vpack.c.bf16 %v12178_v14, %v12175_v45  ;;  %v10135_v46 = vld [vmem:[#allocation14 + $0xd4] ss:$8 sps:$4 sm:$0xff]   ;;  %v10139_v34 = vld [vmem:[#allocation14 + $0xf0] ss:$8 sps:$4 sm:$0xff]   ;;  %v10144_v63 = vld [vmem:[#allocation14 + $0x104] ss:$8 sps:$4 sm:$0xff]  }
0x1a6b   :  { %v10141_v23 = vld [vmem:[#allocation14 + $0xf4] ss:$8 sps:$4 sm:$0xff]  }
0x1a6c   :  { %7174 = vmatprep.mubr.bf16.mxu1 %v6363_v7  ;;  %7227 = vmatprep.mubr.bf16.mxu0 %v6363_v7 }
0x1a6d   :  { %7265 = vmatpush1.bf16.msra.mxu1 %v8957_v40  ;;  %7318 = vmatpush1.bf16.msra.mxu0 %v8959_v0 }
0x1a6e   :  { %7175 = vmatmul.mubr.bf16.gmra.mrb[180].mxu1 %v6362_v29  ;;  %7228 = vmatmul.mubr.bf16.gmra.mrb[148].mxu0 %v6362_v29 }
0x1a6f   :  { %7270 = vmatprep.mubr.bf16.mxu1 %v12140_v41  ;;  %7323 = vmatprep.mubr.bf16.mxu0 %v12140_v41  ;;  %v10097_v41 = vld [vmem:[#allocation14 + $0x10] ss:$8 sps:$4 sm:$0xff]  }
0x1a70   :  { %7266 = vmatprep.subr.bf16.mxu1 %v8966_v51  ;;  %7319 = vmatprep.subr.bf16.mxu0 %v8968_v1 }
0x1a71   :  { %7267 = vmatpush1.bf16.msra.mxu1 %v8965_v48  ;;  %7320 = vmatpush1.bf16.msra.mxu0 %v8967_v26 }
0x1a72   :  { %7268 = vmatprep.subr.bf16.mxu1 %v8974_v21  ;;  %7321 = vmatprep.subr.bf16.mxu0 %v8976_v13 }
0x1a75   :  { %7269 = vmatpush1.bf16.msra.mxu1 %v8973_v53  ;;  %7322 = vmatpush1.bf16.msra.mxu0 %v8975_v18  ;;  %v10142_v53 = vld [vmem:[#allocation14 + $0x100] ss:$8 sps:$4 sm:$0xff]   ;;  %v10147_v18 = vld [vmem:[#allocation14 + $0x114] ss:$8 sps:$4 sm:$0xff]  }
0x1a76   :  { %8160 = vmatprep.subr.bf16.mxu1 %v10096_v49  ;;  %v10145_v49 = vld [vmem:[#allocation14 + $0x110] ss:$8 sps:$4 sm:$0xff]  }
0x1a78   :  { %7271 = vmatmul.mubr.bf16.vlgmr.msra.gmra.mrb[184].mxu1 %v12144_v9  ;;  %7324 = vmatmul.mubr.bf16.vlgmr.msra.gmra.mrb[152].mxu0 %v12144_v9  ;;  %v10111_v9 = vld [vmem:[#allocation14 + $0x54] ss:$8 sps:$4 sm:$0xff]  }
0x1a79   :  { %7280 = vmatprep.mubr.bf16.mxu1 %v6363_v7  ;;  %7333 = vmatprep.mubr.bf16.mxu0 %v6363_v7 }
0x1a7a   :  { %8161 = vmatpush1.bf16.msra.mxu1 %v10094_v3  ;;  %v10150_v3 = vld [vmem:[#allocation14 + $0x124] ss:$8 sps:$4 sm:$0xff]  }
0x1a7b   :  { %8162 = vmatprep.subr.bf16.mxu1 %v10099_v44  ;;  %v10148_v44 = vld [vmem:[#allocation14 + $0x120] ss:$8 sps:$4 sm:$0xff]  }
0x1a7e   :  { %8163 = vmatpush1.bf16.msra.mxu1 %v10097_v41  ;;  %v10153_v41 = vld [vmem:[#allocation14 + $0x134] ss:$8 sps:$4 sm:$0xff]  }
0x1a7f   :  { %8164 = vmatprep.subr.bf16.mxu1 %v10102_v61  ;;  %v10151_v61 = vld [vmem:[#allocation14 + $0x130] ss:$8 sps:$4 sm:$0xff]  }
0x1a80   :  { %7281 = vmatmul.mubr.bf16.gmra.mrb[188].mxu1 %v6362_v29  ;;  %7334 = vmatmul.mubr.bf16.gmra.mrb[156].mxu0 %v6362_v29 }
0x1a82   :  { %8165 = vmatpush1.bf16.msra.mxu1 %v10100_v27  ;;  %v10156_v27 = vld [vmem:[#allocation14 + $0x144] ss:$8 sps:$4 sm:$0xff]  }
0x1a83   :  { %8166 = vmatprep.subr.bf16.mxu1 %v10105_v6  ;;  %v10154_v6 = vld [vmem:[#allocation14 + $0x140] ss:$8 sps:$4 sm:$0xff]  }
0x1a86   :  { %8167 = vmatpush1.bf16.msra.mxu1 %v10103_v17  ;;  %v10159_v17 = vld [vmem:[#allocation14 + $0x154] ss:$8 sps:$4 sm:$0xff]  }
0x1a87   :  { %8168 = vmatprep.subr.bf16.mxu1 %v10108_v37  ;;  %v10157_v37 = vld [vmem:[#allocation14 + $0x150] ss:$8 sps:$4 sm:$0xff]  }
0x1a8a   :  { %8169 = vmatpush1.bf16.msra.mxu1 %v10106_v20  ;;  %v10162_v20 = vld [vmem:[#allocation14 + $0x164] ss:$8 sps:$4 sm:$0xff]  }
0x1a8b   :  { %8170 = vmatprep.subr.bf16.mxu1 %v10111_v9  ;;  %v10160_v9 = vld [vmem:[#allocation14 + $0x160] ss:$8 sps:$4 sm:$0xff]  }
0x1a8e   :  { %8171 = vmatpush1.bf16.msra.mxu1 %v10109_v16  ;;  %v10165_v16 = vld [vmem:[#allocation14 + $0x174] ss:$8 sps:$4 sm:$0xff]  }
0x1a8f   :  { %8172 = vmatprep.subr.bf16.mxu1 %v10114_v38  ;;  %v10163_v38 = vld [vmem:[#allocation14 + $0x170] ss:$8 sps:$4 sm:$0xff]  }
0x1a92   :  { %8173 = vmatpush1.bf16.msra.mxu1 %v10112_v31  ;;  %v10168_v31 = vld [vmem:[#allocation14 + $0x184] ss:$8 sps:$4 sm:$0xff]  }
0x1a93   :  { %8174 = vmatprep.subr.bf16.mxu1 %v10117_v12  ;;  %v10166_v12 = vld [vmem:[#allocation14 + $0x180] ss:$8 sps:$4 sm:$0xff]  }
0x1a96   :  { %8175 = vmatpush1.bf16.msra.mxu1 %v10115_v50  ;;  %v10171_v50 = vld [vmem:[#allocation14 + $0x194] ss:$8 sps:$4 sm:$0xff]  }
0x1a97   :  { %8176 = vmatprep.subr.bf16.mxu1 %v10120_v33  ;;  %v10169_v33 = vld [vmem:[#allocation14 + $0x190] ss:$8 sps:$4 sm:$0xff]  }
0x1a9a   :  { %8177 = vmatpush1.bf16.msra.mxu1 %v10118_v10  ;;  %v10174_v10 = vld [vmem:[#allocation14 + $0x1a4] ss:$8 sps:$4 sm:$0xff]  }
0x1a9b   :  { %8178 = vmatprep.subr.bf16.mxu1 %v10123_v25  ;;  %v10172_v25 = vld [vmem:[#allocation14 + $0x1a0] ss:$8 sps:$4 sm:$0xff]  }
0x1a9e   :  { %8179 = vmatpush1.bf16.msra.mxu1 %v10121_v15  ;;  %v10177_v15 = vld [vmem:[#allocation14 + $0x1b4] ss:$8 sps:$4 sm:$0xff]  }
0x1a9f   :  { %8180 = vmatprep.subr.bf16.mxu1 %v10126_v32  ;;  %v10175_v32 = vld [vmem:[#allocation14 + $0x1b0] ss:$8 sps:$4 sm:$0xff]  }
0x1aa2   :  { %8181 = vmatpush1.bf16.msra.mxu1 %v10124_v62  ;;  %v10180_v62 = vld [vmem:[#allocation14 + $0x1c4] ss:$8 sps:$4 sm:$0xff]  }
0x1aa3   :  { %8182 = vmatprep.subr.bf16.mxu1 %v10129_v35 }
0x1aa6   :  { %8183 = vmatpush1.bf16.msra.mxu1 %v10127_v52 }
0x1aa7   :  { %8184 = vmatprep.subr.bf16.mxu1 %v10132_v59  ;;  %v10178_v59 = vld [vmem:[#allocation14 + $0x1c0] ss:$8 sps:$4 sm:$0xff]  }
0x1aaa   :  { %8185 = vmatpush1.bf16.msra.mxu1 %v10130_v22 }
0x1aab   :  { %8186 = vmatprep.subr.bf16.mxu1 %v10135_v46 }
0x1aae   :  { %8187 = vmatpush1.bf16.msra.mxu1 %v10133_v28  ;;  %v10183_v28 = vld [vmem:[#allocation14 + $0x1d4] ss:$8 sps:$4 sm:$0xff]  }
0x1aaf   :  { %8188 = vmatprep.subr.bf16.mxu1 %v10138_v54 }
0x1ab2   :  { %8189 = vmatpush1.bf16.msra.mxu1 %v10136_v36 }
0x1ab3   :  { %8190 = vmatprep.subr.bf16.mxu1 %v10141_v23 }
0x1ab6   :  { %8191 = vmatpush1.bf16.msra.mxu1 %v10139_v34 }
0x1ab7   :  { %8213 = vmatprep.subr.bf16.mxu1 %v10144_v63 }
0x1b0b   :  { %v7166_v39 = vpop.f32.mrb[176].mxu1  ;;  %v7219_v60 = vpop.f32.mrb[144].mxu0 }
0x1b0c   :  { %v7168_v58 = vpop.f32.mrb[177].mxu1  ;;  %v7221_v40 = vpop.f32.mrb[145].mxu0  ;;  %v7344_v57 = vmax.f32 %v7166_v39, 0.0  ;;  %v7346_v56 = vmax.f32 %v7219_v60, 0.0 }
0x1b0d   :  { %v7170_v0 = vpop.f32.mrb[178].mxu1  ;;  %v7223_v30 = vpop.f32.mrb[146].mxu0  ;;  %v7345_v4 = vmax.f32 %v7168_v58, 0.0  ;;  %v7347_v8 = vmax.f32 %v7221_v40, 0.0 }
0x1b0e   :  { %v7352_v7 = vmax.f32 %v7170_v0, 0.0  ;;  %v7354_v29 = vmax.f32 %v7223_v30, 0.0  ;;  %v7172_v19 = vpop.f32.mrb[179].mxu1  ;;  %v7225_v11 = vpop.f32.mrb[147].mxu0 }
0x1b0f   :  { %v7353_v51 = vmax.f32 %v7172_v19, 0.0  ;;  %v7355_v1 = vmax.f32 %v7225_v11, 0.0  ;;  %v10186_v19 = vld [vmem:[#allocation14 + $0x1e4] ss:$8 sps:$4 sm:$0xff]  }
0x1b10   :  { %v7376_v48 = vpack.c.bf16 %v7352_v7, %v7344_v57  ;;  %v12188_v26 = vpack.c.bf16 %v7354_v29, %v7346_v56  ;;  %v10181_v56 = vld [vmem:[#allocation14 + $0x1d0] ss:$8 sps:$4 sm:$0xff]  }
0x1b11   :  { %v7377_v21 = vpack.c.bf16 %v7353_v51, %v7345_v4  ;;  %v12190_v13 = vpack.c.bf16 %v7355_v1, %v7347_v8  ;;  %v10184_v8 = vld [vmem:[#allocation14 + $0x1e0] ss:$8 sps:$4 sm:$0xff]   ;;  %v10189_v51 = vld [vmem:[#allocation14 + $0x1f4] ss:$8 sps:$4 sm:$0xff]  }
0x1b13   :  { %8192 = vmatprep.mubr.bf16.mxu1 %v7377_v21 }
0x1b14   :  { %8193 = vmatmul.mubr.bf16.vlgmr.msra.gmra.mrb[192].mxu1 %v7376_v48 }
0x1b15   :  { %8214 = vmatpush1.bf16.msra.mxu1 %v10142_v53 }
0x1b16   :  { %8215 = vmatprep.subr.bf16.mxu1 %v10147_v18 }
0x1b19   :  { %8216 = vmatpush1.bf16.msra.mxu1 %v10145_v49 }
0x1b1a   :  { %8217 = vmatprep.subr.bf16.mxu1 %v10150_v3  ;;  %v10187_v3 = vld [vmem:[#allocation14 + $0x1f0] ss:$8 sps:$4 sm:$0xff]  }
0x1b1d   :  { %8218 = vmatpush1.bf16.msra.mxu1 %v10148_v44  ;;  %v10192_v44 = vld [vmem:[#allocation14 + $0x204] ss:$8 sps:$4 sm:$0xff]  }
0x1b1e   :  { %8219 = vmatprep.subr.bf16.mxu1 %v10153_v41 }
0x1b21   :  { %8220 = vmatpush1.bf16.msra.mxu1 %v10151_v61 }
0x1b22   :  { %8221 = vmatprep.subr.bf16.mxu1 %v10156_v27 }
0x1b25   :  { %8222 = vmatpush1.bf16.msra.mxu1 %v10154_v6 }
0x1b26   :  { %8223 = vmatprep.subr.bf16.mxu1 %v10159_v17 }
0x1b29   :  { %8224 = vmatpush1.bf16.msra.mxu1 %v10157_v37 }
0x1b2a   :  { %8225 = vmatprep.subr.bf16.mxu1 %v10162_v20 }
0x1b2d   :  { %8226 = vmatpush1.bf16.msra.mxu1 %v10160_v9 }
0x1b2e   :  { %8227 = vmatprep.subr.bf16.mxu1 %v10165_v16 }
0x1b31   :  { %8228 = vmatpush1.bf16.msra.mxu1 %v10163_v38 }
0x1b32   :  { %8229 = vmatprep.subr.bf16.mxu1 %v10168_v31 }
0x1b35   :  { %8230 = vmatpush1.bf16.msra.mxu1 %v10166_v12 }
0x1b36   :  { %8231 = vmatprep.subr.bf16.mxu1 %v10171_v50 }
0x1b39   :  { %8232 = vmatpush1.bf16.msra.mxu1 %v10169_v33  ;;  %v10190_v33 = vld [vmem:[#allocation14 + $0x200] ss:$8 sps:$4 sm:$0xff]  }
0x1b3a   :  { %8233 = vmatprep.subr.bf16.mxu1 %v10174_v10  ;;  %v10195_v10 = vld [vmem:[#allocation14 + $0x214] ss:$8 sps:$4 sm:$0xff]  }
0x1b3d   :  { %8234 = vmatpush1.bf16.msra.mxu1 %v10172_v25 }
0x1b3e   :  { %8235 = vmatprep.subr.bf16.mxu1 %v10177_v15 }
0x1b41   :  { %v7176_v35 = vpop.f32.mrb[180].mxu1  ;;  %v7229_v52 = vpop.f32.mrb[148].mxu0  ;;  %8236 = vmatpush1.bf16.msra.mxu1 %v10175_v32 }
0x1b42   :  { %v7178_v22 = vpop.f32.mrb[181].mxu1  ;;  %v7231_v46 = vpop.f32.mrb[149].mxu0  ;;  %8237 = vmatprep.subr.bf16.mxu1 %v10180_v62  ;;  %v7360_v23 = vmax.f32 %v7176_v35, 0.0  ;;  %v7362_v34 = vmax.f32 %v7229_v52, 0.0 }
0x1b43   :  { %v7180_v54 = vpop.f32.mrb[182].mxu1  ;;  %v7233_v36 = vpop.f32.mrb[150].mxu0  ;;  %v7361_v40 = vmax.f32 %v7178_v22, 0.0  ;;  %v7363_v0 = vmax.f32 %v7231_v46, 0.0  ;;  %v10198_v22 = vld [vmem:[#allocation14 + $0x224] ss:$8 sps:$4 sm:$0xff]  }
0x1b44   :  { %v7368_v63 = vmax.f32 %v7180_v54, 0.0  ;;  %v7370_v39 = vmax.f32 %v7233_v36, 0.0  ;;  %v7182_v60 = vpop.f32.mrb[183].mxu1  ;;  %v7235_v58 = vpop.f32.mrb[151].mxu0 }
0x1b45   :  { %v7369_v30 = vmax.f32 %v7182_v60, 0.0  ;;  %v7371_v57 = vmax.f32 %v7235_v58, 0.0  ;;  %8238 = vmatpush1.bf16.msra.mxu1 %v10178_v59  ;;  %v10193_v59 = vld [vmem:[#allocation14 + $0x210] ss:$8 sps:$4 sm:$0xff]  }
0x1b46   :  { %v7384_v7 = vpack.c.bf16 %v7368_v63, %v7360_v23  ;;  %v12192_v29 = vpack.c.bf16 %v7370_v39, %v7362_v34  ;;  %8239 = vmatprep.subr.bf16.mxu1 %v10183_v28 }
0x1b47   :  { %v7385_v11 = vpack.c.bf16 %v7369_v30, %v7361_v40  ;;  %v7387_v4 = vpack.c.bf16 %v7371_v57, %v7363_v0  ;;  %v10196_v57 = vld [vmem:[#allocation14 + $0x220] ss:$8 sps:$4 sm:$0xff]  }
0x1b49   :  { %8202 = vmatprep.mubr.bf16.mxu1 %v7385_v11  ;;  %8240 = vmatpush1.bf16.msra.mxu1 %v10181_v56  ;;  %v10201_v56 = vld [vmem:[#allocation14 + $0x234] ss:$8 sps:$4 sm:$0xff]   ;;  %v10202_v11 = vld [vmem:[#allocation14 + $0x240] ss:$8 sps:$4 sm:$0xff]  }
0x1b4a   :  { %8203 = vmatmul.mubr.bf16.gmra.mrb[196].mxu1 %v7384_v7  ;;  %8241 = vmatprep.subr.bf16.mxu1 %v10186_v19  ;;  %v10199_v7 = vld [vmem:[#allocation14 + $0x230] ss:$8 sps:$4 sm:$0xff]   ;;  %v10204_v19 = vld [vmem:[#allocation14 + $0x244] ss:$8 sps:$4 sm:$0xff]  }
0x1b4b   :  { %v7272_v1 = vpop.f32.mrb[184].mxu1  ;;  %v7325_v48 = vpop.f32.mrb[152].mxu0  ;;  %8245 = vmatprep.mubr.bf16.mxu1 %v12190_v13 }
0x1b4c   :  { %v7274_v21 = vpop.f32.mrb[185].mxu1  ;;  %v7327_v53 = vpop.f32.mrb[153].mxu0  ;;  %v7348_v41 = vmax.f32 %v7272_v1, 0.0  ;;  %v7350_v61 = vmax.f32 %v7325_v48, 0.0  ;;  %v10208_v1 = vld [vmem:[#allocation14 + $0x260] ss:$8 sps:$4 sm:$0xff]  }
0x1b4d   :  { %v7276_v18 = vpop.f32.mrb[186].mxu1  ;;  %v7329_v49 = vpop.f32.mrb[154].mxu0  ;;  %8242 = vmatpush1.bf16.msra.mxu1 %v10184_v8  ;;  %v7349_v20 = vmax.f32 %v7274_v21, 0.0  ;;  %v7351_v9 = vmax.f32 %v7327_v53, 0.0  ;;  %v10205_v8 = vld [vmem:[#allocation14 + $0x250] ss:$8 sps:$4 sm:$0xff]  }
0x1b4e   :  { %v7356_v27 = vmax.f32 %v7276_v18, 0.0  ;;  %v7358_v6 = vmax.f32 %v7329_v49, 0.0  ;;  %v7278_v17 = vpop.f32.mrb[187].mxu1  ;;  %v7331_v37 = vpop.f32.mrb[155].mxu0  ;;  %8243 = vmatprep.subr.bf16.mxu1 %v10189_v51  ;;  %v10210_v51 = vld [vmem:[#allocation14 + $0x264] ss:$8 sps:$4 sm:$0xff]  }
0x1b4f   :  { %v7357_v16 = vmax.f32 %v7278_v17, 0.0  ;;  %v7359_v38 = vmax.f32 %v7331_v37, 0.0  ;;  %v10213_v48 = vld [vmem:[#allocation14 + $0x274] ss:$8 sps:$4 sm:$0xff]   ;;  %v10211_v21 = vld [vmem:[#allocation14 + $0x270] ss:$8 sps:$4 sm:$0xff]  }
0x1b50   :  { %v12195_v31 = vpack.c.bf16 %v7356_v27, %v7348_v41  ;;  %v12197_v13 = vpack.c.bf16 %v7358_v6, %v7350_v61  ;;  %v10214_v53 = vld [vmem:[#allocation14 + $0x280] ss:$8 sps:$4 sm:$0xff]   ;;  %v10219_v18 = vld [vmem:[#allocation14 + $0x294] ss:$8 sps:$4 sm:$0xff]   ;;  %v10217_v49 = vld [vmem:[#allocation14 + $0x290] ss:$8 sps:$4 sm:$0xff]  }
0x1b51   :  { %v7381_v12 = vpack.c.bf16 %v7357_v16, %v7349_v20  ;;  %v12199_v50 = vpack.c.bf16 %v7359_v38, %v7351_v9  ;;  %8244 = vmatpush1.bf16.msra.mxu1 %v10187_v3  ;;  %v10222_v3 = vld [vmem:[#allocation14 + $0x2a4] ss:$8 sps:$4 sm:$0xff]   ;;  %v10225_v41 = vld [vmem:[#allocation14 + $0x2b4] ss:$8 sps:$4 sm:$0xff]   ;;  %v10223_v61 = vld [vmem:[#allocation14 + $0x2b0] ss:$8 sps:$4 sm:$0xff]  }
0x1b52   :  { %8266 = vmatprep.subr.bf16.mxu1 %v10192_v44  ;;  %v10220_v44 = vld [vmem:[#allocation14 + $0x2a0] ss:$8 sps:$4 sm:$0xff]   ;;  %v10228_v27 = vld [vmem:[#allocation14 + $0x2c4] ss:$8 sps:$4 sm:$0xff]   ;;  %v10231_v17 = vld [vmem:[#allocation14 + $0x2d4] ss:$8 sps:$4 sm:$0xff]  }
0x1b53   :  { %v7282_v25 = vpop.f32.mrb[188].mxu1  ;;  %v7335_v15 = vpop.f32.mrb[156].mxu0  ;;  %v10226_v6 = vld [vmem:[#allocation14 + $0x2c0] ss:$8 sps:$4 sm:$0xff]   ;;  %v10229_v37 = vld [vmem:[#allocation14 + $0x2d0] ss:$8 sps:$4 sm:$0xff]  }
0x1b54   :  { %v7284_v32 = vpop.f32.mrb[189].mxu1  ;;  %v7337_v62 = vpop.f32.mrb[157].mxu0  ;;  %8246 = vmatmul.mubr.bf16.vlgmr.msra.gmra.mrb[192].mxu1 %v12188_v26  ;;  %v7364_v46 = vmax.f32 %v7282_v25, 0.0  ;;  %v7366_v28 = vmax.f32 %v7335_v15, 0.0  ;;  %v10234_v20 = vld [vmem:[#allocation14 + $0x2e4] ss:$8 sps:$4 sm:$0xff]  }
0x1b55   :  { %v7286_v35 = vpop.f32.mrb[190].mxu1  ;;  %v7339_v52 = vpop.f32.mrb[158].mxu0  ;;  %8255 = vmatprep.mubr.bf16.mxu1 %v7387_v4  ;;  %8267 = vmatpush1.bf16.msra.mxu1 %v10190_v33  ;;  %v7365_v63 = vmax.f32 %v7284_v32, 0.0  ;;  %v7367_v39 = vmax.f32 %v7337_v62, 0.0  ;;  %v10207_v4 = vld [vmem:[#allocation14 + $0x254] ss:$8 sps:$4 sm:$0xff]  }
0x1b56   :  { %v7372_v54 = vmax.f32 %v7286_v35, 0.0  ;;  %v7374_v36 = vmax.f32 %v7339_v52, 0.0  ;;  %v7288_v23 = vpop.f32.mrb[191].mxu1  ;;  %v7341_v34 = vpop.f32.mrb[159].mxu0  ;;  %8268 = vmatprep.subr.bf16.mxu1 %v10195_v10  ;;  %v10232_v9 = vld [vmem:[#allocation14 + $0x2e0] ss:$8 sps:$4 sm:$0xff]  }
0x1b57   :  { %v7373_v60 = vmax.f32 %v7288_v23, 0.0  ;;  %v7375_v58 = vmax.f32 %v7341_v34, 0.0  ;;  %v10237_v16 = vld [vmem:[#allocation14 + $0x2f4] ss:$8 sps:$4 sm:$0xff]   ;;  %v10235_v38 = vld [vmem:[#allocation14 + $0x2f0] ss:$8 sps:$4 sm:$0xff]  }
0x1b58   :  { %v12202_v40 = vpack.c.bf16 %v7372_v54, %v7364_v46  ;;  %v12204_v26 = vpack.c.bf16 %v7374_v36, %v7366_v28  ;;  %v10238_v33 = vld [vmem:[#allocation14 + $0x300] ss:$8 sps:$4 sm:$0xff]   ;;  %v10243_v10 = vld [vmem:[#allocation14 + $0x314] ss:$8 sps:$4 sm:$0xff]   ;;  %v10241_v25 = vld [vmem:[#allocation14 + $0x310] ss:$8 sps:$4 sm:$0xff]  }
0x1b59   :  { %v12206_v0 = vpack.c.bf16 %v7373_v60, %v7365_v63  ;;  %v12208_v30 = vpack.c.bf16 %v7375_v58, %v7367_v39  ;;  %8269 = vmatpush1.bf16.msra.mxu1 %v10193_v59  ;;  %v10246_v15 = vld [vmem:[#allocation14 + $0x324] ss:$8 sps:$4 sm:$0xff]   ;;  %v10244_v32 = vld [vmem:[#allocation14 + $0x320] ss:$8 sps:$4 sm:$0xff]   ;;  %v10249_v62 = vld [vmem:[#allocation14 + $0x334] ss:$8 sps:$4 sm:$0xff]  }
0x1b5a   :  { %8270 = vmatprep.subr.bf16.mxu1 %v10198_v22  ;;  %v10247_v35 = vld [vmem:[#allocation14 + $0x330] ss:$8 sps:$4 sm:$0xff]   ;;  %v10252_v52 = vld [vmem:[#allocation14 + $0x344] ss:$8 sps:$4 sm:$0xff]   ;;  %v10255_v59 = vld [vmem:[#allocation14 + $0x354] ss:$8 sps:$4 sm:$0xff]  }
0x1b5b   :  { %v10253_v22 = vld [vmem:[#allocation14 + $0x350] ss:$8 sps:$4 sm:$0xff]   ;;  %v10258_v46 = vld [vmem:[#allocation14 + $0x364] ss:$8 sps:$4 sm:$0xff]   ;;  %v10256_v28 = vld [vmem:[#allocation14 + $0x360] ss:$8 sps:$4 sm:$0xff]  }
0x1b5c   :  { %8256 = vmatmul.mubr.bf16.gmra.mrb[196].mxu1 %v12192_v29  ;;  %v10216_v29 = vld [vmem:[#allocation14 + $0x284] ss:$8 sps:$4 sm:$0xff]   ;;  %v10261_v54 = vld [vmem:[#allocation14 + $0x374] ss:$8 sps:$4 sm:$0xff]   ;;  %v10259_v36 = vld [vmem:[#allocation14 + $0x370] ss:$8 sps:$4 sm:$0xff]  }
0x1b5d   :  { %8271 = vmatpush1.bf16.msra.mxu1 %v10196_v57  ;;  %8298 = vmatprep.mubr.bf16.mxu1 %v7381_v12  ;;  %v10240_v12 = vld [vmem:[#allocation14 + $0x304] ss:$8 sps:$4 sm:$0xff]   ;;  %v10267_v34 = vld [vmem:[#allocation14 + $0x394] ss:$8 sps:$4 sm:$0xff]   ;;  %v10265_v63 = vld [vmem:[#allocation14 + $0x390] ss:$8 sps:$4 sm:$0xff]  }
0x1b5e   :  { %8272 = vmatprep.subr.bf16.mxu1 %v10201_v56  ;;  %v10264_v23 = vld [vmem:[#allocation14 + $0x384] ss:$8 sps:$4 sm:$0xff]   ;;  %v10268_v60 = vld [vmem:[#allocation14 + $0x3a0] ss:$8 sps:$4 sm:$0xff]   ;;  %v10273_v58 = vld [vmem:[#allocation14 + $0x3b4] ss:$8 sps:$4 sm:$0xff]  }
0x1b5f   :  { %v10270_v39 = vld [vmem:[#allocation14 + $0x3a4] ss:$8 sps:$4 sm:$0xff]   ;;  %v10274_v57 = vld [vmem:[#allocation14 + $0x3c0] ss:$8 sps:$4 sm:$0xff]   ;;  %v10279_v56 = vld [vmem:[#allocation14 + $0x3d4] ss:$8 sps:$4 sm:$0xff]  }
0x1b61   :  { %8273 = vmatpush1.bf16.msra.mxu1 %v10199_v7  ;;  %v10277_v7 = vld [vmem:[#allocation14 + $0x3d0] ss:$8 sps:$4 sm:$0xff]  }
0x1b62   :  { %8274 = vmatprep.subr.bf16.mxu1 %v10204_v19  ;;  %v10282_v19 = vld [vmem:[#allocation14 + $0x3e4] ss:$8 sps:$4 sm:$0xff]  }
0x1b65   :  { %8275 = vmatpush1.bf16.msra.mxu1 %v10202_v11  ;;  %v10280_v11 = vld [vmem:[#allocation14 + $0x3e0] ss:$8 sps:$4 sm:$0xff]  }
0x1b66   :  { %8276 = vmatprep.subr.bf16.mxu1 %v10207_v4  ;;  %v10285_v4 = vld [vmem:[#allocation14 + $0x3f4] ss:$8 sps:$4 sm:$0xff]  }
0x1b69   :  { %8277 = vmatpush1.bf16.msra.mxu1 %v10205_v8  ;;  %v10283_v8 = vld [vmem:[#allocation14 + $0x3f0] ss:$8 sps:$4 sm:$0xff]  }
0x1b6a   :  { %8278 = vmatprep.subr.bf16.mxu1 %v10210_v51 }
0x1b6d   :  { %8279 = vmatpush1.bf16.msra.mxu1 %v10208_v1 }
0x1b6e   :  { %8280 = vmatprep.subr.bf16.mxu1 %v10213_v48 }
0x1b71   :  { %8281 = vmatpush1.bf16.msra.mxu1 %v10211_v21 }
0x1b72   :  { %8282 = vmatprep.subr.bf16.mxu1 %v10216_v29 }
0x1b75   :  { %8283 = vmatpush1.bf16.msra.mxu1 %v10214_v53 }
0x1b76   :  { %8284 = vmatprep.subr.bf16.mxu1 %v10219_v18 }
0x1b79   :  { %8285 = vmatpush1.bf16.msra.mxu1 %v10217_v49 }
0x1b7a   :  { %8286 = vmatprep.subr.bf16.mxu1 %v10222_v3 }
0x1b7d   :  { %8287 = vmatpush1.bf16.msra.mxu1 %v10220_v44 }
0x1b7e   :  { %8288 = vmatprep.subr.bf16.mxu1 %v10225_v41 }
0x1b81   :  { %8289 = vmatpush1.bf16.msra.mxu1 %v10223_v61 }
0x1b82   :  { %8290 = vmatprep.subr.bf16.mxu1 %v10228_v27 }
0x1b85   :  { %8291 = vmatpush1.bf16.msra.mxu1 %v10226_v6 }
0x1b86   :  { %8292 = vmatprep.subr.bf16.mxu1 %v10231_v17 }
0x1b89   :  { %8293 = vmatpush1.bf16.msra.mxu1 %v10229_v37 }
0x1b8a   :  { %8294 = vmatprep.subr.bf16.mxu1 %v10234_v20 }
0x1b8d   :  { %8295 = vmatpush1.bf16.msra.mxu1 %v10232_v9 }
0x1b8e   :  { %8296 = vmatprep.subr.bf16.mxu1 %v10237_v16 }
0x1b91   :  { %8297 = vmatpush1.bf16.msra.mxu1 %v10235_v38 }
0x1b92   :  { %8319 = vmatprep.subr.bf16.mxu1 %v10240_v12 }
0x1b94   :  { %8299 = vmatmul.mubr.bf16.vlgmr.msra.gmra.mrb[192].mxu1 %v12195_v31  ;;  %v10250_v31 = vld [vmem:[#allocation14 + $0x340] ss:$8 sps:$4 sm:$0xff]  }
0x1b95   :  { %8308 = vmatprep.mubr.bf16.mxu1 %v12206_v0  ;;  %8320 = vmatpush1.bf16.msra.mxu1 %v10238_v33  ;;  %v10276_v0 = vld [vmem:[#allocation14 + $0x3c4] ss:$8 sps:$4 sm:$0xff]  }
0x1b96   :  { %8321 = vmatprep.subr.bf16.mxu1 %v10243_v10 }
0x1b99   :  { %8322 = vmatpush1.bf16.msra.mxu1 %v10241_v25 }
0x1b9a   :  { %8323 = vmatprep.subr.bf16.mxu1 %v10246_v15 }
0x1b9c   :  { %8309 = vmatmul.mubr.bf16.gmra.mrb[196].mxu1 %v12202_v40  ;;  %v10271_v40 = vld [vmem:[#allocation14 + $0x3b0] ss:$8 sps:$4 sm:$0xff]  }
0x1b9d   :  { %8324 = vmatpush1.bf16.msra.mxu1 %v10244_v32  ;;  %8351 = vmatprep.mubr.bf16.mxu1 %v12199_v50  ;;  %v10262_v50 = vld [vmem:[#allocation14 + $0x380] ss:$8 sps:$4 sm:$0xff]  }
0x1b9e   :  { %8325 = vmatprep.subr.bf16.mxu1 %v10249_v62 }
0x1ba1   :  { %8326 = vmatpush1.bf16.msra.mxu1 %v10247_v35 }
0x1ba2   :  { %8327 = vmatprep.subr.bf16.mxu1 %v10252_v52 }
0x1ba5   :  { %8328 = vmatpush1.bf16.msra.mxu1 %v10250_v31 }
0x1ba6   :  { %8329 = vmatprep.subr.bf16.mxu1 %v10255_v59 }
0x1ba9   :  { %8330 = vmatpush1.bf16.msra.mxu1 %v10253_v22 }
0x1baa   :  { %8331 = vmatprep.subr.bf16.mxu1 %v10258_v46 }
0x1bad   :  { %8332 = vmatpush1.bf16.msra.mxu1 %v10256_v28 }
0x1bae   :  { %8333 = vmatprep.subr.bf16.mxu1 %v10261_v54 }
0x1bb1   :  { %8334 = vmatpush1.bf16.msra.mxu1 %v10259_v36 }
0x1bb2   :  { %8335 = vmatprep.subr.bf16.mxu1 %v10264_v23 }
0x1bb5   :  { %8336 = vmatpush1.bf16.msra.mxu1 %v10262_v50 }
0x1bb6   :  { %8337 = vmatprep.subr.bf16.mxu1 %v10267_v34 }
0x1bb9   :  { %8338 = vmatpush1.bf16.msra.mxu1 %v10265_v63 }
0x1bba   :  { %8339 = vmatprep.subr.bf16.mxu1 %v10270_v39 }
0x1bbd   :  { %8340 = vmatpush1.bf16.msra.mxu1 %v10268_v60 }
0x1bbe   :  { %8341 = vmatprep.subr.bf16.mxu1 %v10273_v58 }
0x1bc1   :  { %8342 = vmatpush1.bf16.msra.mxu1 %v10271_v40 }
0x1bc2   :  { %8343 = vmatprep.subr.bf16.mxu1 %v10276_v0 }
0x1bc5   :  { %8344 = vmatpush1.bf16.msra.mxu1 %v10274_v57 }
0x1bc6   :  { %8345 = vmatprep.subr.bf16.mxu1 %v10279_v56 }
0x1bc9   :  { %8346 = vmatpush1.bf16.msra.mxu1 %v10277_v7 }
0x1bca   :  { %8347 = vmatprep.subr.bf16.mxu1 %v10282_v19 }
0x1bcd   :  { %8348 = vmatpush1.bf16.msra.mxu1 %v10280_v11 }
0x1bce   :  { %8349 = vmatprep.subr.bf16.mxu1 %v10285_v4 }
0x1bd1   :  { %8350 = vmatpush1.bf16.msra.mxu1 %v10283_v8 }
0x1bd4   :  { %8352 = vmatmul.mubr.bf16.vlgmr.msra.gmra.mrb[192].mxu1 %v12197_v13 }
0x1bd5   :  { %8361 = vmatprep.mubr.bf16.mxu1 %v12208_v30 }
0x1bdc   :  { %8362 = vmatmul.mubr.bf16.gmra.mrb[196].mxu1 %v12204_v26 }
0x1ca7   :  { %v8353_v51 = vpop.f32.mrb[192].mxu1 }
0x1ca8   :  { %v8372_v1 = vmax.f32 %v8353_v51, 0.0  ;;  %v8355_v48 = vpop.f32.mrb[193].mxu1 }
0x1ca9   :  { %v8373_v21 = vmax.f32 %v8355_v48, 0.0  ;;  %v8357_v29 = vpop.f32.mrb[194].mxu1 }
0x1caa   :  { %v8374_v53 = vmax.f32 %v8357_v29, 0.0  ;;  %v8359_v18 = vpop.f32.mrb[195].mxu1 }
0x1cab   :  { %v8380_v49 = vadd.f32 %v8373_v21, %v8372_v1  ;;  %v8375_v3 = vmax.f32 %v8359_v18, 0.0 }
0x1cad   :  { %v8383_v44 = vadd.f32 %v8375_v3, %v8374_v53  ;;  %8381 = vadd.xlane.f32.xlu0 %v8380_v49  ;;  %v10453_v49 = vld [vmem:[%s12260_s11] sm:$0x3f] }
0x1caf   :  { %8384 = vadd.xlane.f32.xlu1 %v8383_v44  ;;  %v8363_v41 = vpop.f32.mrb[196].mxu1  ;;  %v10454_v44 = vld [vmem:[%s12260_s11 + $0x8] sm:$0x3f]  ;;  %s10685_s11 = smov [#allocation16]  }
0x1cb0   :  { %v8376_v61 = vmax.f32 %v8363_v41, 0.0  ;;  %v8365_v27 = vpop.f32.mrb[197].mxu1  ;;  %s8497_s4 = sshll.u32 %s10685_s11, 4  ;;  %s8498_s4 = int_to_ptr.vmem [resolvable:$true] %s8497_s4 }
0x1cb1   :  { %v8377_v13 = vmax.f32 %v8365_v27, 0.0  ;;  %v8367_v6 = vpop.f32.mrb[198].mxu1  ;;  %s10631_s30 = scalar_lea.vmem %s8498_s4, 1024  ;;  %p10636_p9 = scmp.lt.s32.totalorder %s8498_s4, %s8498_s4 }
0x1cb2   :  { %v8378_v30 = vmax.f32 %v8367_v6, 0.0  ;;  %v8369_v17 = vpop.f32.mrb[199].mxu1  ;;  %p10632_p8 = scmp.ne.s32.totalorder %s8498_s4, %s10631_s30  ;;  %p10637_p10 = scmp.lt.s32.totalorder %s10631_s30, %s10631_s30 }
0x1cb3   :  { %v8386_v26 = vadd.f32 %v8377_v13, %v8376_v61  ;;  %v8379_v37 = vmax.f32 %v8369_v17, 0.0 }
0x1cb4   :  { %p10638_p11 = por %p10637_p10, %p10636_p9 }
0x1cb5   :  { %v8389_v20 = vadd.f32 %v8379_v37, %v8378_v30  ;;  %8387 = vadd.xlane.f32.xlu0 %v8386_v26 }
0x1cb6   :  { %p10639_p12 = pnand %p10638_p11, %p10632_p8 }
0x1cb7   :  { %8390 = vadd.xlane.f32.xlu1 %v8389_v20 }
0x1d3a   :  { %v8382_v9 = vpop.xlane.xlu0 %8381 }
0x1d3b   :  { %v8392_v16 = vmul.f32 0.00390625, %v8382_v9 }
0x1d3c   :  { %v8385_v38 = vpop.xlane.xlu1 %8384 }
0x1d3d   :  { %v8396_v12 = vsub.f32 %v8372_v1, %v8392_v16  ;;  %v8397_v33 = vsub.f32 %v8373_v21, %v8392_v16  ;;  %v8393_v10 = vmul.f32 0.00390625, %v8385_v38  ;;  %v8446_v1 = vsub.s32 4, %v11444_v43 }
0x1d3f   :  { %v8404_v25 = vmul.f32 %v8396_v12, %v8396_v12  ;;  %v8405_v15 = vmul.f32 %v8397_v33, %v8397_v33  ;;  %v8398_v32 = vsub.f32 %v8374_v53, %v8393_v10  ;;  %v8399_v62 = vsub.f32 %v8375_v3, %v8393_v10 }
0x1d40   :  { %v8462_v53 = vsub.s32 5, %v11444_v43  ;;  %v8447_v3 = vrot.slane %v10453_v49, %v8446_v1  ;;  %v8451_v41 = vrot.slane %v10454_v44, %v8446_v1 }
0x1d41   :  { %v8406_v35 = vmul.f32 %v8398_v32, %v8398_v32  ;;  %v8407_v52 = vmul.f32 %v8399_v62, %v8399_v62  ;;  %v8412_v31 = vadd.f32 %v8405_v15, %v8404_v25 }
0x1d42   :  { %v8388_v59 = vpop.xlane.xlu0 %8387  ;;  %v8463_v27 = vrot.slane %v10453_v49, %v8462_v53 }
0x1d43   :  { %v8394_v22 = vmul.f32 0.00390625, %v8388_v59  ;;  %8413 = vadd.xlane.f32.xlu0 %v8412_v31  ;;  %v8415_v46 = vadd.f32 %v8407_v52, %v8406_v35 }
0x1d44   :  { %v8391_v28 = vpop.xlane.xlu1 %8390 }
0x1d45   :  { %v8400_v54 = vsub.f32 %v8376_v61, %v8394_v22  ;;  %v8401_v36 = vsub.f32 %v8377_v13, %v8394_v22  ;;  %v8395_v23 = vmul.f32 0.00390625, %v8391_v28  ;;  %8416 = vadd.xlane.f32.xlu1 %v8415_v46  ;;  %v8467_v13 = vrot.slane %v10454_v44, %v8462_v53 }
0x1d47   :  { %v8408_v50 = vmul.f32 %v8400_v54, %v8400_v54  ;;  %v8409_v34 = vmul.f32 %v8401_v36, %v8401_v36  ;;  %v8402_v63 = vsub.f32 %v8378_v30, %v8395_v23  ;;  %v8403_v39 = vsub.f32 %v8379_v37, %v8395_v23 }
0x1d49   :  { %v8410_v60 = vmul.f32 %v8402_v63, %v8402_v63  ;;  %v8411_v58 = vmul.f32 %v8403_v39, %v8403_v39  ;;  %v8418_v40 = vadd.f32 %v8409_v34, %v8408_v50 }
0x1d4b   :  { %8419 = vadd.xlane.f32.xlu0 %v8418_v40  ;;  %v8421_v0 = vadd.f32 %v8411_v58, %v8410_v60 }
0x1d4d   :  { %8422 = vadd.xlane.f32.xlu1 %v8421_v0 }
0x1dd0   :  { %v8414_v57 = vpop.xlane.xlu0 %8413 }
0x1dd1   :  { %v8424_v56 = vmul.f32 0.00390625, %v8414_v57 }
0x1dd2   :  { %v8417_v7 = vpop.xlane.xlu1 %8416 }
0x1dd3   :  { %v8428_v19 = vadd.f32 1e-05, %v8424_v56  ;;  %v8425_v11 = vmul.f32 0.00390625, %v8417_v7 }
0x1dd5   :  { %10430 = vrsqrt.f32 %v8428_v19  ;;  %v8429_v4 = vadd.f32 1e-05, %v8425_v11 }
0x1dd7   :  { %10432 = vrsqrt.f32 %v8429_v4 }
0x1dd8   :  { %v8420_v8 = vpop.xlane.xlu0 %8419 }
0x1dd9   :  { %v8426_v51 = vmul.f32 0.00390625, %v8420_v8 }
0x1dda   :  { %v8423_v48 = vpop.xlane.xlu1 %8422 }
0x1ddb   :  { %v8430_v21 = vadd.f32 1e-05, %v8426_v51  ;;  %v8427_v29 = vmul.f32 0.00390625, %v8423_v48 }
0x1ddd   :  { %10434 = vrsqrt.f32 %v8430_v21  ;;  %v8431_v18 = vadd.f32 1e-05, %v8427_v29 }
0x1ddf   :  { %v10431_v61 = vpop.eup %10430  ;;  %10436 = vrsqrt.f32 %v8431_v18 }
0x1de0   :  { %v8436_v6 = vmul.f32 %v10431_v61, %v8396_v12  ;;  %v8437_v30 = vmul.f32 %v10431_v61, %v8397_v33 }
0x1de1   :  { %v10433_v17 = vpop.eup %10432 }
0x1de2   :  { %v8452_v43 = vmul.f32 %v8447_v3, %v8436_v6  ;;  %v8453_v26 = vmul.f32 %v8451_v41, %v8437_v30  ;;  %v8438_v37 = vmul.f32 %v10433_v17, %v8398_v32  ;;  %v8439_v20 = vmul.f32 %v10433_v17, %v8399_v62 }
0x1de4   :  { %v8468_v9 = vadd.f32 %v8463_v27, %v8452_v43  ;;  %v8469_v16 = vadd.f32 %v8467_v13, %v8453_v26  ;;  %v8454_v38 = vmul.f32 %v8447_v3, %v8438_v37  ;;  %v8455_v10 = vmul.f32 %v8451_v41, %v8439_v20 }
0x1de6   :  { %v8476_v25 = vadd.f32 %v8468_v9, %v12133_v42  ;;  %v8477_v15 = vadd.f32 %v8469_v16, %v12127_v5  ;;  %v8470_v35 = vadd.f32 %v8463_v27, %v8454_v38  ;;  %v8471_v52 = vadd.f32 %v8467_v13, %v8455_v10 }
0x1de7   :  { %v10435_v31 = vpop.eup %10434 }
0x1de8   :  { %8484 = vst [vmem:[#allocation16] sm:$0xff] %v8476_v25  ;;  %8485 = vst [vmem:[#allocation16 + $0x8] sm:$0xff] %v8477_v15  ;;  %v8478_v12 = vadd.f32 %v8470_v35, %v12136_v55  ;;  %v8479_v33 = vadd.f32 %v8471_v52, %v12130_v47  ;;  %v8440_v59 = vmul.f32 %v10435_v31, %v8400_v54 }
0x1de9   :  { %v8441_v32 = vmul.f32 %v10435_v31, %v8401_v36  ;;  %v10437_v62 = vpop.eup %10436 }
0x1dea   :  { %8486 = vst [vmem:[#allocation16 + $0x10] sm:$0xff] %v8478_v12  ;;  %8487 = vst [vmem:[#allocation16 + $0x18] sm:$0xff] %v8479_v33  ;;  %v8456_v22 = vmul.f32 %v8447_v3, %v8440_v59  ;;  %v8442_v28 = vmul.f32 %v10437_v62, %v8402_v63  ;;  %v8443_v42 = vmul.f32 %v10437_v62, %v8403_v39 }
0x1deb   :  { %v8457_v46 = vmul.f32 %v8451_v41, %v8441_v32 }
0x1dec   :  { %v8472_v23 = vadd.f32 %v8463_v27, %v8456_v22  ;;  %v8458_v50 = vmul.f32 %v8447_v3, %v8442_v28  ;;  %v8459_v34 = vmul.f32 %v8451_v41, %v8443_v42 }
0x1ded   :  { %v8473_v5 = vadd.f32 %v8467_v13, %v8457_v46 }
0x1dee   :  { %v8480_v60 = vadd.f32 %v8472_v23, %v12175_v45  ;;  %v8474_v47 = vadd.f32 %v8463_v27, %v8458_v50  ;;  %v8475_v54 = vadd.f32 %v8467_v13, %v8459_v34 }
0x1def   :  { %v8481_v55 = vadd.f32 %v8473_v5, %v12169_v24 }
0x1df0   :  { %8488 = vst [vmem:[#allocation16 + $0x20] sm:$0xff] %v8480_v60  ;;  %v8482_v36 = vadd.f32 %v8474_v47, %v12178_v14  ;;  %v8483_v58 = vadd.f32 %v8475_v54, %v12172_v2 }
0x1df1   :  { %8489 = vst [vmem:[#allocation16 + $0x28] sm:$0xff] %v8481_v55 }
0x1df2   :  { %8490 = vst [vmem:[#allocation16 + $0x30] sm:$0xff] %v8482_v36  ;;  %8491 = vst [vmem:[#allocation16 + $0x38] sm:$0xff] %v8483_v58 }
0x1df3   :  { %10642 = shalt.err (!%p10639_p12)
}
0x1df4   :  { %s10643_s28 = scalar_lea.hbm %s12261_s12, 1024 }
0x1df5   :  { %p10644_p13 = scmp.ne.s32.totalorder %s12261_s12, %s10643_s28  ;;  %p10647_p0 = scmp.lt.u32.totalorder %s10643_s28, %s12261_s12 }
0x1df7   :  { %p10649_p1 = pnand %p10647_p0, %p10644_p13 }
0x1df9   :  { %10652 = shalt.err (!%p10649_p1)
}
0x1dfa   :  { %8503 = dma.vmem_to_hbm [thread:$0]  %s8498_s4, 1024, %s12261_s12, [#allocation4], %s10673_s8, %s10673_s8, %s10674_s20  }
0x1dfb   :  { %10663 = dma.done.wait [#allocation4], 1024  }
0x1dfc   :  { %10664 = vsyncadd [#allocation4], 4294966272 }
0x1dfd   :  { %8507 = vsyncpa [#allocation3], 1 }
0x1dfe   :  { %8508 = vsyncpa [#allocation6], 1 }
0x1dff   :  { %8509 = vsyncpa [#allocation9], 1 }
0x1e00   :  { %8510 = vsyncpa [#allocation12], 1 }
0x1e01   :  { %8511 = vsyncpa [#allocation15], 1 }
0x1e02   :  { %8512 = vsyncpa [#allocation4], 1 }

</bundles_post_ra>
